<compile_context>
chip_gen: v7x
topology: tpu7x:2x2x1
jax: 0.10.0
libtpu: 0.0.40
codegen_flags: <defaults>
</compile_context>

<pallas_src>
import jax
import jax.numpy as jnp
from jax import lax
from jax.experimental import pallas as pl
from jax.experimental.pallas import tpu as pltpu

# ---- module constants (from GPT.py) ----
n_embed = 384
n_heads = 6
head_size = n_embed // n_heads   # 64
block_size = 256
dropout = 0.2                    # unused at inference

# TODO(synk): dropout is a no-op here (eval mode); training-mode dropout would
#             need pltpu.prng_seed/prng_random_bits + masking.
# TODO(synk): on v7x with B==1 and large T, add a parallel query-tile grid axis
#             so both TensorCores get work (single batch -> single parallel step).


def _mha_fused_kernel(x_ref, wqkv_ref, wproj_ref, bias_ref, o_ref):
    """Fused multi-head causal attention + output projection, all heads per step.

    grid = (B // Bt,)

      x_ref    : (Bt, T, C)        f32
      wqkv_ref : (C, H*3*hs)       bf16  (VMEM-resident; scale folded into Q cols)
      wproj_ref: (C, C)            bf16  (VMEM-resident)
      bias_ref : (1, C)            f32
      o_ref    : (Bt, T, C)        out dtype
    """
    Bt, T, C = x_ref.shape
    hs = head_size

    # One wide QKV matmul for Bt batch rows and all heads: (Bt*T, C) x (C, 3*C).
    x = x_ref[...].reshape(Bt * T, C).astype(jnp.bfloat16)
    qkv = jnp.dot(x, wqkv_ref[...],
                  preferred_element_type=jnp.float32)            # (Bt*T, H*3*hs) f32

    # Causal mask, built once per grid step.
    row = lax.broadcasted_iota(jnp.int32, (T, T), 0)
    col = lax.broadcasted_iota(jnp.int32, (T, T), 1)
    above_diag = col > row

    batch_outs = []
    for b in range(Bt):                                          # static unroll
        r0 = b * T
        head_outs = []
        for h in range(n_heads):                                 # static unroll
            base = h * 3 * hs
            q = qkv[r0:r0 + T, base:base + hs].astype(jnp.bfloat16)           # (T, hs)
            k = qkv[r0:r0 + T, base + hs:base + 2 * hs].astype(jnp.bfloat16)  # (T, hs)
            v = qkv[r0:r0 + T, base + 2 * hs:base + 3 * hs].astype(jnp.bfloat16)

            # q @ k^T without an explicit transpose (scale already folded into Wq).
            s = lax.dot_general(q, k, (((1,), (1,)), ((), ())),
                                preferred_element_type=jnp.float32)           # (T, T)
            s = jnp.where(above_diag, -1e30, s)

            # numerically-stable softmax in f32; normalize AFTER the PV matmul
            s = s - jnp.max(s, axis=-1, keepdims=True)
            p = jnp.exp(s)
            denom = jnp.sum(p, axis=-1, keepdims=True)                        # (T, 1)

            head_unnorm = jnp.dot(p.astype(jnp.bfloat16), v,
                                  preferred_element_type=jnp.float32)         # (T, hs)
            head_out = head_unnorm * pl.reciprocal(denom, approx=True)
            head_outs.append(head_out.astype(jnp.bfloat16))

        # torch.cat order: head h occupies columns [h*hs, (h+1)*hs).
        batch_outs.append(jnp.concatenate(head_outs, axis=-1))               # (T, C)

    heads_cat = jnp.concatenate(batch_outs, axis=0)                           # (Bt*T, C)

    # Single merged output projection: (Bt*T, 384) x (384, 384), K=384.
    out = jnp.dot(heads_cat, wproj_ref[...],
                  preferred_element_type=jnp.float32) + bias_ref[...]         # (Bt*T, C)
    o_ref[...] = out.reshape(Bt, T, C).astype(o_ref.dtype)


def _pack_qkv_weights(wq, wk, wv, scale):
    """(H, C, hs) x3 -> (C, H*3*hs) bf16, head-major [q_h | k_h | v_h] layout.

    The attention scale is folded into the Q columns (zero in-kernel ops).
    """
    H, C, hs = wq.shape
    per_head = jnp.concatenate([wq * scale, wk, wv], axis=-1)     # (H, C, 3*hs)
    packed = jnp.transpose(per_head, (1, 0, 2)).reshape(C, H * 3 * hs)
    return packed.astype(jnp.bfloat16)


def _pick_batch_tile(B, T):
    """Largest divisor of B with Bt*T around >=256 rows (MXU fill), capped at B."""
    target = max(1, pl.cdiv(256, T))
    for cand in range(min(B, target), 0, -1):
        if B % cand == 0:
            return cand
    return 1


def multi_head_attention(x, wq, wk, wv, w_proj, b_proj):
    """x: (B, T, C);  wq/wk/wv: (H, C, hs);  w_proj: (C, C) (pre-transposed);
    b_proj: (1, C)."""
    B, T, C = x.shape
    H, _, hs = wq.shape
    assert C == n_embed and H == n_heads and hs == head_size
    assert T % 8 == 0 and T <= block_size

    # NOTE: reference scales scores by C**-0.5 with C = n_embed (x.shape[-1]),
    # exactly as GPT.py's Head.forward does (not head_size**-0.5).
    scale = float(C) ** -0.5

    Bt = _pick_batch_tile(B, T)
    qkv_n = H * 3 * hs                                            # 1152

    wqkv = _pack_qkv_weights(wq, wk, wv, scale)                   # (C, 1152) bf16
    w_proj_b = w_proj.astype(jnp.bfloat16)                        # (C, C) bf16

    return pl.pallas_call(
        _mha_fused_kernel,
        out_shape=jax.ShapeDtypeStruct((B, T, C), x.dtype),
        grid_spec=pltpu.PrefetchScalarGridSpec(
            num_scalar_prefetch=0,
            grid=(B // Bt,),
            in_specs=[
                pl.BlockSpec((Bt, T, C), lambda b: (b, 0, 0)),        # x
                pl.BlockSpec((C, qkv_n), lambda b: (0, 0)),           # wqkv (resident)
                pl.BlockSpec((C, C), lambda b: (0, 0)),               # w_proj (resident)
                pl.BlockSpec((1, C), lambda b: (0, 0)),               # bias (resident)
            ],
            out_specs=pl.BlockSpec((Bt, T, C), lambda b: (b, 0, 0)),
        ),
        compiler_params=pltpu.CompilerParams(
            dimension_semantics=("parallel",)),
    )(x, wqkv, w_proj_b, b_proj)


def _reference(x, wq, wk, wv, w_proj, b_proj):
    """Pure-JAX f32 reference matching the PyTorch module (eval mode)."""
    B, T, C = x.shape
    q = jnp.einsum('btc,hcd->bhtd', x, wq)
    k = jnp.einsum('btc,hcd->bhtd', x, wk)
    v = jnp.einsum('btc,hcd->bhtd', x, wv)
    wei = jnp.einsum('bhtd,bhsd->bhts', q, k) * (C ** -0.5)
    mask = jnp.tril(jnp.ones((T, T), dtype=bool))
    wei = jnp.where(mask[None, None], wei, -jnp.inf)
    wei = jax.nn.softmax(wei, axis=-1)
    out = jnp.einsum('bhts,bhsd->bhtd', wei, v)
    out = jnp.transpose(out, (0, 2, 1, 3)).reshape(B, T, C)
    return out @ w_proj + b_proj


if __name__ == "__main__":
    key = jax.random.PRNGKey(0)
    kx, kq, kk, kv, kp, kb = jax.random.split(key, 6)

    B, T = 2, 16   # small seq, consistent with block_size=256 (T <= block_size)

    x = jax.random.normal(kx, (B, T, n_embed), dtype=jnp.float32)

    # deterministic parameter init (synthetic, not a checkpoint)
    scale_in = 1.0 / (n_embed ** 0.5)
    wq = jax.random.normal(kq, (n_heads, n_embed, head_size), jnp.float32) * scale_in
    wk = jax.random.normal(kk, (n_heads, n_embed, head_size), jnp.float32) * scale_in
    wv = jax.random.normal(kv, (n_heads, n_embed, head_size), jnp.float32) * scale_in
    w_proj = jax.random.normal(kp, (n_embed, n_embed), jnp.float32) * scale_in
    b_proj = jax.random.normal(kb, (1, n_embed), jnp.float32) * 0.01

    out = multi_head_attention(x, wq, wk, wv, w_proj, b_proj)
    jax.block_until_ready(out)

    assert out.shape == (B, T, n_embed), out.shape
    ref = _reference(x, wq, wk, wv, w_proj, b_proj)
    max_err = float(jnp.max(jnp.abs(out - ref)))
    assert max_err < 0.1, max_err   # bf16 matmul operands + approx reciprocal
    print("KERNEL_OK")
</pallas_src>

<mosaic_0001>
module attributes {stable_mosaic.version = 11 : i64} {
  func.func @_mha_fused_kernel(%arg0: i32, %arg1: memref<2x16x384xf32, #tpu.memory_space<vmem>>, %arg2: memref<384x1152xbf16, #tpu.memory_space<vmem>>, %arg3: memref<384x384xbf16, #tpu.memory_space<vmem>>, %arg4: memref<1x384xf32, #tpu.memory_space<vmem>>, %arg5: memref<2x16x384xf32, #tpu.memory_space<vmem>>) attributes {dimension_semantics = [#tpu.dimension_semantics<parallel>], iteration_bounds = array<i64: 1>, scalar_prefetch = 0 : i64, scratch_operands = 0 : i64, tpu.core_type = #tpu.core_type<tc>, window_params = [{transform_indices = @transform_0, window_bounds = array<i64: 2, 16, 384>}, {pipeline_mode = #tpu.pipeline_mode<synchronous>, transform_indices = @transform_1, window_bounds = array<i64: 384, 1152>}, {pipeline_mode = #tpu.pipeline_mode<synchronous>, transform_indices = @transform_2, window_bounds = array<i64: 384, 384>}, {pipeline_mode = #tpu.pipeline_mode<synchronous>, transform_indices = @transform_3, window_bounds = array<i64: 1, 384>}, {transform_indices = @transform_4, window_bounds = array<i64: 2, 16, 384>}]} {
    %c0 = arith.constant 0 : index
    %c0_0 = arith.constant 0 : index
    %c0_1 = arith.constant 0 : index
    %0 = vector.load %arg1[%c0, %c0_0, %c0_1] : memref<2x16x384xf32, #tpu.memory_space<vmem>>, vector<2x16x384xf32>
    %1 = vector.shape_cast %0 : vector<2x16x384xf32> to vector<32x384xf32>
    %2 = arith.truncf %1 : vector<32x384xf32> to vector<32x384xbf16>
    %c0_2 = arith.constant 0 : index
    %c0_3 = arith.constant 0 : index
    %3 = vector.load %arg2[%c0_2, %c0_3] : memref<384x1152xbf16, #tpu.memory_space<vmem>>, vector<384x1152xbf16>
    %cst = arith.constant dense<0.000000e+00> : vector<32x1152xf32>
    %4 = tpu.matmul %2, %3, %cst {dimension_numbers = #tpu.dot_dimension_numbers<[1], [0], [0], [1], [0, 0, 1, 1], [], []>} : vector<32x384xbf16>, vector<384x1152xbf16>, vector<32x1152xf32> -> vector<32x1152xf32>
    %5 = tpu.iota {dimensions = array<i32: 0>} : vector<16x16xi32>
    %6 = tpu.iota {dimensions = array<i32: 1>} : vector<16x16xi32>
    %7 = arith.cmpi sgt, %6, %5 : vector<16x16xi32>
    %8 = vector.extract_strided_slice %4 {offsets = [0, 0], sizes = [16, 64], strides = [1, 1]} : vector<32x1152xf32> to vector<16x64xf32>
    %9 = arith.truncf %8 : vector<16x64xf32> to vector<16x64xbf16>
    %10 = vector.extract_strided_slice %4 {offsets = [0, 64], sizes = [16, 64], strides = [1, 1]} : vector<32x1152xf32> to vector<16x64xf32>
    %11 = arith.truncf %10 : vector<16x64xf32> to vector<16x64xbf16>
    %12 = vector.extract_strided_slice %4 {offsets = [0, 128], sizes = [16, 64], strides = [1, 1]} : vector<32x1152xf32> to vector<16x64xf32>
    %13 = arith.truncf %12 : vector<16x64xf32> to vector<16x64xbf16>
    %cst_4 = arith.constant dense<0.000000e+00> : vector<16x16xf32>
    %14 = tpu.matmul %9, %11, %cst_4 {dimension_numbers = #tpu.dot_dimension_numbers<[1], [1], [0], [0], [0, 0, 1, 0], [], []>} : vector<16x64xbf16>, vector<16x64xbf16>, vector<16x16xf32> -> vector<16x16xf32>
    %cst_5 = arith.constant -1.000000e+30 : f32
    %15 = vector.broadcast %cst_5 : f32 to vector<16x16xf32>
    %16 = arith.select %7, %15, %14 : vector<16x16xi1>, vector<16x16xf32>
    %cst_6 = arith.constant dense<0xFF800000> : vector<16xf32>
    %17 = vector.multi_reduction <maximumf>, %16, %cst_6 [1] : vector<16x16xf32> to vector<16xf32>
    %18 = vector.shape_cast %17 : vector<16xf32> to vector<16x1xf32>
    %19 = vector.broadcast %18 : vector<16x1xf32> to vector<16x16xf32>
    %20 = arith.subf %16, %19 : vector<16x16xf32>
    %21 = math.exp %20 : vector<16x16xf32>
    %cst_7 = arith.constant dense<0.000000e+00> : vector<16xf32>
    %22 = vector.multi_reduction <add>, %21, %cst_7 [1] : vector<16x16xf32> to vector<16xf32>
    %23 = vector.shape_cast %22 : vector<16xf32> to vector<16x1xf32>
    %24 = arith.truncf %21 : vector<16x16xf32> to vector<16x16xbf16>
    %cst_8 = arith.constant dense<0.000000e+00> : vector<16x64xf32>
    %25 = tpu.matmul %24, %13, %cst_8 {dimension_numbers = #tpu.dot_dimension_numbers<[1], [0], [0], [1], [0, 0, 1, 1], [], []>} : vector<16x16xbf16>, vector<16x64xbf16>, vector<16x64xf32> -> vector<16x64xf32>
    %26 = tpu.reciprocal %23 {approx = true} : vector<16x1xf32> -> vector<16x1xf32>
    %27 = vector.broadcast %26 : vector<16x1xf32> to vector<16x64xf32>
    %28 = arith.mulf %25, %27 : vector<16x64xf32>
    %29 = arith.truncf %28 : vector<16x64xf32> to vector<16x64xbf16>
    %30 = vector.extract_strided_slice %4 {offsets = [0, 192], sizes = [16, 64], strides = [1, 1]} : vector<32x1152xf32> to vector<16x64xf32>
    %31 = arith.truncf %30 : vector<16x64xf32> to vector<16x64xbf16>
    %32 = vector.extract_strided_slice %4 {offsets = [0, 256], sizes = [16, 64], strides = [1, 1]} : vector<32x1152xf32> to vector<16x64xf32>
    %33 = arith.truncf %32 : vector<16x64xf32> to vector<16x64xbf16>
    %34 = vector.extract_strided_slice %4 {offsets = [0, 320], sizes = [16, 64], strides = [1, 1]} : vector<32x1152xf32> to vector<16x64xf32>
    %35 = arith.truncf %34 : vector<16x64xf32> to vector<16x64xbf16>
    %cst_9 = arith.constant dense<0.000000e+00> : vector<16x16xf32>
    %36 = tpu.matmul %31, %33, %cst_9 {dimension_numbers = #tpu.dot_dimension_numbers<[1], [1], [0], [0], [0, 0, 1, 0], [], []>} : vector<16x64xbf16>, vector<16x64xbf16>, vector<16x16xf32> -> vector<16x16xf32>
    %cst_10 = arith.constant -1.000000e+30 : f32
    %37 = vector.broadcast %cst_10 : f32 to vector<16x16xf32>
    %38 = arith.select %7, %37, %36 : vector<16x16xi1>, vector<16x16xf32>
    %cst_11 = arith.constant dense<0xFF800000> : vector<16xf32>
    %39 = vector.multi_reduction <maximumf>, %38, %cst_11 [1] : vector<16x16xf32> to vector<16xf32>
    %40 = vector.shape_cast %39 : vector<16xf32> to vector<16x1xf32>
    %41 = vector.broadcast %40 : vector<16x1xf32> to vector<16x16xf32>
    %42 = arith.subf %38, %41 : vector<16x16xf32>
    %43 = math.exp %42 : vector<16x16xf32>
    %cst_12 = arith.constant dense<0.000000e+00> : vector<16xf32>
    %44 = vector.multi_reduction <add>, %43, %cst_12 [1] : vector<16x16xf32> to vector<16xf32>
    %45 = vector.shape_cast %44 : vector<16xf32> to vector<16x1xf32>
    %46 = arith.truncf %43 : vector<16x16xf32> to vector<16x16xbf16>
    %cst_13 = arith.constant dense<0.000000e+00> : vector<16x64xf32>
    %47 = tpu.matmul %46, %35, %cst_13 {dimension_numbers = #tpu.dot_dimension_numbers<[1], [0], [0], [1], [0, 0, 1, 1], [], []>} : vector<16x16xbf16>, vector<16x64xbf16>, vector<16x64xf32> -> vector<16x64xf32>
    %48 = tpu.reciprocal %45 {approx = true} : vector<16x1xf32> -> vector<16x1xf32>
    %49 = vector.broadcast %48 : vector<16x1xf32> to vector<16x64xf32>
    %50 = arith.mulf %47, %49 : vector<16x64xf32>
    %51 = arith.truncf %50 : vector<16x64xf32> to vector<16x64xbf16>
    %52 = vector.extract_strided_slice %4 {offsets = [0, 384], sizes = [16, 64], strides = [1, 1]} : vector<32x1152xf32> to vector<16x64xf32>
    %53 = arith.truncf %52 : vector<16x64xf32> to vector<16x64xbf16>
    %54 = vector.extract_strided_slice %4 {offsets = [0, 448], sizes = [16, 64], strides = [1, 1]} : vector<32x1152xf32> to vector<16x64xf32>
    %55 = arith.truncf %54 : vector<16x64xf32> to vector<16x64xbf16>
    %56 = vector.extract_strided_slice %4 {offsets = [0, 512], sizes = [16, 64], strides = [1, 1]} : vector<32x1152xf32> to vector<16x64xf32>
    %57 = arith.truncf %56 : vector<16x64xf32> to vector<16x64xbf16>
    %cst_14 = arith.constant dense<0.000000e+00> : vector<16x16xf32>
    %58 = tpu.matmul %53, %55, %cst_14 {dimension_numbers = #tpu.dot_dimension_numbers<[1], [1], [0], [0], [0, 0, 1, 0], [], []>} : vector<16x64xbf16>, vector<16x64xbf16>, vector<16x16xf32> -> vector<16x16xf32>
    %cst_15 = arith.constant -1.000000e+30 : f32
    %59 = vector.broadcast %cst_15 : f32 to vector<16x16xf32>
    %60 = arith.select %7, %59, %58 : vector<16x16xi1>, vector<16x16xf32>
    %cst_16 = arith.constant dense<0xFF800000> : vector<16xf32>
    %61 = vector.multi_reduction <maximumf>, %60, %cst_16 [1] : vector<16x16xf32> to vector<16xf32>
    %62 = vector.shape_cast %61 : vector<16xf32> to vector<16x1xf32>
    %63 = vector.broadcast %62 : vector<16x1xf32> to vector<16x16xf32>
    %64 = arith.subf %60, %63 : vector<16x16xf32>
    %65 = math.exp %64 : vector<16x16xf32>
    %cst_17 = arith.constant dense<0.000000e+00> : vector<16xf32>
    %66 = vector.multi_reduction <add>, %65, %cst_17 [1] : vector<16x16xf32> to vector<16xf32>
    %67 = vector.shape_cast %66 : vector<16xf32> to vector<16x1xf32>
    %68 = arith.truncf %65 : vector<16x16xf32> to vector<16x16xbf16>
    %cst_18 = arith.constant dense<0.000000e+00> : vector<16x64xf32>
    %69 = tpu.matmul %68, %57, %cst_18 {dimension_numbers = #tpu.dot_dimension_numbers<[1], [0], [0], [1], [0, 0, 1, 1], [], []>} : vector<16x16xbf16>, vector<16x64xbf16>, vector<16x64xf32> -> vector<16x64xf32>
    %70 = tpu.reciprocal %67 {approx = true} : vector<16x1xf32> -> vector<16x1xf32>
    %71 = vector.broadcast %70 : vector<16x1xf32> to vector<16x64xf32>
    %72 = arith.mulf %69, %71 : vector<16x64xf32>
    %73 = arith.truncf %72 : vector<16x64xf32> to vector<16x64xbf16>
    %74 = vector.extract_strided_slice %4 {offsets = [0, 576], sizes = [16, 64], strides = [1, 1]} : vector<32x1152xf32> to vector<16x64xf32>
    %75 = arith.truncf %74 : vector<16x64xf32> to vector<16x64xbf16>
    %76 = vector.extract_strided_slice %4 {offsets = [0, 640], sizes = [16, 64], strides = [1, 1]} : vector<32x1152xf32> to vector<16x64xf32>
    %77 = arith.truncf %76 : vector<16x64xf32> to vector<16x64xbf16>
    %78 = vector.extract_strided_slice %4 {offsets = [0, 704], sizes = [16, 64], strides = [1, 1]} : vector<32x1152xf32> to vector<16x64xf32>
    %79 = arith.truncf %78 : vector<16x64xf32> to vector<16x64xbf16>
    %cst_19 = arith.constant dense<0.000000e+00> : vector<16x16xf32>
    %80 = tpu.matmul %75, %77, %cst_19 {dimension_numbers = #tpu.dot_dimension_numbers<[1], [1], [0], [0], [0, 0, 1, 0], [], []>} : vector<16x64xbf16>, vector<16x64xbf16>, vector<16x16xf32> -> vector<16x16xf32>
    %cst_20 = arith.constant -1.000000e+30 : f32
    %81 = vector.broadcast %cst_20 : f32 to vector<16x16xf32>
    %82 = arith.select %7, %81, %80 : vector<16x16xi1>, vector<16x16xf32>
    %cst_21 = arith.constant dense<0xFF800000> : vector<16xf32>
    %83 = vector.multi_reduction <maximumf>, %82, %cst_21 [1] : vector<16x16xf32> to vector<16xf32>
    %84 = vector.shape_cast %83 : vector<16xf32> to vector<16x1xf32>
    %85 = vector.broadcast %84 : vector<16x1xf32> to vector<16x16xf32>
    %86 = arith.subf %82, %85 : vector<16x16xf32>
    %87 = math.exp %86 : vector<16x16xf32>
    %cst_22 = arith.constant dense<0.000000e+00> : vector<16xf32>
    %88 = vector.multi_reduction <add>, %87, %cst_22 [1] : vector<16x16xf32> to vector<16xf32>
    %89 = vector.shape_cast %88 : vector<16xf32> to vector<16x1xf32>
    %90 = arith.truncf %87 : vector<16x16xf32> to vector<16x16xbf16>
    %cst_23 = arith.constant dense<0.000000e+00> : vector<16x64xf32>
    %91 = tpu.matmul %90, %79, %cst_23 {dimension_numbers = #tpu.dot_dimension_numbers<[1], [0], [0], [1], [0, 0, 1, 1], [], []>} : vector<16x16xbf16>, vector<16x64xbf16>, vector<16x64xf32> -> vector<16x64xf32>
    %92 = tpu.reciprocal %89 {approx = true} : vector<16x1xf32> -> vector<16x1xf32>
    %93 = vector.broadcast %92 : vector<16x1xf32> to vector<16x64xf32>
    %94 = arith.mulf %91, %93 : vector<16x64xf32>
    %95 = arith.truncf %94 : vector<16x64xf32> to vector<16x64xbf16>
    %96 = vector.extract_strided_slice %4 {offsets = [0, 768], sizes = [16, 64], strides = [1, 1]} : vector<32x1152xf32> to vector<16x64xf32>
    %97 = arith.truncf %96 : vector<16x64xf32> to vector<16x64xbf16>
    %98 = vector.extract_strided_slice %4 {offsets = [0, 832], sizes = [16, 64], strides = [1, 1]} : vector<32x1152xf32> to vector<16x64xf32>
    %99 = arith.truncf %98 : vector<16x64xf32> to vector<16x64xbf16>
    %100 = vector.extract_strided_slice %4 {offsets = [0, 896], sizes = [16, 64], strides = [1, 1]} : vector<32x1152xf32> to vector<16x64xf32>
    %101 = arith.truncf %100 : vector<16x64xf32> to vector<16x64xbf16>
    %cst_24 = arith.constant dense<0.000000e+00> : vector<16x16xf32>
    %102 = tpu.matmul %97, %99, %cst_24 {dimension_numbers = #tpu.dot_dimension_numbers<[1], [1], [0], [0], [0, 0, 1, 0], [], []>} : vector<16x64xbf16>, vector<16x64xbf16>, vector<16x16xf32> -> vector<16x16xf32>
    %cst_25 = arith.constant -1.000000e+30 : f32
    %103 = vector.broadcast %cst_25 : f32 to vector<16x16xf32>
    %104 = arith.select %7, %103, %102 : vector<16x16xi1>, vector<16x16xf32>
    %cst_26 = arith.constant dense<0xFF800000> : vector<16xf32>
    %105 = vector.multi_reduction <maximumf>, %104, %cst_26 [1] : vector<16x16xf32> to vector<16xf32>
    %106 = vector.shape_cast %105 : vector<16xf32> to vector<16x1xf32>
    %107 = vector.broadcast %106 : vector<16x1xf32> to vector<16x16xf32>
    %108 = arith.subf %104, %107 : vector<16x16xf32>
    %109 = math.exp %108 : vector<16x16xf32>
    %cst_27 = arith.constant dense<0.000000e+00> : vector<16xf32>
    %110 = vector.multi_reduction <add>, %109, %cst_27 [1] : vector<16x16xf32> to vector<16xf32>
    %111 = vector.shape_cast %110 : vector<16xf32> to vector<16x1xf32>
    %112 = arith.truncf %109 : vector<16x16xf32> to vector<16x16xbf16>
    %cst_28 = arith.constant dense<0.000000e+00> : vector<16x64xf32>
    %113 = tpu.matmul %112, %101, %cst_28 {dimension_numbers = #tpu.dot_dimension_numbers<[1], [0], [0], [1], [0, 0, 1, 1], [], []>} : vector<16x16xbf16>, vector<16x64xbf16>, vector<16x64xf32> -> vector<16x64xf32>
    %114 = tpu.reciprocal %111 {approx = true} : vector<16x1xf32> -> vector<16x1xf32>
    %115 = vector.broadcast %114 : vector<16x1xf32> to vector<16x64xf32>
    %116 = arith.mulf %113, %115 : vector<16x64xf32>
    %117 = arith.truncf %116 : vector<16x64xf32> to vector<16x64xbf16>
    %118 = vector.extract_strided_slice %4 {offsets = [0, 960], sizes = [16, 64], strides = [1, 1]} : vector<32x1152xf32> to vector<16x64xf32>
    %119 = arith.truncf %118 : vector<16x64xf32> to vector<16x64xbf16>
    %120 = vector.extract_strided_slice %4 {offsets = [0, 1024], sizes = [16, 64], strides = [1, 1]} : vector<32x1152xf32> to vector<16x64xf32>
    %121 = arith.truncf %120 : vector<16x64xf32> to vector<16x64xbf16>
    %122 = vector.extract_strided_slice %4 {offsets = [0, 1088], sizes = [16, 64], strides = [1, 1]} : vector<32x1152xf32> to vector<16x64xf32>
    %123 = arith.truncf %122 : vector<16x64xf32> to vector<16x64xbf16>
    %cst_29 = arith.constant dense<0.000000e+00> : vector<16x16xf32>
    %124 = tpu.matmul %119, %121, %cst_29 {dimension_numbers = #tpu.dot_dimension_numbers<[1], [1], [0], [0], [0, 0, 1, 0], [], []>} : vector<16x64xbf16>, vector<16x64xbf16>, vector<16x16xf32> -> vector<16x16xf32>
    %cst_30 = arith.constant -1.000000e+30 : f32
    %125 = vector.broadcast %cst_30 : f32 to vector<16x16xf32>
    %126 = arith.select %7, %125, %124 : vector<16x16xi1>, vector<16x16xf32>
    %cst_31 = arith.constant dense<0xFF800000> : vector<16xf32>
    %127 = vector.multi_reduction <maximumf>, %126, %cst_31 [1] : vector<16x16xf32> to vector<16xf32>
    %128 = vector.shape_cast %127 : vector<16xf32> to vector<16x1xf32>
    %129 = vector.broadcast %128 : vector<16x1xf32> to vector<16x16xf32>
    %130 = arith.subf %126, %129 : vector<16x16xf32>
    %131 = math.exp %130 : vector<16x16xf32>
    %cst_32 = arith.constant dense<0.000000e+00> : vector<16xf32>
    %132 = vector.multi_reduction <add>, %131, %cst_32 [1] : vector<16x16xf32> to vector<16xf32>
    %133 = vector.shape_cast %132 : vector<16xf32> to vector<16x1xf32>
    %134 = arith.truncf %131 : vector<16x16xf32> to vector<16x16xbf16>
    %cst_33 = arith.constant dense<0.000000e+00> : vector<16x64xf32>
    %135 = tpu.matmul %134, %123, %cst_33 {dimension_numbers = #tpu.dot_dimension_numbers<[1], [0], [0], [1], [0, 0, 1, 1], [], []>} : vector<16x16xbf16>, vector<16x64xbf16>, vector<16x64xf32> -> vector<16x64xf32>
    %136 = tpu.reciprocal %133 {approx = true} : vector<16x1xf32> -> vector<16x1xf32>
    %137 = vector.broadcast %136 : vector<16x1xf32> to vector<16x64xf32>
    %138 = arith.mulf %135, %137 : vector<16x64xf32>
    %139 = arith.truncf %138 : vector<16x64xf32> to vector<16x64xbf16>
    %140 = tpu.concatenate %29, %51, %73, %95, %117, %139 in 1 : vector<16x64xbf16>, vector<16x64xbf16>, vector<16x64xbf16>, vector<16x64xbf16>, vector<16x64xbf16>, vector<16x64xbf16> -> vector<16x384xbf16>
    %141 = vector.extract_strided_slice %4 {offsets = [16, 0], sizes = [16, 64], strides = [1, 1]} : vector<32x1152xf32> to vector<16x64xf32>
    %142 = arith.truncf %141 : vector<16x64xf32> to vector<16x64xbf16>
    %143 = vector.extract_strided_slice %4 {offsets = [16, 64], sizes = [16, 64], strides = [1, 1]} : vector<32x1152xf32> to vector<16x64xf32>
    %144 = arith.truncf %143 : vector<16x64xf32> to vector<16x64xbf16>
    %145 = vector.extract_strided_slice %4 {offsets = [16, 128], sizes = [16, 64], strides = [1, 1]} : vector<32x1152xf32> to vector<16x64xf32>
    %146 = arith.truncf %145 : vector<16x64xf32> to vector<16x64xbf16>
    %cst_34 = arith.constant dense<0.000000e+00> : vector<16x16xf32>
    %147 = tpu.matmul %142, %144, %cst_34 {dimension_numbers = #tpu.dot_dimension_numbers<[1], [1], [0], [0], [0, 0, 1, 0], [], []>} : vector<16x64xbf16>, vector<16x64xbf16>, vector<16x16xf32> -> vector<16x16xf32>
    %cst_35 = arith.constant -1.000000e+30 : f32
    %148 = vector.broadcast %cst_35 : f32 to vector<16x16xf32>
    %149 = arith.select %7, %148, %147 : vector<16x16xi1>, vector<16x16xf32>
    %cst_36 = arith.constant dense<0xFF800000> : vector<16xf32>
    %150 = vector.multi_reduction <maximumf>, %149, %cst_36 [1] : vector<16x16xf32> to vector<16xf32>
    %151 = vector.shape_cast %150 : vector<16xf32> to vector<16x1xf32>
    %152 = vector.broadcast %151 : vector<16x1xf32> to vector<16x16xf32>
    %153 = arith.subf %149, %152 : vector<16x16xf32>
    %154 = math.exp %153 : vector<16x16xf32>
    %cst_37 = arith.constant dense<0.000000e+00> : vector<16xf32>
    %155 = vector.multi_reduction <add>, %154, %cst_37 [1] : vector<16x16xf32> to vector<16xf32>
    %156 = vector.shape_cast %155 : vector<16xf32> to vector<16x1xf32>
    %157 = arith.truncf %154 : vector<16x16xf32> to vector<16x16xbf16>
    %cst_38 = arith.constant dense<0.000000e+00> : vector<16x64xf32>
    %158 = tpu.matmul %157, %146, %cst_38 {dimension_numbers = #tpu.dot_dimension_numbers<[1], [0], [0], [1], [0, 0, 1, 1], [], []>} : vector<16x16xbf16>, vector<16x64xbf16>, vector<16x64xf32> -> vector<16x64xf32>
    %159 = tpu.reciprocal %156 {approx = true} : vector<16x1xf32> -> vector<16x1xf32>
    %160 = vector.broadcast %159 : vector<16x1xf32> to vector<16x64xf32>
    %161 = arith.mulf %158, %160 : vector<16x64xf32>
    %162 = arith.truncf %161 : vector<16x64xf32> to vector<16x64xbf16>
    %163 = vector.extract_strided_slice %4 {offsets = [16, 192], sizes = [16, 64], strides = [1, 1]} : vector<32x1152xf32> to vector<16x64xf32>
    %164 = arith.truncf %163 : vector<16x64xf32> to vector<16x64xbf16>
    %165 = vector.extract_strided_slice %4 {offsets = [16, 256], sizes = [16, 64], strides = [1, 1]} : vector<32x1152xf32> to vector<16x64xf32>
    %166 = arith.truncf %165 : vector<16x64xf32> to vector<16x64xbf16>
    %167 = vector.extract_strided_slice %4 {offsets = [16, 320], sizes = [16, 64], strides = [1, 1]} : vector<32x1152xf32> to vector<16x64xf32>
    %168 = arith.truncf %167 : vector<16x64xf32> to vector<16x64xbf16>
    %cst_39 = arith.constant dense<0.000000e+00> : vector<16x16xf32>
    %169 = tpu.matmul %164, %166, %cst_39 {dimension_numbers = #tpu.dot_dimension_numbers<[1], [1], [0], [0], [0, 0, 1, 0], [], []>} : vector<16x64xbf16>, vector<16x64xbf16>, vector<16x16xf32> -> vector<16x16xf32>
    %cst_40 = arith.constant -1.000000e+30 : f32
    %170 = vector.broadcast %cst_40 : f32 to vector<16x16xf32>
    %171 = arith.select %7, %170, %169 : vector<16x16xi1>, vector<16x16xf32>
    %cst_41 = arith.constant dense<0xFF800000> : vector<16xf32>
    %172 = vector.multi_reduction <maximumf>, %171, %cst_41 [1] : vector<16x16xf32> to vector<16xf32>
    %173 = vector.shape_cast %172 : vector<16xf32> to vector<16x1xf32>
    %174 = vector.broadcast %173 : vector<16x1xf32> to vector<16x16xf32>
    %175 = arith.subf %171, %174 : vector<16x16xf32>
    %176 = math.exp %175 : vector<16x16xf32>
    %cst_42 = arith.constant dense<0.000000e+00> : vector<16xf32>
    %177 = vector.multi_reduction <add>, %176, %cst_42 [1] : vector<16x16xf32> to vector<16xf32>
    %178 = vector.shape_cast %177 : vector<16xf32> to vector<16x1xf32>
    %179 = arith.truncf %176 : vector<16x16xf32> to vector<16x16xbf16>
    %cst_43 = arith.constant dense<0.000000e+00> : vector<16x64xf32>
    %180 = tpu.matmul %179, %168, %cst_43 {dimension_numbers = #tpu.dot_dimension_numbers<[1], [0], [0], [1], [0, 0, 1, 1], [], []>} : vector<16x16xbf16>, vector<16x64xbf16>, vector<16x64xf32> -> vector<16x64xf32>
    %181 = tpu.reciprocal %178 {approx = true} : vector<16x1xf32> -> vector<16x1xf32>
    %182 = vector.broadcast %181 : vector<16x1xf32> to vector<16x64xf32>
    %183 = arith.mulf %180, %182 : vector<16x64xf32>
    %184 = arith.truncf %183 : vector<16x64xf32> to vector<16x64xbf16>
    %185 = vector.extract_strided_slice %4 {offsets = [16, 384], sizes = [16, 64], strides = [1, 1]} : vector<32x1152xf32> to vector<16x64xf32>
    %186 = arith.truncf %185 : vector<16x64xf32> to vector<16x64xbf16>
    %187 = vector.extract_strided_slice %4 {offsets = [16, 448], sizes = [16, 64], strides = [1, 1]} : vector<32x1152xf32> to vector<16x64xf32>
    %188 = arith.truncf %187 : vector<16x64xf32> to vector<16x64xbf16>
    %189 = vector.extract_strided_slice %4 {offsets = [16, 512], sizes = [16, 64], strides = [1, 1]} : vector<32x1152xf32> to vector<16x64xf32>
    %190 = arith.truncf %189 : vector<16x64xf32> to vector<16x64xbf16>
    %cst_44 = arith.constant dense<0.000000e+00> : vector<16x16xf32>
    %191 = tpu.matmul %186, %188, %cst_44 {dimension_numbers = #tpu.dot_dimension_numbers<[1], [1], [0], [0], [0, 0, 1, 0], [], []>} : vector<16x64xbf16>, vector<16x64xbf16>, vector<16x16xf32> -> vector<16x16xf32>
    %cst_45 = arith.constant -1.000000e+30 : f32
    %192 = vector.broadcast %cst_45 : f32 to vector<16x16xf32>
    %193 = arith.select %7, %192, %191 : vector<16x16xi1>, vector<16x16xf32>
    %cst_46 = arith.constant dense<0xFF800000> : vector<16xf32>
    %194 = vector.multi_reduction <maximumf>, %193, %cst_46 [1] : vector<16x16xf32> to vector<16xf32>
    %195 = vector.shape_cast %194 : vector<16xf32> to vector<16x1xf32>
    %196 = vector.broadcast %195 : vector<16x1xf32> to vector<16x16xf32>
    %197 = arith.subf %193, %196 : vector<16x16xf32>
    %198 = math.exp %197 : vector<16x16xf32>
    %cst_47 = arith.constant dense<0.000000e+00> : vector<16xf32>
    %199 = vector.multi_reduction <add>, %198, %cst_47 [1] : vector<16x16xf32> to vector<16xf32>
    %200 = vector.shape_cast %199 : vector<16xf32> to vector<16x1xf32>
    %201 = arith.truncf %198 : vector<16x16xf32> to vector<16x16xbf16>
    %cst_48 = arith.constant dense<0.000000e+00> : vector<16x64xf32>
    %202 = tpu.matmul %201, %190, %cst_48 {dimension_numbers = #tpu.dot_dimension_numbers<[1], [0], [0], [1], [0, 0, 1, 1], [], []>} : vector<16x16xbf16>, vector<16x64xbf16>, vector<16x64xf32> -> vector<16x64xf32>
    %203 = tpu.reciprocal %200 {approx = true} : vector<16x1xf32> -> vector<16x1xf32>
    %204 = vector.broadcast %203 : vector<16x1xf32> to vector<16x64xf32>
    %205 = arith.mulf %202, %204 : vector<16x64xf32>
    %206 = arith.truncf %205 : vector<16x64xf32> to vector<16x64xbf16>
    %207 = vector.extract_strided_slice %4 {offsets = [16, 576], sizes = [16, 64], strides = [1, 1]} : vector<32x1152xf32> to vector<16x64xf32>
    %208 = arith.truncf %207 : vector<16x64xf32> to vector<16x64xbf16>
    %209 = vector.extract_strided_slice %4 {offsets = [16, 640], sizes = [16, 64], strides = [1, 1]} : vector<32x1152xf32> to vector<16x64xf32>
    %210 = arith.truncf %209 : vector<16x64xf32> to vector<16x64xbf16>
    %211 = vector.extract_strided_slice %4 {offsets = [16, 704], sizes = [16, 64], strides = [1, 1]} : vector<32x1152xf32> to vector<16x64xf32>
    %212 = arith.truncf %211 : vector<16x64xf32> to vector<16x64xbf16>
    %cst_49 = arith.constant dense<0.000000e+00> : vector<16x16xf32>
    %213 = tpu.matmul %208, %210, %cst_49 {dimension_numbers = #tpu.dot_dimension_numbers<[1], [1], [0], [0], [0, 0, 1, 0], [], []>} : vector<16x64xbf16>, vector<16x64xbf16>, vector<16x16xf32> -> vector<16x16xf32>
    %cst_50 = arith.constant -1.000000e+30 : f32
    %214 = vector.broadcast %cst_50 : f32 to vector<16x16xf32>
    %215 = arith.select %7, %214, %213 : vector<16x16xi1>, vector<16x16xf32>
    %cst_51 = arith.constant dense<0xFF800000> : vector<16xf32>
    %216 = vector.multi_reduction <maximumf>, %215, %cst_51 [1] : vector<16x16xf32> to vector<16xf32>
    %217 = vector.shape_cast %216 : vector<16xf32> to vector<16x1xf32>
    %218 = vector.broadcast %217 : vector<16x1xf32> to vector<16x16xf32>
    %219 = arith.subf %215, %218 : vector<16x16xf32>
    %220 = math.exp %219 : vector<16x16xf32>
    %cst_52 = arith.constant dense<0.000000e+00> : vector<16xf32>
    %221 = vector.multi_reduction <add>, %220, %cst_52 [1] : vector<16x16xf32> to vector<16xf32>
    %222 = vector.shape_cast %221 : vector<16xf32> to vector<16x1xf32>
    %223 = arith.truncf %220 : vector<16x16xf32> to vector<16x16xbf16>
    %cst_53 = arith.constant dense<0.000000e+00> : vector<16x64xf32>
    %224 = tpu.matmul %223, %212, %cst_53 {dimension_numbers = #tpu.dot_dimension_numbers<[1], [0], [0], [1], [0, 0, 1, 1], [], []>} : vector<16x16xbf16>, vector<16x64xbf16>, vector<16x64xf32> -> vector<16x64xf32>
    %225 = tpu.reciprocal %222 {approx = true} : vector<16x1xf32> -> vector<16x1xf32>
    %226 = vector.broadcast %225 : vector<16x1xf32> to vector<16x64xf32>
    %227 = arith.mulf %224, %226 : vector<16x64xf32>
    %228 = arith.truncf %227 : vector<16x64xf32> to vector<16x64xbf16>
    %229 = vector.extract_strided_slice %4 {offsets = [16, 768], sizes = [16, 64], strides = [1, 1]} : vector<32x1152xf32> to vector<16x64xf32>
    %230 = arith.truncf %229 : vector<16x64xf32> to vector<16x64xbf16>
    %231 = vector.extract_strided_slice %4 {offsets = [16, 832], sizes = [16, 64], strides = [1, 1]} : vector<32x1152xf32> to vector<16x64xf32>
    %232 = arith.truncf %231 : vector<16x64xf32> to vector<16x64xbf16>
    %233 = vector.extract_strided_slice %4 {offsets = [16, 896], sizes = [16, 64], strides = [1, 1]} : vector<32x1152xf32> to vector<16x64xf32>
    %234 = arith.truncf %233 : vector<16x64xf32> to vector<16x64xbf16>
    %cst_54 = arith.constant dense<0.000000e+00> : vector<16x16xf32>
    %235 = tpu.matmul %230, %232, %cst_54 {dimension_numbers = #tpu.dot_dimension_numbers<[1], [1], [0], [0], [0, 0, 1, 0], [], []>} : vector<16x64xbf16>, vector<16x64xbf16>, vector<16x16xf32> -> vector<16x16xf32>
    %cst_55 = arith.constant -1.000000e+30 : f32
    %236 = vector.broadcast %cst_55 : f32 to vector<16x16xf32>
    %237 = arith.select %7, %236, %235 : vector<16x16xi1>, vector<16x16xf32>
    %cst_56 = arith.constant dense<0xFF800000> : vector<16xf32>
    %238 = vector.multi_reduction <maximumf>, %237, %cst_56 [1] : vector<16x16xf32> to vector<16xf32>
    %239 = vector.shape_cast %238 : vector<16xf32> to vector<16x1xf32>
    %240 = vector.broadcast %239 : vector<16x1xf32> to vector<16x16xf32>
    %241 = arith.subf %237, %240 : vector<16x16xf32>
    %242 = math.exp %241 : vector<16x16xf32>
    %cst_57 = arith.constant dense<0.000000e+00> : vector<16xf32>
    %243 = vector.multi_reduction <add>, %242, %cst_57 [1] : vector<16x16xf32> to vector<16xf32>
    %244 = vector.shape_cast %243 : vector<16xf32> to vector<16x1xf32>
    %245 = arith.truncf %242 : vector<16x16xf32> to vector<16x16xbf16>
    %cst_58 = arith.constant dense<0.000000e+00> : vector<16x64xf32>
    %246 = tpu.matmul %245, %234, %cst_58 {dimension_numbers = #tpu.dot_dimension_numbers<[1], [0], [0], [1], [0, 0, 1, 1], [], []>} : vector<16x16xbf16>, vector<16x64xbf16>, vector<16x64xf32> -> vector<16x64xf32>
    %247 = tpu.reciprocal %244 {approx = true} : vector<16x1xf32> -> vector<16x1xf32>
    %248 = vector.broadcast %247 : vector<16x1xf32> to vector<16x64xf32>
    %249 = arith.mulf %246, %248 : vector<16x64xf32>
    %250 = arith.truncf %249 : vector<16x64xf32> to vector<16x64xbf16>
    %251 = vector.extract_strided_slice %4 {offsets = [16, 960], sizes = [16, 64], strides = [1, 1]} : vector<32x1152xf32> to vector<16x64xf32>
    %252 = arith.truncf %251 : vector<16x64xf32> to vector<16x64xbf16>
    %253 = vector.extract_strided_slice %4 {offsets = [16, 1024], sizes = [16, 64], strides = [1, 1]} : vector<32x1152xf32> to vector<16x64xf32>
    %254 = arith.truncf %253 : vector<16x64xf32> to vector<16x64xbf16>
    %255 = vector.extract_strided_slice %4 {offsets = [16, 1088], sizes = [16, 64], strides = [1, 1]} : vector<32x1152xf32> to vector<16x64xf32>
    %256 = arith.truncf %255 : vector<16x64xf32> to vector<16x64xbf16>
    %cst_59 = arith.constant dense<0.000000e+00> : vector<16x16xf32>
    %257 = tpu.matmul %252, %254, %cst_59 {dimension_numbers = #tpu.dot_dimension_numbers<[1], [1], [0], [0], [0, 0, 1, 0], [], []>} : vector<16x64xbf16>, vector<16x64xbf16>, vector<16x16xf32> -> vector<16x16xf32>
    %cst_60 = arith.constant -1.000000e+30 : f32
    %258 = vector.broadcast %cst_60 : f32 to vector<16x16xf32>
    %259 = arith.select %7, %258, %257 : vector<16x16xi1>, vector<16x16xf32>
    %cst_61 = arith.constant dense<0xFF800000> : vector<16xf32>
    %260 = vector.multi_reduction <maximumf>, %259, %cst_61 [1] : vector<16x16xf32> to vector<16xf32>
    %261 = vector.shape_cast %260 : vector<16xf32> to vector<16x1xf32>
    %262 = vector.broadcast %261 : vector<16x1xf32> to vector<16x16xf32>
    %263 = arith.subf %259, %262 : vector<16x16xf32>
    %264 = math.exp %263 : vector<16x16xf32>
    %cst_62 = arith.constant dense<0.000000e+00> : vector<16xf32>
    %265 = vector.multi_reduction <add>, %264, %cst_62 [1] : vector<16x16xf32> to vector<16xf32>
    %266 = vector.shape_cast %265 : vector<16xf32> to vector<16x1xf32>
    %267 = arith.truncf %264 : vector<16x16xf32> to vector<16x16xbf16>
    %cst_63 = arith.constant dense<0.000000e+00> : vector<16x64xf32>
    %268 = tpu.matmul %267, %256, %cst_63 {dimension_numbers = #tpu.dot_dimension_numbers<[1], [0], [0], [1], [0, 0, 1, 1], [], []>} : vector<16x16xbf16>, vector<16x64xbf16>, vector<16x64xf32> -> vector<16x64xf32>
    %269 = tpu.reciprocal %266 {approx = true} : vector<16x1xf32> -> vector<16x1xf32>
    %270 = vector.broadcast %269 : vector<16x1xf32> to vector<16x64xf32>
    %271 = arith.mulf %268, %270 : vector<16x64xf32>
    %272 = arith.truncf %271 : vector<16x64xf32> to vector<16x64xbf16>
    %273 = tpu.concatenate %162, %184, %206, %228, %250, %272 in 1 : vector<16x64xbf16>, vector<16x64xbf16>, vector<16x64xbf16>, vector<16x64xbf16>, vector<16x64xbf16>, vector<16x64xbf16> -> vector<16x384xbf16>
    %274 = tpu.concatenate %140, %273 in 0 : vector<16x384xbf16>, vector<16x384xbf16> -> vector<32x384xbf16>
    %c0_64 = arith.constant 0 : index
    %c0_65 = arith.constant 0 : index
    %275 = vector.load %arg3[%c0_64, %c0_65] : memref<384x384xbf16, #tpu.memory_space<vmem>>, vector<384x384xbf16>
    %cst_66 = arith.constant dense<0.000000e+00> : vector<32x384xf32>
    %276 = tpu.matmul %274, %275, %cst_66 {dimension_numbers = #tpu.dot_dimension_numbers<[1], [0], [0], [1], [0, 0, 1, 1], [], []>} : vector<32x384xbf16>, vector<384x384xbf16>, vector<32x384xf32> -> vector<32x384xf32>
    %c0_67 = arith.constant 0 : index
    %c0_68 = arith.constant 0 : index
    %277 = vector.load %arg4[%c0_67, %c0_68] : memref<1x384xf32, #tpu.memory_space<vmem>>, vector<1x384xf32>
    %278 = vector.broadcast %277 : vector<1x384xf32> to vector<32x384xf32>
    %279 = arith.addf %276, %278 : vector<32x384xf32>
    %280 = vector.shape_cast %279 : vector<32x384xf32> to vector<2x16x384xf32>
    %c0_69 = arith.constant 0 : index
    %c0_70 = arith.constant 0 : index
    %c0_71 = arith.constant 0 : index
    %281 = vector.load %arg5[%c0_69, %c0_70, %c0_71] : memref<2x16x384xf32, #tpu.memory_space<vmem>>, vector<2x16x384xf32>
    tpu.vector_store %arg5[%c0_69, %c0_70, %c0_71], %280 {strides = array<i32>} : memref<2x16x384xf32, #tpu.memory_space<vmem>>, vector<2x16x384xf32>,
    return
  }
  func.func @transform_0(%arg0: i32) -> (i32, i32, i32) {
    %c0_i32 = arith.constant 0 : i32
    %c0_i32_0 = arith.constant 0 : i32
    %c0_i32_1 = arith.constant 0 : i32
    return %arg0, %c0_i32, %c0_i32_0 : i32, i32, i32
  }
  func.func @transform_1(%arg0: i32) -> (i32, i32) {
    %c0_i32 = arith.constant 0 : i32
    %c0_i32_0 = arith.constant 0 : i32
    %c0_i32_1 = arith.constant 0 : i32
    return %c0_i32, %c0_i32_0 : i32, i32
  }
  func.func @transform_2(%arg0: i32) -> (i32, i32) {
    %c0_i32 = arith.constant 0 : i32
    %c0_i32_0 = arith.constant 0 : i32
    %c0_i32_1 = arith.constant 0 : i32
    return %c0_i32, %c0_i32_0 : i32, i32
  }
  func.func @transform_3(%arg0: i32) -> (i32, i32) {
    %c0_i32 = arith.constant 0 : i32
    %c0_i32_0 = arith.constant 0 : i32
    %c0_i32_1 = arith.constant 0 : i32
    return %c0_i32, %c0_i32_0 : i32, i32
  }
  func.func @transform_4(%arg0: i32) -> (i32, i32, i32) {
    %c0_i32 = arith.constant 0 : i32
    %c0_i32_0 = arith.constant 0 : i32
    %c0_i32_1 = arith.constant 0 : i32
    return %arg0, %c0_i32, %c0_i32_0 : i32, i32, i32
  }
}

</mosaic_0001>

<bundles_post_ra>
// kernel: tpu_custom_call.1
= control target key start
LH: loop header
LB: loop body
LE: loop exit
PB: predicated region body
PF: predicated region fallthrough
CT: control target
= control target key end

     0   :  { %9 = vsyncpa [#allocation3], 0  ;;  %s6134_s0 = inlined_call_operand.hbm [shape: f32[2,16,384], index: 0, kind: input, shape index: {}]   ;;  %s6135_s1 = inlined_call_operand.hbm [shape: bf16[384,1152], index: 1, kind: input, shape index: {}]   ;;  %s6136_s2 = inlined_call_operand.hbm [shape: bf16[384,384], index: 2, kind: input, shape index: {}]   ;;  %s6137_s3 = inlined_call_operand.vmem [shape: f32[1,384], index: 3, kind: input, shape index: {}]   ;;  %s6138_s4 = inlined_call_operand.hbm [shape: f32[2,16,384], index: 4, kind: output, shape index: {}]  }
   0x1   :  { %10 = vsyncpa [#allocation6], 0 }
   0x2   :  { %11 = vsyncpa [#allocation4], 0  ;;  %s5488_s15 = smov [#allocation5]   ;;  %s5394_s19 = scalar_lea.hbm %s6135_s1, 27648 }
   0x3   :  { %s29_s16 = sshll.u32 %s5488_s15, 4  ;;  %p5395_p0 = scmp.ne.s32.totalorder %s6135_s1, %s5394_s19  ;;  %s30_s16 = int_to_ptr.vmem [resolvable:$true] %s29_s16 }
   0x4   :  { %p5398_p1 = scmp.lt.u32.totalorder %s5394_s19, %s6135_s1 }
   0x6   :  { %p5400_p2 = pnand %p5398_p1, %p5395_p0 }
   0x8   :  { %5403 = shalt.err (!%p5400_p2)
}
   0x9   :  { %s5404_s24 = scalar_lea.vmem %s30_s16, 27648  ;;  %p5409_p4 = scmp.lt.s32.totalorder %s30_s16, %s30_s16 }
   0xa   :  { %p5405_p3 = scmp.ne.s32.totalorder %s30_s16, %s5404_s24  ;;  %p5410_p5 = scmp.lt.s32.totalorder %s5404_s24, %s5404_s24 }
   0xc   :  { %p5411_p6 = por %p5410_p5, %p5409_p4 }
   0xe   :  { %p5412_p7 = pnand %p5411_p6, %p5405_p3 }
  0x10   :  { %5415 = shalt.err (!%p5412_p7)
}
  0x11   :  { %s5489_s25 = smov 576   ;;  %s5490_s26 = smov 36  }
  0x12   :  { %35 = dma.hbm_to_vmem [thread:$0]  %s6135_s1, 27648, %s30_s16, [#allocation6], %s5489_s25, %s5489_s25, %s5490_s26  }
  0x13   :  { %s5491_s29 = smov [#allocation2]   ;;  %s5416_s7 = scalar_lea.hbm %s6134_s0, 1536 }
  0x14   :  { %s17_s30 = sshll.u32 %s5491_s29, 4  ;;  %p5417_p8 = scmp.ne.s32.totalorder %s6134_s0, %s5416_s7  ;;  %s18_s30 = int_to_ptr.vmem [resolvable:$true] %s17_s30 }
  0x15   :  { %p5420_p9 = scmp.lt.u32.totalorder %s5416_s7, %s6134_s0 }
  0x17   :  { %p5422_p10 = pnand %p5420_p9, %p5417_p8 }
  0x19   :  { %5425 = shalt.err (!%p5422_p10)
}
  0x1a   :  { %s5426_s12 = scalar_lea.vmem %s18_s30, 1536  ;;  %p5431_p12 = scmp.lt.s32.totalorder %s18_s30, %s18_s30 }
  0x1b   :  { %p5427_p11 = scmp.ne.s32.totalorder %s18_s30, %s5426_s12  ;;  %p5432_p13 = scmp.lt.s32.totalorder %s5426_s12, %s5426_s12 }
  0x1d   :  { %p5433_p0 = por %p5432_p13, %p5431_p12 }
  0x1f   :  { %p5434_p1 = pnand %p5433_p0, %p5427_p11 }
  0x21   :  { %5437 = shalt.err (!%p5434_p1)
}
  0x22   :  { %s5492_s1 = smov 384   ;;  %s5493_s13 = smov 24  }
  0x23   :  { %23 = dma.hbm_to_vmem [thread:$0]  %s6134_s0, 1536, %s18_s30, [#allocation3], %s5492_s1, %s5492_s1, %s5493_s13  }
  0x24   :  { %s5494_s16 = smov [#allocation7]   ;;  %s5438_s20 = scalar_lea.hbm %s6136_s2, 9216 }
  0x25   :  { %s41_s17 = sshll.u32 %s5494_s16, 4  ;;  %p5439_p2 = scmp.ne.s32.totalorder %s6136_s2, %s5438_s20  ;;  %s42_s17 = int_to_ptr.vmem [resolvable:$true] %s41_s17 }
  0x26   :  { %p5442_p3 = scmp.lt.u32.totalorder %s5438_s20, %s6136_s2 }
  0x28   :  { %p5444_p4 = pnand %p5442_p3, %p5439_p2 }
  0x2a   :  { %5447 = shalt.err (!%p5444_p4)
}
  0x2b   :  { %s5448_s25 = scalar_lea.vmem %s42_s17, 9216  ;;  %p5453_p6 = scmp.lt.s32.totalorder %s42_s17, %s42_s17 }
  0x2c   :  { %p5449_p5 = scmp.ne.s32.totalorder %s42_s17, %s5448_s25  ;;  %p5454_p7 = scmp.lt.s32.totalorder %s5448_s25, %s5448_s25 }
  0x2e   :  { %p5455_p8 = por %p5454_p7, %p5453_p6 }
  0x30   :  { %p5456_p9 = pnand %p5455_p8, %p5449_p5 }
  0x32   :  { %5459 = shalt.err (!%p5456_p9)
}
  0x33   :  { %s5495_s0 = smov 192   ;;  %s5496_s26 = smov 12  }
  0x34   :  { %47 = dma.hbm_to_vmem [thread:$0]  %s6136_s2, 9216, %s42_s17, [#allocation6], %s5495_s0, %s5495_s0, %s5496_s26  }
  0x35   :  { %5482 = dma.done.wait [#allocation3], 1536  }
  0x36   :  { %5483 = vsyncadd [#allocation3], 4294965760 }
  0x37   :  { %5484 = dma.done.wait [#allocation6], 36864  }
  0x38   :  { %5485 = vsyncadd [#allocation6], 4294930432  ;;  %v4890_v0 = vld [vmem:[#allocation5 + $0x4] ss:$36 sps:$4 sm:$0xff]   ;;  %v4893_v2 = vld [vmem:[#allocation5 + $0x4c] ss:$36 sps:$4 sm:$0xff]  }
  0x39   :  { %v4892_v1 = vld [vmem:[#allocation5] ss:$36 sps:$4 sm:$0xff]   ;;  %1422 = vmatprep.subr.bf16.mxu0 %v4890_v0  ;;  %v4895_v3 = vld [vmem:[#allocation5 + $0x48] ss:$36 sps:$4 sm:$0xff]   ;;  %v4896_v4 = vld [vmem:[#allocation5 + $0x94] ss:$36 sps:$4 sm:$0xff]  }
  0x3a   :  { %1423 = vmatpush1.bf16.msra.mxu0 %v4892_v1  ;;  %v4898_v5 = vld [vmem:[#allocation5 + $0x90] ss:$36 sps:$4 sm:$0xff]   ;;  %v4899_v6 = vld [vmem:[#allocation5 + $0xdc] ss:$36 sps:$4 sm:$0xff]   ;;  %v4902_v8 = vld [vmem:[#allocation5 + $0x124] ss:$36 sps:$4 sm:$0xff]  }
  0x3b   :  { %1424 = vmatprep.subr.bf16.mxu0 %v4893_v2  ;;  %v4901_v7 = vld [vmem:[#allocation5 + $0xd8] ss:$36 sps:$4 sm:$0xff]   ;;  %v4904_v9 = vld [vmem:[#allocation5 + $0x120] ss:$36 sps:$4 sm:$0xff]   ;;  %v4905_v10 = vld [vmem:[#allocation5 + $0x16c] ss:$36 sps:$4 sm:$0xff]  }
  0x3c   :  { %v4907_v11 = vld [vmem:[#allocation5 + $0x168] ss:$36 sps:$4 sm:$0xff]   ;;  %v4908_v12 = vld [vmem:[#allocation5 + $0x1b4] ss:$36 sps:$4 sm:$0xff]   ;;  %v64_v14 = vld [vmem:[#allocation2 + $0x20] sm:$0xff]  ;;  %vm5499_vm0 = vmmov 0  }
  0x3d   :  { %v61_v13 = vld [vmem:[#allocation2 + $0x8] sm:$0xff]  ;;  %v4910_v16 = vld [vmem:[#allocation5 + $0x1b0] ss:$36 sps:$4 sm:$0xff]   ;;  %v4911_v17 = vld [vmem:[#allocation5 + $0x1fc] ss:$36 sps:$4 sm:$0xff]   ;;  %s5500_s2 = smov 64  }
  0x3e   :  { %1425 = vmatpush1.bf16.msra.mxu0 %v4895_v3  ;;  %v5566_v15 = vpack.c.bf16 %v64_v14, %v61_v13  ;;  %v4913_v18 = vld [vmem:[#allocation5 + $0x1f8] ss:$36 sps:$4 sm:$0xff]   ;;  %v4914_v19 = vld [vmem:[#allocation5 + $0x244] ss:$36 sps:$4 sm:$0xff]   ;;  %v4917_v21 = vld [vmem:[#allocation5 + $0x28c] ss:$36 sps:$4 sm:$0xff]  }
  0x3f   :  { %1426 = vmatprep.subr.bf16.mxu0 %v4896_v4  ;;  %v4916_v20 = vld [vmem:[#allocation5 + $0x240] ss:$36 sps:$4 sm:$0xff]   ;;  %v4919_v22 = vld [vmem:[#allocation5 + $0x288] ss:$36 sps:$4 sm:$0xff]   ;;  %v4920_v23 = vld [vmem:[#allocation5 + $0x2d4] ss:$36 sps:$4 sm:$0xff]  }
  0x40   :  { %1454 = vmatprep.mubr.bf16.mxu0 %v5566_v15  ;;  %1560 = vmatprep.mubr.bf16.mxu1 %v5566_v15  ;;  %v4962_v24 = vld [vmem:[#allocation5 + $0xc] ss:$36 sps:$4 sm:$0xff]   ;;  %v4965_v27 = vld [vmem:[#allocation5 + $0x54] ss:$36 sps:$4 sm:$0xff]   ;;  %v4923_v28 = vld [vmem:[#allocation5 + $0x31c] ss:$36 sps:$4 sm:$0xff]  }
  0x41   :  { %v4964_v25 = vld [vmem:[#allocation5 + $0x8] ss:$36 sps:$4 sm:$0xff]   ;;  %v4922_v26 = vld [vmem:[#allocation5 + $0x2d0] ss:$36 sps:$4 sm:$0xff]   ;;  %1528 = vmatprep.subr.bf16.mxu1 %v4962_v24  ;;  %v4968_v30 = vld [vmem:[#allocation5 + $0x9c] ss:$36 sps:$4 sm:$0xff]  }
  0x42   :  { %1427 = vmatpush1.bf16.msra.mxu0 %v4898_v5  ;;  %1529 = vmatpush1.bf16.msra.mxu1 %v4964_v25  ;;  %v4967_v29 = vld [vmem:[#allocation5 + $0x50] ss:$36 sps:$4 sm:$0xff]   ;;  %v4925_v31 = vld [vmem:[#allocation5 + $0x318] ss:$36 sps:$4 sm:$0xff]   ;;  %v4926_v32 = vld [vmem:[#allocation5 + $0x364] ss:$36 sps:$4 sm:$0xff]  }
  0x43   :  { %1428 = vmatprep.subr.bf16.mxu0 %v4899_v6  ;;  %1530 = vmatprep.subr.bf16.mxu1 %v4965_v27  ;;  %v4970_v33 = vld [vmem:[#allocation5 + $0x98] ss:$36 sps:$4 sm:$0xff]   ;;  %v4971_v34 = vld [vmem:[#allocation5 + $0xe4] ss:$36 sps:$4 sm:$0xff]   ;;  %v4929_v36 = vld [vmem:[#allocation5 + $0x3ac] ss:$36 sps:$4 sm:$0xff]  }
  0x44   :  { %v4928_v35 = vld [vmem:[#allocation5 + $0x360] ss:$36 sps:$4 sm:$0xff]   ;;  %v4974_v38 = vld [vmem:[#allocation5 + $0x12c] ss:$36 sps:$4 sm:$0xff]   ;;  %v4932_v40 = vld [vmem:[#allocation5 + $0x3f4] ss:$36 sps:$4 sm:$0xff]  }
  0x45   :  { %v4973_v37 = vld [vmem:[#allocation5 + $0xe0] ss:$36 sps:$4 sm:$0xff]   ;;  %v4931_v39 = vld [vmem:[#allocation5 + $0x3a8] ss:$36 sps:$4 sm:$0xff]   ;;  %v4977_v42 = vld [vmem:[#allocation5 + $0x174] ss:$36 sps:$4 sm:$0xff]  }
  0x46   :  { %1429 = vmatpush1.bf16.msra.mxu0 %v4901_v7  ;;  %1531 = vmatpush1.bf16.msra.mxu1 %v4967_v29  ;;  %v4976_v41 = vld [vmem:[#allocation5 + $0x128] ss:$36 sps:$4 sm:$0xff]   ;;  %v4934_v43 = vld [vmem:[#allocation5 + $0x3f0] ss:$36 sps:$4 sm:$0xff]   ;;  %v4935_v44 = vld [vmem:[#allocation5 + $0x43c] ss:$36 sps:$4 sm:$0xff]  }
  0x47   :  { %1430 = vmatprep.subr.bf16.mxu0 %v4902_v8  ;;  %1532 = vmatprep.subr.bf16.mxu1 %v4968_v30  ;;  %v4979_v45 = vld [vmem:[#allocation5 + $0x170] ss:$36 sps:$4 sm:$0xff]   ;;  %v4980_v46 = vld [vmem:[#allocation5 + $0x1bc] ss:$36 sps:$4 sm:$0xff]   ;;  %v4940_v49 = vld [vmem:[#allocation5 + $0x484] ss:$36 sps:$4 sm:$0xff]  }
  0x48   :  { %v4937_v47 = vld [vmem:[#allocation5 + $0x438] ss:$36 sps:$4 sm:$0xff]   ;;  %v60_v48 = vld [vmem:[#allocation2] sm:$0xff]  ;;  %v70_v52 = vld [vmem:[#allocation2 + $0x50] sm:$0xff]  ;;  %vm1956_vm1 = vcmask 523264   ;;  %vm2006_vm3 = vcmask 130048  }
  0x49   :  { %v63_v50 = vld [vmem:[#allocation2 + $0x18] sm:$0xff]  ;;  %v4983_v54 = vld [vmem:[#allocation5 + $0x204] ss:$36 sps:$4 sm:$0xff]   ;;  %v4943_v57 = vld [vmem:[#allocation5 + $0x4cc] ss:$36 sps:$4 sm:$0xff]  }
  0x4a   :  { %1431 = vmatpush1.bf16.msra.mxu0 %v4904_v9  ;;  %1533 = vmatpush1.bf16.msra.mxu1 %v4970_v33  ;;  %v67_v51 = vld [vmem:[#allocation2 + $0x38] sm:$0xff]  ;;  %v5570_v55 = vpack.c.bf16 %v63_v50, %v60_v48  ;;  %v4938_v56 = vld [vmem:[#allocation5 + $0x480] ss:$36 sps:$4 sm:$0xff]   ;;  %v4986_v60 = vld [vmem:[#allocation5 + $0x24c] ss:$36 sps:$4 sm:$0xff]  }
  0x4b   :  { %1432 = vmatprep.subr.bf16.mxu0 %v4905_v10  ;;  %1534 = vmatprep.subr.bf16.mxu1 %v4971_v34  ;;  %v4982_v53 = vld [vmem:[#allocation5 + $0x1b8] ss:$36 sps:$4 sm:$0xff]   ;;  %v5572_v58 = vpack.c.bf16 %v70_v52, %v67_v51  ;;  %v4985_v59 = vld [vmem:[#allocation5 + $0x200] ss:$36 sps:$4 sm:$0xff]   ;;  %v4941_v61 = vld [vmem:[#allocation5 + $0x4c8] ss:$36 sps:$4 sm:$0xff]  }
  0x4c   :  { %v4946_v62 = vld [vmem:[#allocation5 + $0x514] ss:$36 sps:$4 sm:$0xff]   ;;  %v69_v0 = vld [vmem:[#allocation2 + $0x48] sm:$0xff]  ;;  %v4949_v5 = vld [vmem:[#allocation5 + $0x55c] ss:$36 sps:$4 sm:$0xff]  }
  0x4d   :  { %v66_v63 = vld [vmem:[#allocation2 + $0x30] sm:$0xff]  ;;  %v4988_v1 = vld [vmem:[#allocation5 + $0x248] ss:$36 sps:$4 sm:$0xff]   ;;  %v4947_v7 = vld [vmem:[#allocation5 + $0x558] ss:$36 sps:$4 sm:$0xff]  }
  0x4e   :  { %1433 = vmatpush1.bf16.msra.mxu0 %v4907_v11  ;;  %1535 = vmatpush1.bf16.msra.mxu1 %v4973_v37  ;;  %v4989_v2 = vld [vmem:[#allocation5 + $0x294] ss:$36 sps:$4 sm:$0xff]   ;;  %v5576_v3 = vpack.c.bf16 %v69_v0, %v66_v63  ;;  %v4992_v8 = vld [vmem:[#allocation5 + $0x2dc] ss:$36 sps:$4 sm:$0xff]   ;;  %v4952_v9 = vld [vmem:[#allocation5 + $0x5a4] ss:$36 sps:$4 sm:$0xff]  }
  0x4f   :  { %1434 = vmatprep.subr.bf16.mxu0 %v4908_v12  ;;  %1536 = vmatprep.subr.bf16.mxu1 %v4974_v38  ;;  %v4944_v4 = vld [vmem:[#allocation5 + $0x510] ss:$36 sps:$4 sm:$0xff]   ;;  %v4994_v10 = vld [vmem:[#allocation5 + $0x2d8] ss:$36 sps:$4 sm:$0xff]   ;;  %v5497_v11 = vmov 0   ;;  %v68_v34 = vld [vmem:[#allocation2 + $0x40] sm:$0xff] }
  0x50   :  { %v4991_v6 = vld [vmem:[#allocation5 + $0x290] ss:$36 sps:$4 sm:$0xff]   ;;  %v4995_v12 = vld [vmem:[#allocation5 + $0x324] ss:$36 sps:$4 sm:$0xff]   ;;  %v5004_v25 = vld [vmem:[#allocation5 + $0x3fc] ss:$36 sps:$4 sm:$0xff]  }
  0x51   :  { %v4950_v13 = vld [vmem:[#allocation5 + $0x5a0] ss:$36 sps:$4 sm:$0xff]   ;;  %v4955_v14 = vld [vmem:[#allocation5 + $0x5ec] ss:$36 sps:$4 sm:$0xff]   ;;  %v5006_v29 = vld [vmem:[#allocation5 + $0x3f8] ss:$36 sps:$4 sm:$0xff]  }
  0x52   :  { %1435 = vmatpush1.bf16.msra.mxu0 %v4910_v16  ;;  %1537 = vmatpush1.bf16.msra.mxu1 %v4976_v41  ;;  %v4997_v16 = vld [vmem:[#allocation5 + $0x320] ss:$36 sps:$4 sm:$0xff]   ;;  %v5003_v24 = vld [vmem:[#allocation5 + $0x3b0] ss:$36 sps:$4 sm:$0xff]   ;;  %v5016_v41 = vld [vmem:[#allocation5 + $0x518] ss:$36 sps:$4 sm:$0xff]  }
  0x53   :  { %1436 = vmatprep.subr.bf16.mxu0 %v4911_v17  ;;  %1538 = vmatprep.subr.bf16.mxu1 %v4977_v42  ;;  %v4998_v17 = vld [vmem:[#allocation5 + $0x36c] ss:$36 sps:$4 sm:$0xff]   ;;  %v5007_v30 = vld [vmem:[#allocation5 + $0x444] ss:$36 sps:$4 sm:$0xff]   ;;  %v5015_v37 = vld [vmem:[#allocation5 + $0x4d4] ss:$36 sps:$4 sm:$0xff]  }
  0x54   :  { %v62_v27 = vld [vmem:[#allocation2 + $0x10] sm:$0xff]  ;;  %v5021_v42 = vld [vmem:[#allocation5 + $0x564] ss:$36 sps:$4 sm:$0xff]   ;;  %v5030_v48 = vld [vmem:[#allocation5 + $0x63c] ss:$36 sps:$4 sm:$0xff]  }
  0x55   :  { %v5012_v33 = vld [vmem:[#allocation5 + $0x48c] ss:$36 sps:$4 sm:$0xff]   ;;  %v5033_v50 = vld [vmem:[#allocation5 + $0x684] ss:$36 sps:$4 sm:$0xff]   ;;  %v5036_v52 = vld [vmem:[#allocation5 + $0x1c] ss:$36 sps:$4 sm:$0xff]  }
  0x56   :  { %1437 = vmatpush1.bf16.msra.mxu0 %v4913_v18  ;;  %1539 = vmatpush1.bf16.msra.mxu1 %v4979_v45  ;;  %v4953_v18 = vld [vmem:[#allocation5 + $0x5e8] ss:$36 sps:$4 sm:$0xff]   ;;  %v5031_v51 = vld [vmem:[#allocation5 + $0x680] ss:$36 sps:$4 sm:$0xff]   ;;  %v5046_v63 = vld [vmem:[#allocation5 + $0x138] ss:$36 sps:$4 sm:$0xff]  }
  0x57   :  { %1438 = vmatprep.subr.bf16.mxu0 %v4914_v19  ;;  %1540 = vmatprep.subr.bf16.mxu1 %v4980_v46  ;;  %v4958_v19 = vld [vmem:[#allocation5 + $0x634] ss:$36 sps:$4 sm:$0xff]   ;;  %v5022_v45 = vld [vmem:[#allocation5 + $0x5a8] ss:$36 sps:$4 sm:$0xff]  }
  0x58   :  { %v5027_v46 = vld [vmem:[#allocation5 + $0x5f4] ss:$36 sps:$4 sm:$0xff]   ;;  %v5051_v0 = vld [vmem:[#allocation5 + $0x184] ss:$36 sps:$4 sm:$0xff]  }
  0x5a   :  { %1439 = vmatpush1.bf16.msra.mxu0 %v4916_v20  ;;  %1541 = vmatpush1.bf16.msra.mxu1 %v4982_v53  ;;  %v5000_v20 = vld [vmem:[#allocation5 + $0x368] ss:$36 sps:$4 sm:$0xff]   ;;  %v5034_v53 = vld [vmem:[#allocation5 + $0x18] ss:$36 sps:$4 sm:$0xff]  }
  0x5b   :  { %1440 = vmatprep.subr.bf16.mxu0 %v4917_v21  ;;  %1542 = vmatprep.subr.bf16.mxu1 %v4983_v54  ;;  %v5001_v21 = vld [vmem:[#allocation5 + $0x3b4] ss:$36 sps:$4 sm:$0xff]   ;;  %v5039_v54 = vld [vmem:[#allocation5 + $0x64] ss:$36 sps:$4 sm:$0xff]  }
  0x5e   :  { %1441 = vmatpush1.bf16.msra.mxu0 %v4919_v22  ;;  %1543 = vmatpush1.bf16.msra.mxu1 %v4985_v59  ;;  %v4956_v22 = vld [vmem:[#allocation5 + $0x630] ss:$36 sps:$4 sm:$0xff]   ;;  %v5040_v59 = vld [vmem:[#allocation5 + $0xa8] ss:$36 sps:$4 sm:$0xff]  }
  0x5f   :  { %1442 = vmatprep.subr.bf16.mxu0 %v4920_v23  ;;  %1544 = vmatprep.subr.bf16.mxu1 %v4986_v60  ;;  %v4961_v23 = vld [vmem:[#allocation5 + $0x67c] ss:$36 sps:$4 sm:$0xff]   ;;  %v5045_v60 = vld [vmem:[#allocation5 + $0xf4] ss:$36 sps:$4 sm:$0xff]  }
  0x62   :  { %1443 = vmatpush1.bf16.msra.mxu0 %v4922_v26  ;;  %1545 = vmatpush1.bf16.msra.mxu1 %v4988_v1  ;;  %v4959_v26 = vld [vmem:[#allocation5 + $0x678] ss:$36 sps:$4 sm:$0xff]   ;;  %v5049_v1 = vld [vmem:[#allocation5 + $0x180] ss:$36 sps:$4 sm:$0xff]  }
  0x63   :  { %1444 = vmatprep.subr.bf16.mxu0 %v4923_v28  ;;  %1546 = vmatprep.subr.bf16.mxu1 %v4989_v2  ;;  %v65_v28 = vld [vmem:[#allocation2 + $0x28] sm:$0xff] }
  0x64   :  { %v5054_v2 = vld [vmem:[#allocation5 + $0x1cc] ss:$36 sps:$4 sm:$0xff]  }
  0x66   :  { %1445 = vmatpush1.bf16.msra.mxu0 %v4925_v31  ;;  %1547 = vmatpush1.bf16.msra.mxu1 %v4991_v6  ;;  %v5580_v31 = vpack.c.bf16 %v65_v28, %v62_v27  ;;  %v5055_v6 = vld [vmem:[#allocation5 + $0x210] ss:$36 sps:$4 sm:$0xff]   ;;  %v5106_v27 = vld [vmem:[#allocation5 + $0xe8] ss:$36 sps:$4 sm:$0xff]   ;;  %v5073_v28 = vld [vmem:[#allocation5 + $0x3c0] ss:$36 sps:$4 sm:$0xff]  }
  0x67   :  { %1446 = vmatprep.subr.bf16.mxu0 %v4926_v32  ;;  %1548 = vmatprep.subr.bf16.mxu1 %v4992_v8  ;;  %v5009_v32 = vld [vmem:[#allocation5 + $0x440] ss:$36 sps:$4 sm:$0xff]  }
  0x68   :  { %v5060_v8 = vld [vmem:[#allocation5 + $0x25c] ss:$36 sps:$4 sm:$0xff]  }
  0x6a   :  { %1447 = vmatpush1.bf16.msra.mxu0 %v4928_v35  ;;  %1549 = vmatpush1.bf16.msra.mxu1 %v4994_v10  ;;  %v71_v35 = vld [vmem:[#allocation2 + $0x58] sm:$0xff]  ;;  %v5061_v10 = vld [vmem:[#allocation5 + $0x2a0] ss:$36 sps:$4 sm:$0xff]  }
  0x6b   :  { %1448 = vmatprep.subr.bf16.mxu0 %v4929_v36  ;;  %1550 = vmatprep.subr.bf16.mxu1 %v4995_v12  ;;  %v5010_v36 = vld [vmem:[#allocation5 + $0x488] ss:$36 sps:$4 sm:$0xff]   ;;  %v5584_v38 = vpack.c.bf16 %v71_v35, %v68_v34  ;;  %v5120_v34 = vld [vmem:[#allocation5 + $0x17c] ss:$36 sps:$4 sm:$0xff]   ;;  %v5081_v35 = vld [vmem:[#allocation5 + $0x454] ss:$36 sps:$4 sm:$0xff]  }
  0x6c   :  { %v5066_v12 = vld [vmem:[#allocation5 + $0x2ec] ss:$36 sps:$4 sm:$0xff]  }
  0x6e   :  { %1449 = vmatpush1.bf16.msra.mxu0 %v4931_v39  ;;  %1551 = vmatpush1.bf16.msra.mxu1 %v4997_v16  ;;  %v5013_v39 = vld [vmem:[#allocation5 + $0x4d0] ss:$36 sps:$4 sm:$0xff]  }
  0x6f   :  { %1450 = vmatprep.subr.bf16.mxu0 %v4932_v40  ;;  %1552 = vmatprep.subr.bf16.mxu1 %v4998_v17  ;;  %v5018_v40 = vld [vmem:[#allocation5 + $0x51c] ss:$36 sps:$4 sm:$0xff]   ;;  %v5090_v16 = vld [vmem:[#allocation5 + $0x14] ss:$36 sps:$4 sm:$0xff]  }
  0x70   :  { %v5069_v17 = vld [vmem:[#allocation5 + $0x334] ss:$36 sps:$4 sm:$0xff]  }
  0x72   :  { %1451 = vmatpush1.bf16.msra.mxu0 %v4934_v43  ;;  %1553 = vmatpush1.bf16.msra.mxu1 %v5000_v20  ;;  %v5019_v43 = vld [vmem:[#allocation5 + $0x560] ss:$36 sps:$4 sm:$0xff]   ;;  %v5067_v20 = vld [vmem:[#allocation5 + $0x330] ss:$36 sps:$4 sm:$0xff]  }
  0x73   :  { %1452 = vmatprep.subr.bf16.mxu0 %v4935_v44  ;;  %1554 = vmatprep.subr.bf16.mxu1 %v5001_v21  ;;  %v5024_v44 = vld [vmem:[#allocation5 + $0x5ac] ss:$36 sps:$4 sm:$0xff]   ;;  %v5102_v21 = vld [vmem:[#allocation5 + $0xa4] ss:$36 sps:$4 sm:$0xff]  }
  0x76   :  { %1453 = vmatpush1.bf16.msra.mxu0 %v4937_v47  ;;  %1555 = vmatpush1.bf16.msra.mxu1 %v5003_v24  ;;  %v5025_v47 = vld [vmem:[#allocation5 + $0x5f0] ss:$36 sps:$4 sm:$0xff]   ;;  %v5070_v24 = vld [vmem:[#allocation5 + $0x378] ss:$36 sps:$4 sm:$0xff]  }
  0x77   :  { %1475 = vmatprep.subr.bf16.mxu0 %v4940_v49  ;;  %1556 = vmatprep.subr.bf16.mxu1 %v5004_v25  ;;  %v5028_v49 = vld [vmem:[#allocation5 + $0x638] ss:$36 sps:$4 sm:$0xff]   ;;  %v5108_v25 = vld [vmem:[#allocation5 + $0xec] ss:$36 sps:$4 sm:$0xff]  }
  0x79   :  { %1455 = vmatmul.mubr.bf16.vlgmr.msra.gmra.mrb[0].mxu0 %v5570_v55 }
  0x7a   :  { %1476 = vmatpush1.bf16.msra.mxu0 %v4938_v56  ;;  %1464 = vmatprep.mubr.bf16.mxu0 %v5572_v58  ;;  %v5037_v56 = vld [vmem:[#allocation5 + $0x60] ss:$36 sps:$4 sm:$0xff]  }
  0x7b   :  { %1477 = vmatprep.subr.bf16.mxu0 %v4943_v57  ;;  %1557 = vmatpush1.bf16.msra.mxu1 %v5006_v29  ;;  %v5042_v57 = vld [vmem:[#allocation5 + $0xac] ss:$36 sps:$4 sm:$0xff]   ;;  %v5114_v29 = vld [vmem:[#allocation5 + $0x134] ss:$36 sps:$4 sm:$0xff]  }
  0x7c   :  { %1558 = vmatprep.subr.bf16.mxu1 %v5007_v30  ;;  %v5078_v30 = vld [vmem:[#allocation5 + $0x40c] ss:$36 sps:$4 sm:$0xff]  }
  0x7e   :  { %1478 = vmatpush1.bf16.msra.mxu0 %v4941_v61  ;;  %v5043_v61 = vld [vmem:[#allocation5 + $0xf0] ss:$36 sps:$4 sm:$0xff]  }
  0x7f   :  { %1479 = vmatprep.subr.bf16.mxu0 %v4946_v62  ;;  %1559 = vmatpush1.bf16.msra.mxu1 %v5009_v32  ;;  %v5048_v62 = vld [vmem:[#allocation5 + $0x13c] ss:$36 sps:$4 sm:$0xff]   ;;  %v5112_v32 = vld [vmem:[#allocation5 + $0x130] ss:$36 sps:$4 sm:$0xff]  }
  0x80   :  { %1581 = vmatprep.subr.bf16.mxu1 %v5012_v33  ;;  %v5076_v33 = vld [vmem:[#allocation5 + $0x408] ss:$36 sps:$4 sm:$0xff]  }
  0x81   :  { %1465 = vmatmul.mubr.bf16.gmra.mrb[4].mxu0 %v5576_v3 }
  0x82   :  { %1480 = vmatpush1.bf16.msra.mxu0 %v4944_v4  ;;  %1507 = vmatprep.mubr.bf16.mxu0 %v5497_v11  ;;  %v5052_v4 = vld [vmem:[#allocation5 + $0x1c8] ss:$36 sps:$4 sm:$0xff]  }
  0x83   :  { %1481 = vmatprep.subr.bf16.mxu0 %v4949_v5  ;;  %1561 = vmatmul.mubr.bf16.vlgmr.msra.gmra.mrb[0].mxu1 %v5570_v55  ;;  %v5057_v5 = vld [vmem:[#allocation5 + $0x214] ss:$36 sps:$4 sm:$0xff]  }
  0x84   :  { %1582 = vmatpush1.bf16.msra.mxu1 %v5010_v36  ;;  %1570 = vmatprep.mubr.bf16.mxu1 %v5572_v58  ;;  %v5118_v36 = vld [vmem:[#allocation5 + $0x178] ss:$36 sps:$4 sm:$0xff]  }
  0x85   :  { %1583 = vmatprep.subr.bf16.mxu1 %v5015_v37  ;;  %v5079_v37 = vld [vmem:[#allocation5 + $0x450] ss:$36 sps:$4 sm:$0xff]  }
  0x86   :  { %1482 = vmatpush1.bf16.msra.mxu0 %v4947_v7  ;;  %v5058_v7 = vld [vmem:[#allocation5 + $0x258] ss:$36 sps:$4 sm:$0xff]  }
  0x87   :  { %1483 = vmatprep.subr.bf16.mxu0 %v4952_v9  ;;  %v5063_v9 = vld [vmem:[#allocation5 + $0x2a4] ss:$36 sps:$4 sm:$0xff]  }
  0x88   :  { %1584 = vmatpush1.bf16.msra.mxu1 %v5013_v39  ;;  %v5126_v39 = vld [vmem:[#allocation5 + $0x1c4] ss:$36 sps:$4 sm:$0xff]  }
  0x89   :  { %1585 = vmatprep.subr.bf16.mxu1 %v5018_v40  ;;  %v5084_v40 = vld [vmem:[#allocation5 + $0x49c] ss:$36 sps:$4 sm:$0xff]  }
  0x8a   :  { %1484 = vmatpush1.bf16.msra.mxu0 %v4950_v13  ;;  %v5088_v13 = vld [vmem:[#allocation5 + $0x10] ss:$36 sps:$4 sm:$0xff]  }
  0x8b   :  { %1485 = vmatprep.subr.bf16.mxu0 %v4955_v14  ;;  %1571 = vmatmul.mubr.bf16.gmra.mrb[4].mxu1 %v5576_v3  ;;  %v5064_v14 = vld [vmem:[#allocation5 + $0x2e8] ss:$36 sps:$4 sm:$0xff]  }
  0x8c   :  { %1586 = vmatpush1.bf16.msra.mxu1 %v5016_v41  ;;  %1613 = vmatprep.mubr.bf16.mxu1 %v5497_v11  ;;  %v5124_v41 = vld [vmem:[#allocation5 + $0x1c0] ss:$36 sps:$4 sm:$0xff]  }
  0x8d   :  { %1587 = vmatprep.subr.bf16.mxu1 %v5021_v42  ;;  %v5082_v42 = vld [vmem:[#allocation5 + $0x498] ss:$36 sps:$4 sm:$0xff]  }
  0x8e   :  { %1486 = vmatpush1.bf16.msra.mxu0 %v4953_v18  ;;  %v5096_v18 = vld [vmem:[#allocation5 + $0x5c] ss:$36 sps:$4 sm:$0xff]  }
  0x8f   :  { %1487 = vmatprep.subr.bf16.mxu0 %v4958_v19  ;;  %v5094_v19 = vld [vmem:[#allocation5 + $0x58] ss:$36 sps:$4 sm:$0xff]  }
  0x90   :  { %1588 = vmatpush1.bf16.msra.mxu1 %v5019_v43  ;;  %v5087_v43 = vld [vmem:[#allocation5 + $0x4e4] ss:$36 sps:$4 sm:$0xff]  }
  0x91   :  { %1589 = vmatprep.subr.bf16.mxu1 %v5024_v44  ;;  %v5129_v44 = vld [vmem:[#allocation5 + $0x20c] ss:$36 sps:$4 sm:$0xff]  }
  0x92   :  { %1488 = vmatpush1.bf16.msra.mxu0 %v4956_v22  ;;  %v5072_v22 = vld [vmem:[#allocation5 + $0x37c] ss:$36 sps:$4 sm:$0xff]  }
  0x93   :  { %1489 = vmatprep.subr.bf16.mxu0 %v4961_v23  ;;  %v5100_v23 = vld [vmem:[#allocation5 + $0xa0] ss:$36 sps:$4 sm:$0xff]  }
  0x94   :  { %1590 = vmatpush1.bf16.msra.mxu1 %v5022_v45  ;;  %v5127_v45 = vld [vmem:[#allocation5 + $0x208] ss:$36 sps:$4 sm:$0xff]  }
  0x95   :  { %1591 = vmatprep.subr.bf16.mxu1 %v5027_v46  ;;  %v5085_v46 = vld [vmem:[#allocation5 + $0x4e0] ss:$36 sps:$4 sm:$0xff]  }
  0x96   :  { %1490 = vmatpush1.bf16.msra.mxu0 %v4959_v26  ;;  %v5075_v26 = vld [vmem:[#allocation5 + $0x3c4] ss:$36 sps:$4 sm:$0xff]  }
  0x97   :  { %1634 = vmatprep.subr.bf16.mxu0 %v5090_v16  ;;  %v5156_v16 = vld [vmem:[#allocation5 + $0x494] ss:$36 sps:$4 sm:$0xff]  }
  0x98   :  { %1592 = vmatpush1.bf16.msra.mxu1 %v5025_v47  ;;  %v5132_v47 = vld [vmem:[#allocation5 + $0x254] ss:$36 sps:$4 sm:$0xff]  }
  0x99   :  { %1508 = vmatmul.mubr.bf16.vlgmr.msra.gmra.mrb[0].mxu0 %v5580_v31  ;;  %1593 = vmatprep.subr.bf16.mxu1 %v5030_v48  ;;  %v5093_v48 = vld [vmem:[#allocation5 + $0x52c] ss:$36 sps:$4 sm:$0xff]  }
  0x9a   :  { %1517 = vmatprep.mubr.bf16.mxu0 %v5497_v11  ;;  %1635 = vmatpush1.bf16.msra.mxu0 %v5088_v13  ;;  %v5153_v13 = vld [vmem:[#allocation5 + $0x44c] ss:$36 sps:$4 sm:$0xff]  }
  0x9b   :  { %1636 = vmatprep.subr.bf16.mxu0 %v5096_v18  ;;  %v5154_v18 = vld [vmem:[#allocation5 + $0x490] ss:$36 sps:$4 sm:$0xff]  }
  0x9c   :  { %1594 = vmatpush1.bf16.msra.mxu1 %v5028_v49  ;;  %v5130_v49 = vld [vmem:[#allocation5 + $0x250] ss:$36 sps:$4 sm:$0xff]  }
  0x9d   :  { %1595 = vmatprep.subr.bf16.mxu1 %v5033_v50  ;;  %v5091_v50 = vld [vmem:[#allocation5 + $0x528] ss:$36 sps:$4 sm:$0xff]  }
  0x9e   :  { %1637 = vmatpush1.bf16.msra.mxu0 %v5094_v19  ;;  %v5159_v19 = vld [vmem:[#allocation5 + $0x4dc] ss:$36 sps:$4 sm:$0xff]  }
  0x9f   :  { %1638 = vmatprep.subr.bf16.mxu0 %v5102_v21  ;;  %v5162_v21 = vld [vmem:[#allocation5 + $0x524] ss:$36 sps:$4 sm:$0xff]  }
  0xa0   :  { %1596 = vmatpush1.bf16.msra.mxu1 %v5031_v51  ;;  %v5099_v51 = vld [vmem:[#allocation5 + $0x574] ss:$36 sps:$4 sm:$0xff]  }
  0xa1   :  { %1518 = vmatmul.mubr.bf16.gmra.mrb[4].mxu0 %v5584_v38  ;;  %1740 = vmatprep.subr.bf16.mxu1 %v5036_v52  ;;  %v5135_v52 = vld [vmem:[#allocation5 + $0x29c] ss:$36 sps:$4 sm:$0xff]  }
  0xa2   :  { %1666 = vmatprep.mubr.bf16.mxu0 %v5566_v15  ;;  %1639 = vmatpush1.bf16.msra.mxu0 %v5100_v23  ;;  %v5160_v23 = vld [vmem:[#allocation5 + $0x520] ss:$36 sps:$4 sm:$0xff]  }
  0xa3   :  { %1614 = vmatmul.mubr.bf16.vlgmr.msra.gmra.mrb[0].mxu1 %v5580_v31  ;;  %1640 = vmatprep.subr.bf16.mxu0 %v5108_v25  ;;  %v5165_v25 = vld [vmem:[#allocation5 + $0x56c] ss:$36 sps:$4 sm:$0xff]  }
  0xa4   :  { %1741 = vmatpush1.bf16.msra.mxu1 %v5034_v53  ;;  %1623 = vmatprep.mubr.bf16.mxu1 %v5497_v11  ;;  %v5133_v53 = vld [vmem:[#allocation5 + $0x298] ss:$36 sps:$4 sm:$0xff]  }
  0xa5   :  { %1742 = vmatprep.subr.bf16.mxu1 %v5039_v54  ;;  %v5097_v54 = vld [vmem:[#allocation5 + $0x570] ss:$36 sps:$4 sm:$0xff]  }
  0xa6   :  { %1641 = vmatpush1.bf16.msra.mxu0 %v5106_v27  ;;  %v5163_v27 = vld [vmem:[#allocation5 + $0x568] ss:$36 sps:$4 sm:$0xff]  }
  0xa7   :  { %1642 = vmatprep.subr.bf16.mxu0 %v5114_v29 }
  0xa8   :  { %1743 = vmatpush1.bf16.msra.mxu1 %v5037_v56  ;;  %v5138_v56 = vld [vmem:[#allocation5 + $0x2e4] ss:$36 sps:$4 sm:$0xff]  }
  0xa9   :  { %1744 = vmatprep.subr.bf16.mxu1 %v5042_v57  ;;  %v5105_v57 = vld [vmem:[#allocation5 + $0x5bc] ss:$36 sps:$4 sm:$0xff]  }
  0xaa   :  { %1643 = vmatpush1.bf16.msra.mxu0 %v5112_v32 }
  0xab   :  { %1624 = vmatmul.mubr.bf16.gmra.mrb[4].mxu1 %v5584_v38  ;;  %1644 = vmatprep.subr.bf16.mxu0 %v5120_v34  ;;  %v5171_v34 = vld [vmem:[#allocation5 + $0x5fc] ss:$36 sps:$4 sm:$0xff]  }
  0xac   :  { %1745 = vmatpush1.bf16.msra.mxu1 %v5040_v59  ;;  %1772 = vmatprep.mubr.bf16.mxu1 %v5566_v15  ;;  %v5136_v59 = vld [vmem:[#allocation5 + $0x2e0] ss:$36 sps:$4 sm:$0xff]  }
  0xad   :  { %1746 = vmatprep.subr.bf16.mxu1 %v5045_v60  ;;  %v5103_v60 = vld [vmem:[#allocation5 + $0x5b8] ss:$36 sps:$4 sm:$0xff]  }
  0xae   :  { %1645 = vmatpush1.bf16.msra.mxu0 %v5118_v36 }
  0xaf   :  { %1646 = vmatprep.subr.bf16.mxu0 %v5126_v39  ;;  %v5169_v39 = vld [vmem:[#allocation5 + $0x5f8] ss:$36 sps:$4 sm:$0xff]  }
  0xb0   :  { %1747 = vmatpush1.bf16.msra.mxu1 %v5043_v61  ;;  %v5141_v61 = vld [vmem:[#allocation5 + $0x32c] ss:$36 sps:$4 sm:$0xff]  }
  0xb1   :  { %1748 = vmatprep.subr.bf16.mxu1 %v5048_v62  ;;  %v5111_v62 = vld [vmem:[#allocation5 + $0x604] ss:$36 sps:$4 sm:$0xff]  }
  0xb2   :  { %1647 = vmatpush1.bf16.msra.mxu0 %v5124_v41 }
  0xb3   :  { %1648 = vmatprep.subr.bf16.mxu0 %v5129_v44  ;;  %v5172_v44 = vld [vmem:[#allocation5 + $0x640] ss:$36 sps:$4 sm:$0xff]  }
  0xb4   :  { %1749 = vmatpush1.bf16.msra.mxu1 %v5046_v63  ;;  %v5139_v63 = vld [vmem:[#allocation5 + $0x328] ss:$36 sps:$4 sm:$0xff]  }
  0xb5   :  { %1750 = vmatprep.subr.bf16.mxu1 %v5051_v0  ;;  %v5109_v0 = vld [vmem:[#allocation5 + $0x600] ss:$36 sps:$4 sm:$0xff]  }
  0xb6   :  { %1649 = vmatpush1.bf16.msra.mxu0 %v5127_v45  ;;  %v5177_v45 = vld [vmem:[#allocation5 + $0x68c] ss:$36 sps:$4 sm:$0xff]  }
  0xb7   :  { %1650 = vmatprep.subr.bf16.mxu0 %v5132_v47  ;;  %v5178_v47 = vld [vmem:[#allocation5 + $0x260] ss:$36 sps:$4 sm:$0xff]  }
  0xb8   :  { %1751 = vmatpush1.bf16.msra.mxu1 %v5049_v1  ;;  %v5144_v1 = vld [vmem:[#allocation5 + $0x374] ss:$36 sps:$4 sm:$0xff]  }
  0xb9   :  { %1752 = vmatprep.subr.bf16.mxu1 %v5054_v2  ;;  %v5117_v2 = vld [vmem:[#allocation5 + $0x64c] ss:$36 sps:$4 sm:$0xff]  }
  0xba   :  { %1651 = vmatpush1.bf16.msra.mxu0 %v5130_v49  ;;  %v5180_v49 = vld [vmem:[#allocation5 + $0x2a8] ss:$36 sps:$4 sm:$0xff]  }
  0xbb   :  { %1652 = vmatprep.subr.bf16.mxu0 %v5135_v52  ;;  %v5183_v52 = vld [vmem:[#allocation5 + $0xb0] ss:$36 sps:$4 sm:$0xff]  }
  0xbc   :  { %1753 = vmatpush1.bf16.msra.mxu1 %v5052_v4  ;;  %v5142_v4 = vld [vmem:[#allocation5 + $0x370] ss:$36 sps:$4 sm:$0xff]  }
  0xbd   :  { %1754 = vmatprep.subr.bf16.mxu1 %v5057_v5  ;;  %v5115_v5 = vld [vmem:[#allocation5 + $0x648] ss:$36 sps:$4 sm:$0xff]  }
  0xbe   :  { %1653 = vmatpush1.bf16.msra.mxu0 %v5133_v53  ;;  %v5184_v53 = vld [vmem:[#allocation5 + $0x338] ss:$36 sps:$4 sm:$0xff]  }
  0xbf   :  { %1654 = vmatprep.subr.bf16.mxu0 %v5138_v56  ;;  %v5186_v56 = vld [vmem:[#allocation5 + $0x380] ss:$36 sps:$4 sm:$0xff]  }
  0xc0   :  { %1755 = vmatpush1.bf16.msra.mxu1 %v5055_v6  ;;  %v5147_v6 = vld [vmem:[#allocation5 + $0x3bc] ss:$36 sps:$4 sm:$0xff]  }
  0xc1   :  { %1756 = vmatprep.subr.bf16.mxu1 %v5060_v8  ;;  %v5145_v8 = vld [vmem:[#allocation5 + $0x3b8] ss:$36 sps:$4 sm:$0xff]  }
  0xc2   :  { %1655 = vmatpush1.bf16.msra.mxu0 %v5136_v59 }
  0xc3   :  { %1656 = vmatprep.subr.bf16.mxu0 %v5141_v61 }
  0xc4   :  { %1757 = vmatpush1.bf16.msra.mxu1 %v5058_v7  ;;  %v5123_v7 = vld [vmem:[#allocation5 + $0x694] ss:$36 sps:$4 sm:$0xff]  }
  0xc5   :  { %1758 = vmatprep.subr.bf16.mxu1 %v5063_v9  ;;  %v5121_v9 = vld [vmem:[#allocation5 + $0x690] ss:$36 sps:$4 sm:$0xff]  }
  0xc6   :  { %1657 = vmatpush1.bf16.msra.mxu0 %v5139_v63 }
  0xc7   :  { %1658 = vmatprep.subr.bf16.mxu0 %v5144_v1 }
  0xc8   :  { %1759 = vmatpush1.bf16.msra.mxu1 %v5061_v10  ;;  %v5150_v10 = vld [vmem:[#allocation5 + $0x404] ss:$36 sps:$4 sm:$0xff]  }
  0xc9   :  { %1760 = vmatprep.subr.bf16.mxu1 %v5066_v12  ;;  %v5148_v12 = vld [vmem:[#allocation5 + $0x400] ss:$36 sps:$4 sm:$0xff]  }
  0xca   :  { %1659 = vmatpush1.bf16.msra.mxu0 %v5142_v4  ;;  %v5190_v4 = vld [vmem:[#allocation5 + $0x410] ss:$36 sps:$4 sm:$0xff]  }
  0xcb   :  { %1660 = vmatprep.subr.bf16.mxu0 %v5147_v6  ;;  %v5191_v6 = vld [vmem:[#allocation5 + $0x1d0] ss:$36 sps:$4 sm:$0xff]  }
  0xcc   :  { %1761 = vmatpush1.bf16.msra.mxu1 %v5064_v14  ;;  %v5151_v14 = vld [vmem:[#allocation5 + $0x448] ss:$36 sps:$4 sm:$0xff]  }
  0xcd   :  { %1762 = vmatprep.subr.bf16.mxu1 %v5069_v17  ;;  %v5498_v17 = vmov 0.0  }
  0xce   :  { %1661 = vmatpush1.bf16.msra.mxu0 %v5145_v8  ;;  %v5192_v8 = vld [vmem:[#allocation5 + $0x458] ss:$36 sps:$4 sm:$0xff]  }
  0xcf   :  { %1662 = vmatprep.subr.bf16.mxu0 %v5150_v10 }
  0xd0   :  { %1763 = vmatpush1.bf16.msra.mxu1 %v5067_v20  ;;  %v5157_v20 = vld [vmem:[#allocation5 + $0x4d8] ss:$36 sps:$4 sm:$0xff]  }
  0xd1   :  { %1764 = vmatprep.subr.bf16.mxu1 %v5072_v22 }
  0xd2   :  { %1663 = vmatpush1.bf16.msra.mxu0 %v5148_v12 }
  0xd3   :  { %1664 = vmatprep.subr.bf16.mxu0 %v5153_v13  ;;  %v5193_v13 = vld [vmem:[#allocation5 + $0x218] ss:$36 sps:$4 sm:$0xff]  }
  0xd4   :  { %1765 = vmatpush1.bf16.msra.mxu1 %v5070_v24 }
  0xd5   :  { %1766 = vmatprep.subr.bf16.mxu1 %v5075_v26 }
  0xd6   :  { %1665 = vmatpush1.bf16.msra.mxu0 %v5151_v14  ;;  %v5194_v14 = vld [vmem:[#allocation5 + $0x4a0] ss:$36 sps:$4 sm:$0xff]  }
  0xd7   :  { %1687 = vmatprep.subr.bf16.mxu0 %v5156_v16  ;;  %v5195_v16 = vld [vmem:[#allocation5 + $0x4e8] ss:$36 sps:$4 sm:$0xff]  }
  0xd8   :  { %1767 = vmatpush1.bf16.msra.mxu1 %v5073_v28 }
  0xd9   :  { %1768 = vmatprep.subr.bf16.mxu1 %v5078_v30  ;;  %1667 = vmatmul.mubr.bf16.vlgmr.msra.gmra.mrb[8].mxu0 %v5570_v55  ;;  %v5168_v30 = vld [vmem:[#allocation5 + $0x5b4] ss:$36 sps:$4 sm:$0xff]  }
  0xda   :  { %1676 = vmatprep.mubr.bf16.mxu0 %v5572_v58  ;;  %1688 = vmatpush1.bf16.msra.mxu0 %v5154_v18  ;;  %v5196_v18 = vld [vmem:[#allocation5 + $0x530] ss:$36 sps:$4 sm:$0xff]  }
  0xdb   :  { %1689 = vmatprep.subr.bf16.mxu0 %v5159_v19  ;;  %v5197_v19 = vld [vmem:[#allocation5 + $0x578] ss:$36 sps:$4 sm:$0xff]  }
  0xdc   :  { %1769 = vmatpush1.bf16.msra.mxu1 %v5076_v33  ;;  %v5166_v33 = vld [vmem:[#allocation5 + $0x5b0] ss:$36 sps:$4 sm:$0xff]  }
  0xdd   :  { %1770 = vmatprep.subr.bf16.mxu1 %v5081_v35 }
  0xde   :  { %1690 = vmatpush1.bf16.msra.mxu0 %v5157_v20  ;;  %v5198_v20 = vld [vmem:[#allocation5 + $0x5c0] ss:$36 sps:$4 sm:$0xff]  }
  0xdf   :  { %1691 = vmatprep.subr.bf16.mxu0 %v5162_v21  ;;  %v5199_v21 = vld [vmem:[#allocation5 + $0x608] ss:$36 sps:$4 sm:$0xff]  }
  0xe0   :  { %1771 = vmatpush1.bf16.msra.mxu1 %v5079_v37 }
  0xe1   :  { %1793 = vmatprep.subr.bf16.mxu1 %v5084_v40  ;;  %1677 = vmatmul.mubr.bf16.gmra.mrb[12].mxu0 %v5576_v3 }
  0xe2   :  { %1719 = vmatprep.mubr.bf16.mxu0 %v5497_v11  ;;  %1692 = vmatpush1.bf16.msra.mxu0 %v5160_v23 }
  0xe3   :  { %1773 = vmatmul.mubr.bf16.vlgmr.msra.gmra.mrb[8].mxu1 %v5570_v55  ;;  %1693 = vmatprep.subr.bf16.mxu0 %v5165_v25 }
  0xe4   :  { %1794 = vmatpush1.bf16.msra.mxu1 %v5082_v42  ;;  %1782 = vmatprep.mubr.bf16.mxu1 %v5572_v58  ;;  %v5174_v42 = vld [vmem:[#allocation5 + $0x644] ss:$36 sps:$4 sm:$0xff]  }
  0xe5   :  { %1795 = vmatprep.subr.bf16.mxu1 %v5087_v43 }
  0xe6   :  { %1694 = vmatpush1.bf16.msra.mxu0 %v5163_v27 }
  0xe7   :  { %1695 = vmatprep.subr.bf16.mxu0 %v5168_v30 }
  0xe8   :  { %1796 = vmatpush1.bf16.msra.mxu1 %v5085_v46  ;;  %v5175_v46 = vld [vmem:[#allocation5 + $0x688] ss:$36 sps:$4 sm:$0xff]  }
  0xe9   :  { %1797 = vmatprep.subr.bf16.mxu1 %v5093_v48  ;;  %v5179_v48 = vld [vmem:[#allocation5 + $0x20] ss:$36 sps:$4 sm:$0xff]  }
  0xea   :  { %1696 = vmatpush1.bf16.msra.mxu0 %v5166_v33 }
  0xeb   :  { %1783 = vmatmul.mubr.bf16.gmra.mrb[12].mxu1 %v5576_v3  ;;  %1697 = vmatprep.subr.bf16.mxu0 %v5171_v34 }
  0xec   :  { %1798 = vmatpush1.bf16.msra.mxu1 %v5091_v50  ;;  %1825 = vmatprep.mubr.bf16.mxu1 %v5497_v11  ;;  %v5181_v50 = vld [vmem:[#allocation5 + $0x68] ss:$36 sps:$4 sm:$0xff]  }
  0xed   :  { %1799 = vmatprep.subr.bf16.mxu1 %v5099_v51  ;;  %v5182_v51 = vld [vmem:[#allocation5 + $0x2f0] ss:$36 sps:$4 sm:$0xff]  }
  0xee   :  { %1698 = vmatpush1.bf16.msra.mxu0 %v5169_v39 }
  0xef   :  { %1699 = vmatprep.subr.bf16.mxu0 %v5174_v42 }
  0xf0   :  { %1800 = vmatpush1.bf16.msra.mxu1 %v5097_v54  ;;  %v5185_v54 = vld [vmem:[#allocation5 + $0xf8] ss:$36 sps:$4 sm:$0xff]  }
  0xf1   :  { %1801 = vmatprep.subr.bf16.mxu1 %v5105_v57 }
  0xf2   :  { %1700 = vmatpush1.bf16.msra.mxu0 %v5172_v44 }
  0xf3   :  { %1701 = vmatprep.subr.bf16.mxu0 %v5177_v45 }
  0xf4   :  { %1802 = vmatpush1.bf16.msra.mxu1 %v5103_v60  ;;  %v5187_v60 = vld [vmem:[#allocation5 + $0x140] ss:$36 sps:$4 sm:$0xff]  }
  0xf5   :  { %1803 = vmatprep.subr.bf16.mxu1 %v5111_v62  ;;  %v5188_v62 = vld [vmem:[#allocation5 + $0x3c8] ss:$36 sps:$4 sm:$0xff]  }
  0xf6   :  { %1702 = vmatpush1.bf16.msra.mxu0 %v5175_v46 }
  0xf7   :  { %4520 = vmatprep.subr.bf16.mxu0 %v5178_v47 }
  0xf8   :  { %1804 = vmatpush1.bf16.msra.mxu1 %v5109_v0 }
  0xf9   :  { %1805 = vmatprep.subr.bf16.mxu1 %v5117_v2  ;;  %1720 = vmatmul.mubr.bf16.vlgmr.msra.gmra.mrb[8].mxu0 %v5580_v31  ;;  %v5189_v2 = vld [vmem:[#allocation5 + $0x188] ss:$36 sps:$4 sm:$0xff]  }
  0xfa   :  { %1729 = vmatprep.mubr.bf16.mxu0 %v5497_v11  ;;  %4521 = vmatpush3.bf16.msra.mxu0 %v5179_v48 }
  0xfb   :  { %4522 = vmatprep.subr.bf16.mxu0 %v5180_v49 }
  0xfc   :  { %1806 = vmatpush1.bf16.msra.mxu1 %v5115_v5 }
  0xfd   :  { %1807 = vmatprep.subr.bf16.mxu1 %v5123_v7 }
  0xfe   :  { %4523 = vmatpush3.bf16.msra.mxu0 %v5181_v50  ;;  %v1944_v50 = vlaneseq }
  0xff   :  { %4524 = vmatprep.subr.bf16.mxu0 %v5182_v51 }
 0x100   :  { %1808 = vmatpush1.bf16.msra.mxu1 %v5121_v9  ;;  %v5664_v51 = vshrl.u32 %v1944_v50, 7 }
 0x101   :  { %4664 = vmatprep.subr.bf16.mxu1 %v5498_v17  ;;  %1730 = vmatmul.mubr.bf16.gmra.mrb[12].mxu0 %v5584_v38 }
 0x102   :  { %4525 = vmatpush3.bf16.msra.mxu0 %v5183_v52  ;;  %1878 = vmatprep.mubr.bf16.mxu0 %v5566_v15  ;;  %v1948_v52 = vand.u32 127, %v1944_v50 }
 0x103   :  { %1826 = vmatmul.mubr.bf16.vlgmr.msra.gmra.mrb[8].mxu1 %v5580_v31  ;;  %4526 = vmatprep.subr.bf16.mxu0 %v5184_v53  ;;  %v1946_v53 = vadd.s32 8, %v5664_v51 }
 0x104   :  { %1835 = vmatprep.mubr.bf16.mxu1 %v5497_v11  ;;  %vm5668_vm2 = vcmp.gt.s32.totalorder %v1948_v52, %v5664_v51 }
 0x105   :  { %vm5672_vm4 = vcmp.gt.s32.totalorder %v1948_v52, %v1946_v53 }
 0x106   :  { %4527 = vmatpush3.bf16.msra.mxu0 %v5185_v54 }
 0x107   :  { %4528 = vmatprep.subr.bf16.mxu0 %v5186_v56 }
 0x10a   :  { %4529 = vmatpush3.bf16.msra.mxu0 %v5187_v60 }
 0x10b   :  { %1836 = vmatmul.mubr.bf16.gmra.mrb[12].mxu1 %v5584_v38  ;;  %4530 = vmatprep.subr.bf16.mxu0 %v5188_v62 }
 0x10c   :  { %4666 = vmatprep.mubr.msk.bf16.mxu1 %vm5499_vm0, %v5498_v17 }
 0x10e   :  { %4531 = vmatpush3.bf16.msra.mxu0 %v5189_v2 }
 0x10f   :  { %4532 = vmatprep.subr.bf16.mxu0 %v5190_v4 }
 0x112   :  { %4533 = vmatpush3.bf16.msra.mxu0 %v5191_v6 }
 0x113   :  { %4534 = vmatprep.subr.bf16.mxu0 %v5192_v8 }
 0x116   :  { %4535 = vmatpush3.bf16.msra.mxu0 %v5193_v13 }
 0x117   :  { %4644 = vmatprep.subr.bf16.mxu0 %v5194_v14 }
 0x119   :  { %1879 = vmatmul.mubr.bf16.vlgmr.msra.gmra.mrb[16].mxu0 %v5570_v55  ;;  %v5200_v55 = vld [vmem:[#allocation5 + $0x650] ss:$36 sps:$4 sm:$0xff]  }
 0x11a   :  { %4645 = vmatpush3.bf16.msra.mxu0 %v5194_v14  ;;  %1886 = vmatprep.mubr.bf16.mxu0 %v5572_v58  ;;  %v5201_v58 = vld [vmem:[#allocation5 + $0x698] ss:$36 sps:$4 sm:$0xff]  }
 0x11b   :  { %4646 = vmatprep.subr.bf16.mxu0 %v5195_v16 }
 0x11e   :  { %4647 = vmatpush3.bf16.msra.mxu0 %v5195_v16 }
 0x11f   :  { %4648 = vmatprep.subr.bf16.mxu0 %v5196_v18 }
 0x121   :  { %1887 = vmatmul.mubr.bf16.gmra.mrb[20].mxu0 %v5576_v3 }
 0x122   :  { %4649 = vmatpush3.bf16.msra.mxu0 %v5196_v18  ;;  %4660 = vmatprep.mubr.bf16.mxu0 %v5580_v31 }
 0x123   :  { %4650 = vmatprep.subr.bf16.mxu0 %v5197_v19 }
 0x126   :  { %4651 = vmatpush3.bf16.msra.mxu0 %v5197_v19 }
 0x127   :  { %4652 = vmatprep.subr.bf16.mxu0 %v5198_v20 }
 0x12a   :  { %4653 = vmatpush3.bf16.msra.mxu0 %v5198_v20 }
 0x12b   :  { %4654 = vmatprep.subr.bf16.mxu0 %v5199_v21 }
 0x12e   :  { %4655 = vmatpush3.bf16.msra.mxu0 %v5199_v21 }
 0x12f   :  { %4656 = vmatprep.subr.bf16.mxu0 %v5200_v55 }
 0x132   :  { %4657 = vmatpush3.bf16.msra.mxu0 %v5200_v55 }
 0x133   :  { %4658 = vmatprep.subr.bf16.mxu0 %v5201_v58 }
 0x136   :  { %4659 = vmatpush3.bf16.msra.mxu0 %v5201_v58 }
 0x137   :  { %4682 = vmatprep.subr.bf16.mxu0 %v5498_v17 }
 0x139   :  { %4661 = vmatmul.mubr.bf16.vlgmr.msra.gmra.mrb[24].mxu0 %v5584_v38 }
 0x13a   :  { %4684 = vmatprep.mubr.msk.bf16.mxu0 %vm5499_vm0, %v5498_v17 }
 0x16c   :  { %v1509_v22 = vpop.f32.mrb[0].mxu0 }
 0x16d   :  { %v1511_v24 = vpop.f32.mrb[1].mxu0 }
 0x16e   :  { %v1513_v26 = vpop.f32.mrb[2].mxu0 }
 0x16f   :  { %v5610_v28 = vpack.c.bf16 %v1513_v26, %v1509_v22  ;;  %v1515_v29 = vpop.f32.mrb[3].mxu0 }
 0x170   :  { %v5612_v32 = vpack.c.bf16 %v1515_v29, %v1511_v24 }
 0x171   :  { %1954 = vrot.lane.b32.xlu0 %v5610_v28, %s5500_s2 }
 0x174   :  { %v1519_v35 = vpop.f32.mrb[4].mxu0 }
 0x175   :  { %v1521_v36 = vpop.f32.mrb[5].mxu0 }
 0x176   :  { %v1523_v37 = vpop.f32.mrb[6].mxu0  ;;  %v1615_v57 = vpop.f32.mrb[0].mxu1 }
 0x177   :  { %v5616_v40 = vpack.c.bf16 %v1523_v37, %v1519_v35  ;;  %v1525_v41 = vpop.f32.mrb[7].mxu0  ;;  %v1617_v59 = vpop.f32.mrb[1].mxu1 }
 0x178   :  { %v5618_v43 = vpack.c.bf16 %v1525_v41, %v1521_v36  ;;  %v1619_v61 = vpop.f32.mrb[2].mxu1 }
 0x179   :  { %v5624_v63 = vpack.c.bf16 %v1619_v61, %v1615_v57  ;;  %v1621_v0 = vpop.f32.mrb[3].mxu1 }
 0x17a   :  { %v5626_v1 = vpack.c.bf16 %v1621_v0, %v1617_v59 }
 0x17b   :  { %v2083_v52 = vsel %vm1956_vm1, %v5624_v63, 0 }
 0x17e   :  { %v1625_v5 = vpop.f32.mrb[4].mxu1 }
 0x17f   :  { %v1627_v15 = vpop.f32.mrb[5].mxu1 }
 0x180   :  { %v1629_v7 = vpop.f32.mrb[6].mxu1 }
 0x181   :  { %v5628_v9 = vpack.c.bf16 %v1629_v7, %v1625_v5  ;;  %v1631_v10 = vpop.f32.mrb[7].mxu1 }
 0x182   :  { %v5630_v12 = vpack.c.bf16 %v1631_v10, %v1627_v15 }
 0x1cc   :  { %v1721_v35 = vpop.f32.mrb[8].mxu0 }
 0x1cd   :  { %v1723_v36 = vpop.f32.mrb[9].mxu0 }
 0x1ce   :  { %v1725_v37 = vpop.f32.mrb[10].mxu0 }
 0x1cf   :  { %v5656_v39 = vpack.c.bf16 %v1725_v37, %v1721_v35  ;;  %v1727_v41 = vpop.f32.mrb[11].mxu0 }
 0x1d0   :  { %v5658_v42 = vpack.c.bf16 %v1727_v41, %v1723_v36 }
 0x1d4   :  { %v1731_v44 = vpop.f32.mrb[12].mxu0 }
 0x1d5   :  { %v1733_v45 = vpop.f32.mrb[13].mxu0 }
 0x1d6   :  { %v1827_v38 = vpop.f32.mrb[8].mxu1  ;;  %v1735_v46 = vpop.f32.mrb[14].mxu0 }
 0x1d7   :  { %v1829_v22 = vpop.f32.mrb[9].mxu1  ;;  %v5660_v47 = vpack.c.bf16 %v1735_v46, %v1731_v44  ;;  %v1737_v48 = vpop.f32.mrb[15].mxu0 }
 0x1d8   :  { %v1831_v23 = vpop.f32.mrb[10].mxu1  ;;  %v5662_v49 = vpack.c.bf16 %v1737_v48, %v1733_v45 }
 0x1d9   :  { %v5648_v24 = vpack.c.bf16 %v1831_v23, %v1827_v38  ;;  %v1833_v25 = vpop.f32.mrb[11].mxu1 }
 0x1da   :  { %v5650_v26 = vpack.c.bf16 %v1833_v25, %v1829_v22 }
 0x1de   :  { %v1837_v27 = vpop.f32.mrb[12].mxu1 }
 0x1df   :  { %v1839_v29 = vpop.f32.mrb[13].mxu1 }
 0x1e0   :  { %v1841_v30 = vpop.f32.mrb[14].mxu1 }
 0x1e1   :  { %v5652_v33 = vpack.c.bf16 %v1841_v30, %v1837_v27 }
 0x1e3   :  { %v1955_v3 = vpop.permute.xlu0 %1954 }
 0x1e4   :  { %v1961_v31 = vsel %vm1956_vm1, %v1955_v3, 0 }
 0x1e5   :  { %4665 = vmatpush3.bf16.xpose.msra.mxu1 %v1961_v31 }
 0x1e6   :  { %4670 = vmatprep.subr.bf16.mxu1 %v5498_v17 }
 0x1ec   :  { %4667 = vmatmul.mubr.msk.bf16.vlgmr.msra.gmra.mrb[16].mxu1 %vm1956_vm1, %v5610_v28  ;;  %v1843_v28 = vpop.f32.mrb[15].mxu1  ;;  %v4536_v5 = vpop.f32.mrb[16].mxu0 }
 0x1ed   :  { %4671 = vmatpush3.bf16.msra.mxu1 %v5612_v32  ;;  %4672 = vmatprep.mubr.msk.bf16.mxu1 %vm5499_vm0, %v5498_v17  ;;  %v5654_v34 = vpack.c.bf16 %v1843_v28, %v1839_v29  ;;  %v4537_v15 = vpop.f32.mrb[17].mxu0 }
 0x1ee   :  { %4676 = vmatprep.subr.bf16.mxu1 %v5498_v17  ;;  %v4539_v6 = vpop.f32.mrb[18].mxu0  ;;  %v4538_v14 = vadd.f32 %v4537_v15, %v4536_v5 }
 0x1ef   :  { %v4540_v7 = vpop.f32.mrb[19].mxu0 }
 0x1f0   :  { %v4541_v16 = vadd.f32 %v4540_v7, %v4539_v6  ;;  %v3092_v7 = vsel %vm1956_vm1, %v5662_v49, 0 }
 0x1f4   :  { %v4542_v8 = vpop.f32.mrb[20].mxu0 }
 0x1f5   :  { %v4543_v10 = vpop.f32.mrb[21].mxu0 }
 0x1f6   :  { %v4545_v13 = vpop.f32.mrb[22].mxu0  ;;  %v4544_v55 = vadd.f32 %v4543_v10, %v4542_v8 }
 0x2bf   :  { %v1997_v56 = vpop.f32.mrb[16].mxu1 }
 0x2c0   :  { %v2004_v59 = vsel %vm5668_vm2, -1e+30, %v1997_v56  ;;  %v4668_v60 = vpop.f32.mrb[17].mxu1 }
 0x2c1   :  { %v2000_v61 = vpop.f32.mrb[18].mxu1  ;;  %v2007_v62 = vsel %vm2006_vm3, %v2004_v59, -inf }
 0x2c2   :  { %v2005_v0 = vsel %vm5672_vm4, -1e+30, %v2000_v61  ;;  %2008 = vmax.xlane.f32.xlu0 %v2007_v62  ;;  %v4669_v2 = vpop.f32.mrb[19].mxu1  ;;  %v2330_v61 = vsel %vm1956_vm1, %v5658_v42, 0 }
 0x2c3   :  { %v2010_v4 = vsel %vm2006_vm3, %v2005_v0, -inf }
 0x2c4   :  { %2011 = vmax.xlane.f32.xlu1 %v2010_v4 }
 0x2d5   :  { %2077 = vrot.lane.b32.xlu1 %v5612_v32, %s5500_s2  ;;  %v4546_v32 = vpop.f32.mrb[23].mxu0 }
 0x2d6   :  { %v4662_v18 = vpop.f32.mrb[24].mxu0  ;;  %v4547_v58 = vadd.f32 %v4546_v32, %v4545_v13 }
 0x2d7   :  { %v1929_v19 = vpop.f32.mrb[25].mxu0  ;;  %v1938_v22 = vadd.f32 %v4662_v18, %v4544_v55 }
 0x2d8   :  { %2718 = vrot.lane.b32.xlu0 %v5616_v40, %s5500_s2  ;;  %v4663_v20 = vpop.f32.mrb[26].mxu0  ;;  %v1930_v3 = vadd.f32 %v4538_v14, %v1929_v19 }
 0x2d9   :  { %2203 = vrot.lane.b32.xlu1 %v5626_v1, %s5500_s2  ;;  %v1932_v21 = vpop.f32.mrb[27].mxu0  ;;  %v1941_v23 = vadd.f32 %v4663_v20, %v4547_v58 }
 0x2da   :  { %v1933_v31 = vadd.f32 %v4541_v16, %v1932_v21 }
 0x2db   :  { %v5700_v25 = vpack.c.bf16 %v1941_v23, %v1938_v22 }
 0x2dc   :  { %v5696_v38 = vpack.c.bf16 %v1933_v31, %v1930_v3 }
 0x2dd   :  { %2324 = vrot.lane.b32.xlu1 %v5656_v39, %s5500_s2 }
 0x2e1   :  { %2450 = vrot.lane.b32.xlu1 %v5648_v24, %s5500_s2 }
 0x2e5   :  { %2571 = vrot.lane.b32.xlu1 %v5650_v26, %s5500_s2 }
 0x2e9   :  { %2839 = vrot.lane.b32.xlu1 %v5618_v43, %s5500_s2 }
 0x2ed   :  { %2965 = vrot.lane.b32.xlu1 %v5630_v12, %s5500_s2 }
 0x2f1   :  { %3086 = vrot.lane.b32.xlu1 %v5660_v47, %s5500_s2 }
 0x2f5   :  { %3212 = vrot.lane.b32.xlu1 %v5652_v33, %s5500_s2 }
 0x2f9   :  { %3333 = vrot.lane.b32.xlu1 %v5654_v34, %s5500_s2 }
 0x2fd   :  { %2148 = vrot.lane.b32.xlu1 %v5624_v63, %s5500_s2 }
 0x34f   :  { %v2009_v27 = vpop.xlane.xlu0 %2008 }
 0x350   :  { %v2013_v29 = vsub.f32 %v2004_v59, %v2009_v27 }
 0x351   :  { %v2012_v30 = vpop.xlane.xlu1 %2011 }
 0x352   :  { %v2015_v28 = vmul.f32 1.442695, %v2013_v29  ;;  %v2014_v35 = vsub.f32 %v2005_v0, %v2012_v30 }
 0x353   :  { %v2719_v5 = vpop.permute.xlu0 %2718 }
 0x354   :  { %v2017_v36 = vmul.f32 1.442695, %v2014_v35  ;;  %5298 = vpow2.f32 %v2015_v28  ;;  %v2724_v15 = vsel %vm1956_vm1, %v2719_v5, 0 }
 0x355   :  { %v2078_v37 = vpop.permute.xlu1 %2077 }
 0x356   :  { %5300 = vpow2.f32 %v2017_v36 }
 0x359   :  { %v2204_v41 = vpop.permute.xlu1 %2203 }
 0x35a   :  { %v2209_v59 = vsel %vm1956_vm1, %v2204_v41, 0 }
 0x35d   :  { %v2325_v44 = vpop.permute.xlu1 %2324 }
 0x35e   :  { %v5710_v45 = vpop.eup %5298 }
 0x360   :  { %v5712_v46 = vpop.eup %5300 }
 0x361   :  { %v2451_v48 = vpop.permute.xlu1 %2450  ;;  %v2025_v50 = vpack.c.bf16 %v5712_v46, %v5710_v45 }
 0x362   :  { %v2456_v2 = vsel %vm1956_vm1, %v2451_v48, 0 }
 0x363   :  { %4673 = vmatmul.mubr.msk.bf16.vlgmr.msra.gmra.mrb[20].mxu1 %vm2006_vm3, %v2025_v50 }
 0x364   :  { %4677 = vmatpush3.bf16.xpose.msra.mxu1 %v2083_v52  ;;  %4678 = vmatprep.mubr.msk.bf16.mxu1 %vm5499_vm0, %v5498_v17 }
 0x365   :  { %v2572_v53 = vpop.permute.xlu1 %2571  ;;  %4688 = vmatprep.subr.bf16.mxu1 %v5498_v17 }
 0x369   :  { %v2840_v56 = vpop.permute.xlu1 %2839 }
 0x36b   :  { %4679 = vmatmul.mubr.msk.bf16.vlgmr.msra.gmra.mrb[24].mxu1 %vm1956_vm1, %v2078_v37 }
 0x36c   :  { %4689 = vmatpush3.bf16.xpose.msra.mxu1 %v2209_v59  ;;  %4690 = vmatprep.mubr.msk.bf16.mxu1 %vm5499_vm0, %v5498_v17 }
 0x36d   :  { %v2966_v60 = vpop.permute.xlu1 %2965  ;;  %4700 = vmatprep.subr.bf16.mxu1 %v5498_v17 }
 0x36e   :  { %v2971_v6 = vsel %vm1956_vm1, %v2966_v60, 0 }
 0x371   :  { %v3087_v63 = vpop.permute.xlu1 %3086 }
 0x373   :  { %4691 = vmatmul.mubr.msk.bf16.vlgmr.msra.gmra.mrb[28].mxu1 %vm1956_vm1, %v5626_v1  ;;  %v2577_v1 = vsel %vm1956_vm1, %v5696_v38, 0 }
 0x374   :  { %4701 = vmatpush3.bf16.xpose.msra.mxu1 %v2330_v61  ;;  %4702 = vmatprep.mubr.msk.bf16.mxu1 %vm5499_vm0, %v5498_v17 }
 0x375   :  { %v3213_v62 = vpop.permute.xlu1 %3212  ;;  %4712 = vmatprep.subr.bf16.mxu1 %v5498_v17 }
 0x379   :  { %v3334_v0 = vpop.permute.xlu1 %3333 }
 0x37b   :  { %4703 = vmatmul.mubr.msk.bf16.vlgmr.msra.gmra.mrb[32].mxu1 %vm1956_vm1, %v2325_v44 }
 0x37c   :  { %4713 = vmatpush3.bf16.xpose.msra.mxu1 %v2456_v2  ;;  %4714 = vmatprep.mubr.msk.bf16.mxu1 %vm5499_vm0, %v5498_v17 }
 0x37d   :  { %v2149_v4 = vpop.permute.xlu1 %2148  ;;  %4724 = vmatprep.subr.bf16.mxu1 %v5498_v17 }
 0x37e   :  { %4683 = vmatpush3.bf16.msra.mxu0 %v2149_v4 }
 0x37f   :  { %4694 = vmatprep.subr.bf16.mxu0 %v5498_v17 }
 0x383   :  { %4715 = vmatmul.mubr.msk.bf16.vlgmr.msra.gmra.mrb[36].mxu1 %vm1956_vm1, %v5648_v24  ;;  %v2845_v24 = vsel %vm1956_vm1, %v5628_v9, 0 }
 0x384   :  { %4725 = vmatpush3.bf16.xpose.msra.mxu1 %v2577_v1  ;;  %4726 = vmatprep.mubr.msk.bf16.mxu1 %vm5499_vm0, %v5498_v17 }
 0x385   :  { %4736 = vmatprep.subr.bf16.mxu1 %v5498_v17 }
 0x38b   :  { %4727 = vmatmul.mubr.msk.bf16.vlgmr.msra.gmra.mrb[40].mxu1 %vm1956_vm1, %v2572_v53 }
 0x38c   :  { %4737 = vmatpush3.bf16.xpose.msra.mxu1 %v2724_v15  ;;  %4738 = vmatprep.mubr.msk.bf16.mxu1 %vm5499_vm0, %v5498_v17 }
 0x38d   :  { %4748 = vmatprep.subr.bf16.mxu1 %v5498_v17 }
 0x393   :  { %4739 = vmatmul.mubr.msk.bf16.vlgmr.msra.gmra.mrb[44].mxu1 %vm1956_vm1, %v5616_v40  ;;  %v3218_v40 = vsel %vm1956_vm1, %v3213_v62, 0 }
 0x394   :  { %4749 = vmatpush3.bf16.xpose.msra.mxu1 %v2845_v24  ;;  %4750 = vmatprep.mubr.msk.bf16.mxu1 %vm5499_vm0, %v5498_v17 }
 0x395   :  { %4760 = vmatprep.subr.bf16.mxu1 %v5498_v17 }
 0x39b   :  { %4751 = vmatmul.mubr.msk.bf16.vlgmr.msra.gmra.mrb[48].mxu1 %vm1956_vm1, %v2840_v56 }
 0x39c   :  { %4761 = vmatpush3.bf16.xpose.msra.mxu1 %v2971_v6  ;;  %4762 = vmatprep.mubr.msk.bf16.mxu1 %vm5499_vm0, %v5498_v17 }
 0x39d   :  { %4772 = vmatprep.subr.bf16.mxu1 %v5498_v17 }
 0x3a3   :  { %4763 = vmatmul.mubr.msk.bf16.vlgmr.msra.gmra.mrb[52].mxu1 %vm1956_vm1, %v5630_v12  ;;  %v3339_v12 = vsel %vm1956_vm1, %v5700_v25, 0 }
 0x3a4   :  { %4773 = vmatpush3.bf16.xpose.msra.mxu1 %v3092_v7  ;;  %4774 = vmatprep.mubr.msk.bf16.mxu1 %vm5499_vm0, %v5498_v17 }
 0x3a5   :  { %4784 = vmatprep.subr.bf16.mxu1 %v5498_v17 }
 0x3ab   :  { %4775 = vmatmul.mubr.msk.bf16.vlgmr.msra.gmra.mrb[56].mxu1 %vm1956_vm1, %v3087_v63 }
 0x3ac   :  { %4785 = vmatpush3.bf16.xpose.msra.mxu1 %v3218_v40  ;;  %4786 = vmatprep.mubr.msk.bf16.mxu1 %vm5499_vm0, %v5498_v17 }
 0x3ad   :  { %4796 = vmatprep.subr.bf16.mxu1 %v5498_v17 }
 0x3b3   :  { %4787 = vmatmul.mubr.msk.bf16.vlgmr.msra.gmra.mrb[60].mxu1 %vm1956_vm1, %v5652_v33 }
 0x3b4   :  { %4797 = vmatpush3.bf16.xpose.msra.mxu1 %v3339_v12  ;;  %4798 = vmatprep.mubr.msk.bf16.mxu1 %vm5499_vm0, %v5498_v17 }
 0x3bb   :  { %4799 = vmatmul.mubr.msk.bf16.vlgmr.msra.gmra.mrb[64].mxu1 %vm1956_vm1, %v3334_v0 }
 0x436   :  { %v5783_v8 = vpop.f32.mrb[20].mxu1 }
 0x437   :  { %v4674_v10 = vpop.f32.mrb[21].mxu1 }
 0x438   :  { %v5785_v13 = vpop.f32.mrb[22].mxu1 }
 0x439   :  { %v4675_v32 = vpop.f32.mrb[23].mxu1 }
 0x43e   :  { %v2119_v14 = vpop.f32.mrb[24].mxu1 }
 0x43f   :  { %v5789_v16 = vsel %vm5668_vm2, -1e+30, %v2119_v14  ;;  %v4680_v33 = vpop.f32.mrb[25].mxu1 }
 0x440   :  { %v2122_v18 = vpop.f32.mrb[26].mxu1  ;;  %v2128_v19 = vsel %vm2006_vm3, %v5789_v16, -inf }
 0x441   :  { %v5795_v20 = vsel %vm5672_vm4, -1e+30, %v2122_v18  ;;  %v4681_v21 = vpop.f32.mrb[27].mxu1  ;;  %2129 = vmax.xlane.f32.xlu0 %v2128_v19 }
 0x442   :  { %v2131_v55 = vsel %vm2006_vm3, %v5795_v20, -inf }
 0x443   :  { %2132 = vmax.xlane.f32.xlu1 %v2131_v55 }
 0x446   :  { %v2245_v58 = vpop.f32.mrb[28].mxu1 }
 0x447   :  { %v5801_v3 = vsel %vm5668_vm2, -1e+30, %v2245_v58  ;;  %v4692_v31 = vpop.f32.mrb[29].mxu1 }
 0x448   :  { %v2248_v22 = vpop.f32.mrb[30].mxu1  ;;  %v2254_v23 = vsel %vm2006_vm3, %v5801_v3, -inf }
 0x449   :  { %v5807_v27 = vsel %vm5672_vm4, -1e+30, %v2248_v22  ;;  %v4693_v29 = vpop.f32.mrb[31].mxu1  ;;  %2255 = vmax.xlane.f32.xlu0 %v2254_v23 }
 0x44a   :  { %v2257_v30 = vsel %vm2006_vm3, %v5807_v27, -inf }
 0x44d   :  { %2258 = vmax.xlane.f32.xlu0 %v2257_v30 }
 0x44e   :  { %v2366_v28 = vpop.f32.mrb[32].mxu1 }
 0x44f   :  { %v4704_v35 = vpop.f32.mrb[33].mxu1  ;;  %v5851_v18 = vsel %vm5668_vm2, -1e+30, %v2366_v28 }
 0x450   :  { %v2369_v36 = vpop.f32.mrb[34].mxu1  ;;  %v2375_v55 = vsel %vm2006_vm3, %v5851_v18, -inf }
 0x451   :  { %v5813_v37 = vsel %vm5672_vm4, -1e+30, %v2369_v36  ;;  %v4705_v41 = vpop.f32.mrb[35].mxu1 }
 0x452   :  { %v2378_v44 = vsel %vm2006_vm3, %v5813_v37, -inf }
 0x453   :  { %2379 = vmax.xlane.f32.xlu0 %v2378_v44 }
 0x454   :  { %2395 = vrot.lane.b32.xlu1 %v5658_v42, %s5500_s2 }
 0x456   :  { %v2492_v48 = vpop.f32.mrb[36].mxu1 }
 0x457   :  { %v4716_v50 = vpop.f32.mrb[37].mxu1  ;;  %v5857_v58 = vsel %vm5668_vm2, -1e+30, %v2492_v48 }
 0x458   :  { %v2495_v52 = vpop.f32.mrb[38].mxu1  ;;  %v2501_v23 = vsel %vm2006_vm3, %v5857_v58, -inf }
 0x459   :  { %v5821_v53 = vsel %vm5672_vm4, -1e+30, %v2495_v52  ;;  %v4717_v56 = vpop.f32.mrb[39].mxu1 }
 0x45a   :  { %v2504_v59 = vsel %vm2006_vm3, %v5821_v53, -inf }
 0x45b   :  { %2505 = vmax.xlane.f32.xlu0 %v2504_v59 }
 0x45e   :  { %v2613_v60 = vpop.f32.mrb[40].mxu1 }
 0x45f   :  { %v5827_v63 = vsel %vm5668_vm2, -1e+30, %v2613_v60  ;;  %v4728_v61 = vpop.f32.mrb[41].mxu1 }
 0x460   :  { %v2616_v62 = vpop.f32.mrb[42].mxu1  ;;  %v2622_v42 = vsel %vm2006_vm3, %v5827_v63, -inf }
 0x461   :  { %v5833_v0 = vsel %vm5672_vm4, -1e+30, %v2616_v62  ;;  %2623 = vmax.xlane.f32.xlu0 %v2622_v42  ;;  %v4729_v2 = vpop.f32.mrb[43].mxu1 }
 0x462   :  { %v2625_v4 = vsel %vm2006_vm3, %v5833_v0, -inf }
 0x465   :  { %2626 = vmax.xlane.f32.xlu0 %v2625_v4 }
 0x466   :  { %v2760_v1 = vpop.f32.mrb[44].mxu1 }
 0x467   :  { %v5839_v5 = vsel %vm5668_vm2, -1e+30, %v2760_v1  ;;  %v4740_v15 = vpop.f32.mrb[45].mxu1 }
 0x468   :  { %v2763_v24 = vpop.f32.mrb[46].mxu1  ;;  %v2769_v6 = vsel %vm2006_vm3, %v5839_v5, -inf }
 0x469   :  { %v5845_v7 = vsel %vm5672_vm4, -1e+30, %v2763_v24  ;;  %2770 = vmax.xlane.f32.xlu0 %v2769_v6  ;;  %v4741_v40 = vpop.f32.mrb[47].mxu1 }
 0x46a   :  { %v2772_v12 = vsel %vm2006_vm3, %v5845_v7, -inf }
 0x46d   :  { %2773 = vmax.xlane.f32.xlu0 %v2772_v12 }
 0x46e   :  { %v2881_v10 = vpop.f32.mrb[48].mxu1 }
 0x46f   :  { %v4752_v32 = vpop.f32.mrb[49].mxu1  ;;  %v5889_v15 = vsel %vm5668_vm2, -1e+30, %v2881_v10 }
 0x470   :  { %v2884_v14 = vpop.f32.mrb[50].mxu1  ;;  %v2890_v24 = vsel %vm2006_vm3, %v5889_v15, -inf }
 0x471   :  { %v4753_v33 = vpop.f32.mrb[51].mxu1  ;;  %v5863_v29 = vsel %vm5672_vm4, -1e+30, %v2884_v14 }
 0x472   :  { %v2893_v35 = vsel %vm2006_vm3, %v5863_v29, -inf }
 0x476   :  { %v3007_v19 = vpop.f32.mrb[52].mxu1 }
 0x477   :  { %v4764_v21 = vpop.f32.mrb[53].mxu1  ;;  %v5897_v6 = vsel %vm5668_vm2, -1e+30, %v3007_v19 }
 0x478   :  { %2376 = vmax.xlane.f32.xlu1 %v2375_v55  ;;  %v3010_v31 = vpop.f32.mrb[54].mxu1  ;;  %v3016_v40 = vsel %vm2006_vm3, %v5897_v6, -inf  ;;  %v2019_v55 = vsel %vm2006_vm3, %v5710_v45, 0.0 }
 0x479   :  { %v4765_v22 = vpop.f32.mrb[55].mxu1  ;;  %v5903_v12 = vsel %vm5672_vm4, -1e+30, %v3010_v31 }
 0x47a   :  { %v3019_v10 = vsel %vm2006_vm3, %v5903_v12, -inf }
 0x47c   :  { %2502 = vmax.xlane.f32.xlu1 %v2501_v23 }
 0x47e   :  { %v3128_v30 = vpop.f32.mrb[56].mxu1 }
 0x47f   :  { %v4776_v28 = vpop.f32.mrb[57].mxu1 }
 0x480   :  { %2894 = vmax.xlane.f32.xlu1 %v2893_v35  ;;  %v3131_v36 = vpop.f32.mrb[58].mxu1 }
 0x481   :  { %v5869_v41 = vsel %vm5672_vm4, -1e+30, %v3131_v36  ;;  %v4777_v44 = vpop.f32.mrb[59].mxu1 }
 0x482   :  { %v3140_v48 = vsel %vm2006_vm3, %v5869_v41, -inf }
 0x483   :  { %2642 = vrot.lane.b32.xlu0 %v5696_v38, %s5500_s2 }
 0x484   :  { %3141 = vmax.xlane.f32.xlu1 %v3140_v48 }
 0x486   :  { %v3254_v50 = vpop.f32.mrb[60].mxu1 }
 0x487   :  { %v5877_v52 = vsel %vm5668_vm2, -1e+30, %v3254_v50  ;;  %v4788_v56 = vpop.f32.mrb[61].mxu1 }
 0x488   :  { %v3257_v59 = vpop.f32.mrb[62].mxu1  ;;  %v3263_v60 = vsel %vm2006_vm3, %v5877_v52, -inf }
 0x489   :  { %v5883_v61 = vsel %vm5672_vm4, -1e+30, %v3257_v59  ;;  %3264 = vmax.xlane.f32.xlu1 %v3263_v60  ;;  %v4789_v62 = vpop.f32.mrb[63].mxu1 }
 0x48a   :  { %v3266_v38 = vsel %vm2006_vm3, %v5883_v61, -inf }
 0x48d   :  { %3267 = vmax.xlane.f32.xlu1 %v3266_v38 }
 0x48e   :  { %v3375_v42 = vpop.f32.mrb[64].mxu1 }
 0x48f   :  { %v4800_v2 = vpop.f32.mrb[65].mxu1  ;;  %v5915_v14 = vsel %vm5668_vm2, -1e+30, %v3375_v42 }
 0x490   :  { %v3378_v4 = vpop.f32.mrb[66].mxu1  ;;  %v3384_v33 = vsel %vm2006_vm3, %v5915_v14, -inf }
 0x491   :  { %v4801_v1 = vpop.f32.mrb[67].mxu1  ;;  %v5921_v19 = vsel %vm5672_vm4, -1e+30, %v3378_v4 }
 0x492   :  { %v3387_v21 = vsel %vm2006_vm3, %v5921_v19, -inf }
 0x49e   :  { %2910 = vrot.lane.b32.xlu1 %v5628_v9, %s5500_s2  ;;  %v5909_v9 = vsel %vm5668_vm2, -1e+30, %v3128_v30 }
 0x49f   :  { %v3137_v32 = vsel %vm2006_vm3, %v5909_v9, -inf }
 0x4a2   :  { %2891 = vmax.xlane.f32.xlu0 %v2890_v24 }
 0x4a6   :  { %3017 = vmax.xlane.f32.xlu0 %v3016_v40 }
 0x4aa   :  { %3020 = vmax.xlane.f32.xlu0 %v3019_v10 }
 0x4ae   :  { %3138 = vmax.xlane.f32.xlu0 %v3137_v32 }
 0x4b2   :  { %3385 = vmax.xlane.f32.xlu0 %v3384_v33 }
 0x4c2   :  { %3388 = vmax.xlane.f32.xlu1 %v3387_v21 }
 0x4c6   :  { %2020 = vadd.xlane.f32.xlu1 %v2019_v55 }
 0x4c8   :  { %3157 = vrot.lane.b32.xlu0 %v5662_v49, %s5500_s2 }
 0x4cc   :  { %3404 = vrot.lane.b32.xlu0 %v5700_v25, %s5500_s2 }
 0x4ce   :  { %v2130_v54 = vpop.xlane.xlu0 %2129 }
 0x4cf   :  { %v2134_v31 = vsub.f32 %v5789_v16, %v2130_v54 }
 0x4d0   :  { %v2133_v57 = vpop.xlane.xlu1 %2132 }
 0x4d1   :  { %v2136_v22 = vmul.f32 1.442695, %v2134_v31  ;;  %v2135_v23 = vsub.f32 %v5795_v20, %v2133_v57 }
 0x4d3   :  { %5302 = vpow2.f32 %v2136_v22  ;;  %v2138_v30 = vmul.f32 1.442695, %v2135_v23 }
 0x4d4   :  { %v2396_v42 = vpop.permute.xlu1 %2395 }
 0x4d5   :  { %5304 = vpow2.f32 %v2138_v30 }
 0x4d6   :  { %v2256_v28 = vpop.xlane.xlu0 %2255 }
 0x4d7   :  { %v2260_v45 = vsub.f32 %v5801_v3, %v2256_v28 }
 0x4d9   :  { %v2262_v35 = vmul.f32 1.442695, %v2260_v45 }
 0x4da   :  { %v2259_v36 = vpop.xlane.xlu0 %2258 }
 0x4db   :  { %5306 = vpow2.f32 %v2262_v35  ;;  %v2261_v49 = vsub.f32 %v5807_v27, %v2259_v36 }
 0x4dd   :  { %v5303_v44 = vpop.eup %5302  ;;  %v2264_v25 = vmul.f32 1.442695, %v2261_v49 }
 0x4de   :  { %v2140_v48 = vsel %vm2006_vm3, %v5303_v44, 0.0 }
 0x4df   :  { %v5305_v16 = vpop.eup %5304  ;;  %5308 = vpow2.f32 %v2264_v25  ;;  %2141 = vadd.xlane.f32.xlu1 %v2140_v48  ;;  %v2022_v48 = vsel %vm2006_vm3, %v5712_v46, 0.0 }
 0x4e0   :  { %v2380_v50 = vpop.xlane.xlu0 %2379  ;;  %v2146_v20 = vpack.c.bf16 %v5305_v16, %v5303_v44  ;;  %v2143_v3 = vsel %vm2006_vm3, %v5305_v16, 0.0 }
 0x4e1   :  { %v2382_v56 = vsub.f32 %v5813_v37, %v2380_v50 }
 0x4e2   :  { %4685 = vmatmul.mubr.msk.bf16.vlgmr.msra.gmra.mrb[28].mxu0 %vm2006_vm3, %v2146_v20 }
 0x4e3   :  { %v2385_v59 = vmul.f32 1.442695, %v2382_v56  ;;  %4695 = vmatpush3.bf16.msra.mxu0 %v5656_v39  ;;  %2144 = vadd.xlane.f32.xlu1 %v2143_v3 }
 0x4e4   :  { %4696 = vmatprep.mubr.msk.bf16.mxu0 %vm5499_vm0, %v5498_v17  ;;  %4706 = vmatprep.subr.bf16.mxu0 %v5498_v17 }
 0x4e5   :  { %v5307_v27 = vpop.eup %5306  ;;  %5310 = vpow2.f32 %v2385_v59 }
 0x4e6   :  { %v2266_v60 = vsel %vm2006_vm3, %v5307_v27, 0.0 }
 0x4e7   :  { %2267 = vadd.xlane.f32.xlu1 %v2266_v60 }
 0x4e8   :  { %v2506_v4 = vpop.xlane.xlu0 %2505 }
 0x4e9   :  { %v5309_v62 = vpop.eup %5308  ;;  %v2508_v32 = vsub.f32 %v5821_v53, %v2506_v4 }
 0x4ea   :  { %v2269_v37 = vsel %vm2006_vm3, %v5309_v62, 0.0  ;;  %v2272_v38 = vpack.c.bf16 %v5309_v62, %v5307_v27 }
 0x4eb   :  { %2270 = vadd.xlane.f32.xlu0 %v2269_v37  ;;  %v2511_v57 = vmul.f32 1.442695, %v2508_v32 }
 0x4ec   :  { %4697 = vmatmul.mubr.msk.bf16.vlgmr.msra.gmra.mrb[32].mxu0 %vm2006_vm3, %v2272_v38 }
 0x4ed   :  { %4707 = vmatpush3.bf16.msra.mxu0 %v2396_v42  ;;  %4708 = vmatprep.mubr.msk.bf16.mxu0 %vm5499_vm0, %v5498_v17 }
 0x4ee   :  { %4718 = vmatprep.subr.bf16.mxu0 %v5498_v17  ;;  %v2624_v1 = vpop.xlane.xlu0 %2623 }
 0x4ef   :  { %v5311_v39 = vpop.eup %5310  ;;  %v2628_v21 = vsub.f32 %v5827_v63, %v2624_v1 }
 0x4f0   :  { %v2390_v2 = vsel %vm2006_vm3, %v5311_v39, 0.0 }
 0x4f1   :  { %2391 = vadd.xlane.f32.xlu1 %v2390_v2  ;;  %v2630_v23 = vmul.f32 1.442695, %v2628_v21 }
 0x4f2   :  { %v2627_v24 = vpop.xlane.xlu0 %2626 }
 0x4f3   :  { %v2629_v22 = vsub.f32 %v5833_v0, %v2627_v24 }
 0x4f6   :  { %v2771_v33 = vpop.xlane.xlu0 %2770 }
 0x4f7   :  { %v2775_v30 = vsub.f32 %v5839_v5, %v2771_v33 }
 0x4f9   :  { %v2777_v53 = vmul.f32 1.442695, %v2775_v30 }
 0x4fa   :  { %v2774_v45 = vpop.xlane.xlu0 %2773 }
 0x4fb   :  { %v2776_v63 = vsub.f32 %v5845_v7, %v2774_v45 }
 0x4fe   :  { %v2643_v27 = vpop.permute.xlu0 %2642 }
 0x505   :  { %v2377_v40 = vpop.xlane.xlu1 %2376 }
 0x506   :  { %v2381_v10 = vsub.f32 %v5851_v18, %v2377_v40  ;;  %v2632_v18 = vmul.f32 1.442695, %v2629_v22 }
 0x508   :  { %v2383_v55 = vmul.f32 1.442695, %v2381_v10 }
 0x509   :  { %v2503_v54 = vpop.xlane.xlu1 %2502 }
 0x50a   :  { %5312 = vpow2.f32 %v2383_v55  ;;  %v2507_v31 = vsub.f32 %v5857_v58, %v2503_v54  ;;  %v2779_v58 = vmul.f32 1.442695, %v2776_v63 }
 0x50c   :  { %v2509_v28 = vmul.f32 1.442695, %v2507_v31 }
 0x50d   :  { %v2895_v35 = vpop.xlane.xlu1 %2894 }
 0x50e   :  { %5314 = vpow2.f32 %v2509_v28  ;;  %v2897_v49 = vsub.f32 %v5863_v29, %v2895_v35 }
 0x50f   :  { %5316 = vpow2.f32 %v2511_v57 }
 0x510   :  { %5318 = vpow2.f32 %v2630_v23  ;;  %v2900_v25 = vmul.f32 1.442695, %v2897_v49 }
 0x511   :  { %5320 = vpow2.f32 %v2632_v18  ;;  %v3142_v20 = vpop.xlane.xlu1 %3141 }
 0x512   :  { %5322 = vpow2.f32 %v2777_v53  ;;  %v3144_v31 = vsub.f32 %v5869_v41, %v3142_v20 }
 0x513   :  { %5324 = vpow2.f32 %v2779_v58 }
 0x514   :  { %v5313_v36 = vpop.eup %5312  ;;  %5326 = vpow2.f32 %v2900_v25  ;;  %v3147_v30 = vmul.f32 1.442695, %v3144_v31 }
 0x515   :  { %v2387_v0 = vsel %vm2006_vm3, %v5313_v36, 0.0  ;;  %v2393_v44 = vpack.c.bf16 %v5311_v39, %v5313_v36 }
 0x516   :  { %2388 = vadd.xlane.f32.xlu0 %v2387_v0  ;;  %v3265_v37 = vpop.xlane.xlu1 %3264 }
 0x517   :  { %4709 = vmatmul.mubr.msk.bf16.vlgmr.msra.gmra.mrb[36].mxu0 %vm2006_vm3, %v2393_v44  ;;  %v3269_v35 = vsub.f32 %v5877_v52, %v3265_v37 }
 0x518   :  { %v5315_v5 = vpop.eup %5314  ;;  %4719 = vmatpush3.bf16.msra.mxu0 %v5650_v26  ;;  %4720 = vmatprep.mubr.msk.bf16.mxu0 %vm5499_vm0, %v5498_v17 }
 0x519   :  { %v5317_v7 = vpop.eup %5316  ;;  %v2513_v29 = vsel %vm2006_vm3, %v5315_v5, 0.0  ;;  %4730 = vmatprep.subr.bf16.mxu0 %v5498_v17 }
 0x51a   :  { %v5319_v16 = vpop.eup %5318  ;;  %2023 = vadd.xlane.f32.xlu0 %v2022_v48  ;;  %2514 = vadd.xlane.f32.xlu1 %v2513_v29  ;;  %v2516_v56 = vsel %vm2006_vm3, %v5317_v7, 0.0  ;;  %v2519_v3 = vpack.c.bf16 %v5317_v7, %v5315_v5  ;;  %v3268_v2 = vpop.xlane.xlu1 %3267 }
 0x51b   :  { %v5321_v50 = vpop.eup %5320  ;;  %v2634_v26 = vsel %vm2006_vm3, %v5319_v16, 0.0  ;;  %v3270_v41 = vsub.f32 %v5883_v61, %v3268_v2  ;;  %v3271_v61 = vmul.f32 1.442695, %v3269_v35  ;;  %v5234_v35 = vld [vmem:[#allocation7 + $0xe0] ss:$12 sps:$4 sm:$0xff]  }
 0x51c   :  { %v5323_v59 = vpop.eup %5322  ;;  %v2637_v46 = vsel %vm2006_vm3, %v5321_v50, 0.0  ;;  %v2640_v42 = vpack.c.bf16 %v5321_v50, %v5319_v16 }
 0x51d   :  { %v2781_v60 = vsel %vm2006_vm3, %v5323_v59, 0.0  ;;  %v5325_v62 = vpop.eup %5324  ;;  %v3273_v36 = vmul.f32 1.442695, %v3270_v41  ;;  %v5225_v41 = vld [vmem:[#allocation7 + $0xac] ss:$12 sps:$4 sm:$0xff]  }
 0x51e   :  { %2517 = vadd.xlane.f32.xlu0 %v2516_v56  ;;  %2635 = vadd.xlane.f32.xlu1 %v2634_v26  ;;  %v2784_v38 = vsel %vm2006_vm3, %v5325_v62, 0.0  ;;  %v5327_v39 = vpop.eup %5326  ;;  %v2787_v1 = vpack.c.bf16 %v5325_v62, %v5323_v59  ;;  %v2911_v24 = vpop.permute.xlu1 %2910 }
 0x51f   :  { %4721 = vmatmul.mubr.msk.bf16.vlgmr.msra.gmra.mrb[40].mxu0 %vm2006_vm3, %v2519_v3  ;;  %v2905_v4 = vsel %vm2006_vm3, %v5327_v39, 0.0 }
 0x520   :  { %4731 = vmatpush3.bf16.msra.mxu0 %v2643_v27  ;;  %4732 = vmatprep.mubr.msk.bf16.mxu0 %vm5499_vm0, %v5498_v17 }
 0x521   :  { %4742 = vmatprep.subr.bf16.mxu0 %v5498_v17 }
 0x522   :  { %2638 = vadd.xlane.f32.xlu0 %v2637_v46  ;;  %2782 = vadd.xlane.f32.xlu1 %v2781_v60 }
 0x526   :  { %2785 = vadd.xlane.f32.xlu0 %v2784_v38 }
 0x527   :  { %4733 = vmatmul.mubr.msk.bf16.vlgmr.msra.gmra.mrb[44].mxu0 %vm2006_vm3, %v2640_v42  ;;  %v5204_v42 = vld [vmem:[#allocation7 + $0x4] ss:$12 sps:$4 sm:$0xff]  }
 0x528   :  { %4743 = vmatpush3.bf16.msra.mxu0 %v5618_v43  ;;  %4744 = vmatprep.mubr.msk.bf16.mxu0 %vm5499_vm0, %v5498_v17 }
 0x529   :  { %4754 = vmatprep.subr.bf16.mxu0 %v5498_v17  ;;  %3974 = vmatprep.subr.bf16.mxu1 %v5204_v42  ;;  %v5241_v42 = vld [vmem:[#allocation7 + $0x108] ss:$12 sps:$4 sm:$0xff]  }
 0x52a   :  { %2906 = vadd.xlane.f32.xlu0 %v2905_v4  ;;  %v5207_v4 = vld [vmem:[#allocation7 + $0x1c] ss:$12 sps:$4 sm:$0xff]  }
 0x52f   :  { %4745 = vmatmul.mubr.msk.bf16.vlgmr.msra.gmra.mrb[48].mxu0 %vm2006_vm3, %v2787_v1  ;;  %v2892_v40 = vpop.xlane.xlu0 %2891 }
 0x530   :  { %v2896_v10 = vsub.f32 %v5889_v15, %v2892_v40  ;;  %4755 = vmatpush3.bf16.msra.mxu0 %v2911_v24  ;;  %4756 = vmatprep.mubr.msk.bf16.mxu0 %vm5499_vm0, %v5498_v17  ;;  %v5208_v24 = vld [vmem:[#allocation7 + $0x30] ss:$12 sps:$4 sm:$0xff]   ;;  %v5213_v40 = vld [vmem:[#allocation7 + $0x4c] ss:$12 sps:$4 sm:$0xff]  }
 0x531   :  { %4766 = vmatprep.subr.bf16.mxu0 %v5498_v17 }
 0x532   :  { %v2898_v43 = vmul.f32 1.442695, %v2896_v10  ;;  %v5211_v10 = vld [vmem:[#allocation7 + $0x48] ss:$12 sps:$4 sm:$0xff]  }
 0x533   :  { %v3018_v32 = vpop.xlane.xlu0 %3017 }
 0x534   :  { %5328 = vpow2.f32 %v2898_v43  ;;  %v3022_v33 = vsub.f32 %v5897_v6, %v3018_v32 }
 0x536   :  { %v3024_v21 = vmul.f32 1.442695, %v3022_v33 }
 0x537   :  { %v3021_v55 = vpop.xlane.xlu0 %3020 }
 0x538   :  { %5330 = vpow2.f32 %v3024_v21  ;;  %v3023_v54 = vsub.f32 %v5903_v12, %v3021_v55 }
 0x53a   :  { %v3026_v57 = vmul.f32 1.442695, %v3023_v54  ;;  %v5216_v54 = vld [vmem:[#allocation7 + $0x64] ss:$12 sps:$4 sm:$0xff]  }
 0x53b   :  { %v3139_v15 = vpop.xlane.xlu0 %3138 }
 0x53c   :  { %5332 = vpow2.f32 %v3026_v57  ;;  %v3143_v22 = vsub.f32 %v5909_v9, %v3139_v15  ;;  %v5214_v15 = vld [vmem:[#allocation7 + $0x60] ss:$12 sps:$4 sm:$0xff]  }
 0x53e   :  { %v5329_v23 = vpop.eup %5328  ;;  %v3145_v28 = vmul.f32 1.442695, %v3143_v22 }
 0x53f   :  { %v3386_v45 = vpop.xlane.xlu0 %3385  ;;  %v2902_v18 = vsel %vm2006_vm3, %v5329_v23, 0.0  ;;  %v2908_v53 = vpack.c.bf16 %v5327_v39, %v5329_v23  ;;  %v5202_v39 = vld [vmem:[#allocation7] ss:$12 sps:$4 sm:$0xff]  }
 0x540   :  { %5334 = vpow2.f32 %v3145_v28  ;;  %v3390_v6 = vsub.f32 %v5915_v14, %v3386_v45  ;;  %2903 = vadd.xlane.f32.xlu1 %v2902_v18  ;;  %3975 = vmatpush1.bf16.msra.mxu1 %v5202_v39  ;;  %v5219_v18 = vld [vmem:[#allocation7 + $0x7c] ss:$12 sps:$4 sm:$0xff]   ;;  %v5255_v39 = vld [vmem:[#allocation7 + $0x80] ss:$12 sps:$4 sm:$0xff]  }
 0x541   :  { %4757 = vmatmul.mubr.msk.bf16.vlgmr.msra.gmra.mrb[52].mxu0 %vm2006_vm3, %v2908_v53  ;;  %5336 = vpow2.f32 %v3147_v30  ;;  %3976 = vmatprep.subr.bf16.mxu1 %v5207_v4  ;;  %v5246_v4 = vld [vmem:[#allocation7 + $0x120] ss:$12 sps:$4 sm:$0xff]  }
 0x542   :  { %v5331_v12 = vpop.eup %5330  ;;  %v3392_v63 = vmul.f32 1.442695, %v3390_v6  ;;  %4767 = vmatpush3.bf16.msra.mxu0 %v5660_v47  ;;  %4768 = vmatprep.mubr.msk.bf16.mxu0 %vm5499_vm0, %v5498_v17  ;;  %v5222_v6 = vld [vmem:[#allocation7 + $0x94] ss:$12 sps:$4 sm:$0xff]  }
 0x543   :  { %v3028_v9 = vsel %vm2006_vm3, %v5331_v12, 0.0  ;;  %4778 = vmatprep.subr.bf16.mxu0 %v5498_v17  ;;  %v3158_v0 = vpop.permute.xlu0 %3157 }
 0x544   :  { %3029 = vadd.xlane.f32.xlu1 %v3028_v9  ;;  %5338 = vpow2.f32 %v3392_v63  ;;  %v5229_v63 = vld [vmem:[#allocation7 + $0xc8] ss:$12 sps:$4 sm:$0xff]  }
 0x545   :  { %5340 = vpow2.f32 %v3273_v36  ;;  %v5230_v9 = vld [vmem:[#allocation7 + $0x8] ss:$12 sps:$4 sm:$0xff]  }
 0x546   :  { %v5333_v14 = vpop.eup %5332  ;;  %5342 = vpow2.f32 %v3271_v61  ;;  %v5223_v61 = vld [vmem:[#allocation7 + $0xa8] ss:$12 sps:$4 sm:$0xff]  }
 0x547   :  { %v3031_v58 = vsel %vm2006_vm3, %v5333_v14, 0.0  ;;  %v3034_v49 = vpack.c.bf16 %v5333_v14, %v5331_v12  ;;  %v3405_v3 = vpop.permute.xlu0 %3404  ;;  %v5220_v12 = vld [vmem:[#allocation7 + $0x90] ss:$12 sps:$4 sm:$0xff]  }
 0x548   :  { %3032 = vadd.xlane.f32.xlu0 %v3031_v58 }
 0x549   :  { %4769 = vmatmul.mubr.msk.bf16.vlgmr.msra.gmra.mrb[56].mxu0 %vm2006_vm3, %v3034_v49 }
 0x54a   :  { %v5335_v47 = vpop.eup %5334  ;;  %4779 = vmatpush3.bf16.msra.mxu0 %v3158_v0  ;;  %4780 = vmatprep.mubr.msk.bf16.mxu0 %vm5499_vm0, %v5498_v17  ;;  %v5235_v0 = vld [vmem:[#allocation7 + $0x20] ss:$12 sps:$4 sm:$0xff]  }
 0x54b   :  { %v3149_v52 = vsel %vm2006_vm3, %v5335_v47, 0.0  ;;  %4790 = vmatprep.subr.bf16.mxu0 %v5498_v17  ;;  %v5337_v44 = vpop.eup %5336 }
 0x54c   :  { %3150 = vadd.xlane.f32.xlu1 %v3149_v52  ;;  %v3152_v25 = vsel %vm2006_vm3, %v5337_v44, 0.0  ;;  %v3155_v7 = vpack.c.bf16 %v5337_v44, %v5335_v47  ;;  %v5228_v44 = vld [vmem:[#allocation7 + $0xc4] ss:$12 sps:$4 sm:$0xff]  }
 0x54e   :  { %v5339_v48 = vpop.eup %5338 }
 0x54f   :  { %v3389_v5 = vpop.xlane.xlu1 %3388  ;;  %v3396_v20 = vsel %vm2006_vm3, %v5339_v48, 0.0  ;;  %v6015_v56 = vpop.eup %5340 }
 0x550   :  { %v3391_v29 = vsub.f32 %v5921_v19, %v3389_v5  ;;  %3153 = vadd.xlane.f32.xlu1 %v3152_v25  ;;  %v6017_v19 = vpop.eup %5342  ;;  %v5239_v5 = vld [vmem:[#allocation7 + $0xf8] ss:$12 sps:$4 sm:$0xff]  }
 0x551   :  { %4781 = vmatmul.mubr.msk.bf16.vlgmr.msra.gmra.mrb[60].mxu0 %vm2006_vm3, %v3155_v7  ;;  %v3281_v26 = vpack.c.bf16 %v6015_v56, %v6017_v19 }
 0x552   :  { %v3394_v16 = vmul.f32 1.442695, %v3391_v29  ;;  %4791 = vmatpush3.bf16.msra.mxu0 %v5654_v34  ;;  %4792 = vmatprep.mubr.msk.bf16.mxu0 %vm5499_vm0, %v5498_v17  ;;  %v5226_v29 = vld [vmem:[#allocation7 + $0xc0] ss:$12 sps:$4 sm:$0xff]  }
 0x553   :  { %v2021_v50 = vpop.xlane.xlu1 %2020  ;;  %4802 = vmatprep.subr.bf16.mxu0 %v5498_v17 }
 0x554   :  { %5344 = vpow2.f32 %v3394_v16  ;;  %3397 = vadd.xlane.f32.xlu1 %v3396_v20  ;;  %v5240_v16 = vld [vmem:[#allocation7 + $0x38] ss:$12 sps:$4 sm:$0xff]   ;;  %v5244_v20 = vld [vmem:[#allocation7 + $0x110] ss:$12 sps:$4 sm:$0xff]  }
 0x555   :  { %5346 = vrcp.f32 %v2021_v50  ;;  %v5233_v50 = vld [vmem:[#allocation7 + $0xdc] ss:$12 sps:$4 sm:$0xff]  }
 0x559   :  { %4793 = vmatmul.mubr.msk.bf16.vlgmr.msra.gmra.mrb[64].mxu0 %vm2006_vm3, %v3281_v26  ;;  %v5231_v26 = vld [vmem:[#allocation7 + $0xd8] ss:$12 sps:$4 sm:$0xff]  }
 0x55a   :  { %4803 = vmatpush3.bf16.msra.mxu0 %v3405_v3  ;;  %4804 = vmatprep.mubr.msk.bf16.mxu0 %vm5499_vm0, %v5498_v17  ;;  %v5205_v17 = vld [vmem:[#allocation7 + $0x18] ss:$12 sps:$4 sm:$0xff]   ;;  %v5245_v3 = vld [vmem:[#allocation7 + $0x50] ss:$12 sps:$4 sm:$0xff]  }
 0x55b   :  { %3977 = vmatpush1.bf16.msra.mxu1 %v5205_v17  ;;  %4606 = vmatprep.subr.bf16.mxu0 %v5229_v63  ;;  %v5259_v17 = vld [vmem:[#allocation7 + $0x158] ss:$12 sps:$4 sm:$0xff]  }
 0x55e   :  { %v5345_v34 = vpop.eup %5344 }
 0x55f   :  { %v5347_v59 = vpop.eup %5346  ;;  %v3399_v27 = vsel %vm2006_vm3, %v5345_v34, 0.0  ;;  %v3402_v46 = vpack.c.bf16 %v5345_v34, %v5339_v48  ;;  %v5238_v34 = vld [vmem:[#allocation7 + $0xf4] ss:$12 sps:$4 sm:$0xff]  }
 0x560   :  { %3400 = vadd.xlane.f32.xlu0 %v3399_v27  ;;  %v6026_v60 = vmul.f32 %v5347_v59, %v5783_v8  ;;  %v5210_v8 = vld [vmem:[#allocation7 + $0x34] ss:$12 sps:$4 sm:$0xff]   ;;  %v5236_v27 = vld [vmem:[#allocation7 + $0xf0] ss:$12 sps:$4 sm:$0xff]  }
 0x561   :  { %4805 = vmatmul.mubr.msk.bf16.vlgmr.msra.gmra.mrb[68].mxu0 %vm2006_vm3, %v3402_v46  ;;  %3978 = vmatprep.subr.bf16.mxu1 %v5210_v8  ;;  %v5249_v59 = vld [vmem:[#allocation7 + $0x128] ss:$12 sps:$4 sm:$0xff]  }
 0x562   :  { %3979 = vmatpush1.bf16.msra.mxu1 %v5208_v24  ;;  %4607 = vmatpush3.bf16.msra.mxu0 %v5230_v9  ;;  %v5250_v46 = vld [vmem:[#allocation7 + $0x68] ss:$12 sps:$4 sm:$0xff]   ;;  %v5264_v24 = vld [vmem:[#allocation7 + $0x170] ss:$12 sps:$4 sm:$0xff]  }
 0x563   :  { %3980 = vmatprep.subr.bf16.mxu1 %v5213_v40  ;;  %4608 = vmatprep.subr.bf16.mxu0 %v5234_v35  ;;  %v5253_v8 = vld [vmem:[#allocation7 + $0x13c] ss:$12 sps:$4 sm:$0xff]   ;;  %v5251_v40 = vld [vmem:[#allocation7 + $0x138] ss:$12 sps:$4 sm:$0xff]  }
 0x566   :  { %3981 = vmatpush1.bf16.msra.mxu1 %v5211_v10  ;;  %4609 = vmatpush3.bf16.msra.mxu0 %v5235_v0  ;;  %v5265_v10 = vld [vmem:[#allocation7 + $0xb0] ss:$12 sps:$4 sm:$0xff]  }
 0x567   :  { %3982 = vmatprep.subr.bf16.mxu1 %v5216_v54  ;;  %4610 = vmatprep.subr.bf16.mxu0 %v5239_v5  ;;  %v5263_v54 = vld [vmem:[#allocation7 + $0x16c] ss:$12 sps:$4 sm:$0xff]  }
 0x56a   :  { %3983 = vmatpush1.bf16.msra.mxu1 %v5214_v15  ;;  %4611 = vmatpush3.bf16.msra.mxu0 %v5240_v16 }
 0x56b   :  { %3984 = vmatprep.subr.bf16.mxu1 %v5219_v18  ;;  %4612 = vmatprep.subr.bf16.mxu0 %v5244_v20 }
 0x56c   :  { %v2142_v38 = vpop.xlane.xlu1 %2141 }
 0x56e   :  { %4613 = vmatpush3.bf16.msra.mxu0 %v5245_v3 }
 0x56f   :  { %4614 = vmatprep.subr.bf16.mxu0 %v5249_v59 }
 0x570   :  { %v2145_v1 = vpop.xlane.xlu1 %2144 }
 0x572   :  { %4615 = vmatpush3.bf16.msra.mxu0 %v5250_v46 }
 0x574   :  { %v2268_v32 = vpop.xlane.xlu1 %2267 }
 0x578   :  { %v2271_v62 = vpop.xlane.xlu0 %2270 }
 0x5a3   :  { %v6029_v37 = vpop.xlane.xlu0 %2388 }
 0x5a7   :  { %v2024_v2 = vpop.xlane.xlu0 %2023 }
 0x5a8   :  { %5348 = vrcp.f32 %v2024_v2  ;;  %v5248_v2 = vld [vmem:[#allocation7 + $0x124] ss:$12 sps:$4 sm:$0xff]  }
 0x5a9   :  { %5350 = vrcp.f32 %v2142_v38  ;;  %v5254_v38 = vld [vmem:[#allocation7 + $0x140] ss:$12 sps:$4 sm:$0xff]  }
 0x5aa   :  { %5352 = vrcp.f32 %v2145_v1  ;;  %4616 = vmatprep.subr.bf16.mxu0 %v5254_v38  ;;  %v5260_v1 = vld [vmem:[#allocation7 + $0x98] ss:$12 sps:$4 sm:$0xff]  }
 0x5ab   :  { %5354 = vrcp.f32 %v2268_v32  ;;  %4617 = vmatpush3.bf16.msra.mxu0 %v5255_v39  ;;  %v3278_v32 = vsel %vm2006_vm3, %v6015_v56, 0.0 }
 0x5ac   :  { %5356 = vrcp.f32 %v2271_v62  ;;  %v5243_v62 = vld [vmem:[#allocation7 + $0x10c] ss:$12 sps:$4 sm:$0xff]   ;;  %4618 = vmatprep.subr.bf16.mxu0 %v5259_v17 }
 0x5af   :  { %4619 = vmatpush3.bf16.msra.mxu0 %v5260_v1  ;;  %v5268_v1 = vld [vmem:[#allocation7 + $0x184] ss:$12 sps:$4 sm:$0xff]  }
 0x5b0   :  { %4620 = vmatprep.subr.bf16.mxu0 %v5264_v24 }
 0x5b2   :  { %v5349_v43 = vpop.eup %5348 }
 0x5b3   :  { %v6032_v33 = vmul.f32 %v5349_v43, %v5785_v13  ;;  %v5351_v31 = vpop.eup %5350  ;;  %v5217_v13 = vld [vmem:[#allocation7 + $0x78] ss:$12 sps:$4 sm:$0xff]   ;;  %v5258_v43 = vld [vmem:[#allocation7 + $0x154] ss:$12 sps:$4 sm:$0xff]   ;;  %4621 = vmatpush3.bf16.msra.mxu0 %v5265_v10 }
 0x5b4   :  { %v5353_v22 = vpop.eup %5352  ;;  %3985 = vmatpush1.bf16.msra.mxu1 %v5217_v13 }
 0x5b5   :  { %v2188_v21 = vpop.f32.mrb[28].mxu0  ;;  %v2074_v55 = vpack.c.bf16 %v6032_v33, %v6026_v60  ;;  %3986 = vmatprep.subr.bf16.mxu1 %v5222_v6  ;;  %v5355_v14 = vpop.eup %5354  ;;  %v5280_v60 = vld [vmem:[#allocation7 + $0x1cc] ss:$12 sps:$4 sm:$0xff]   ;;  %v5281_v33 = vld [vmem:[#allocation7 + $0x1d0] ss:$12 sps:$4 sm:$0xff]  }
 0x5b6   :  { %v4686_v57 = vpop.f32.mrb[29].mxu0  ;;  %v2197_v30 = vmul.f32 %v5351_v31, %v2188_v21  ;;  %v5357_v47 = vpop.eup %5356  ;;  %v5256_v21 = vld [vmem:[#allocation7 + $0x150] ss:$12 sps:$4 sm:$0xff]  }
 0x5b7   :  { %v2191_v23 = vpop.f32.mrb[30].mxu0  ;;  %v2392_v31 = vpop.xlane.xlu1 %2391  ;;  %v5261_v57 = vld [vmem:[#allocation7 + $0x168] ss:$12 sps:$4 sm:$0xff]  }
 0x5b8   :  { %v2198_v28 = vmul.f32 %v5353_v22, %v2191_v23  ;;  %v4687_v45 = vpop.f32.mrb[31].mxu0  ;;  %3987 = vmatpush1.bf16.msra.mxu1 %v5220_v12  ;;  %5358 = vrcp.f32 %v2392_v31  ;;  %v2518_v22 = vpop.xlane.xlu0 %2517 }
 0x5b9   :  { %3988 = vmatprep.subr.bf16.mxu1 %v5225_v41  ;;  %5360 = vrcp.f32 %v6029_v37 }
 0x5ba   :  { %v2199_v53 = vpack.c.bf16 %v2198_v28, %v2197_v30 }
 0x5bb   :  { %v2515_v15 = vpop.xlane.xlu1 %2514 }
 0x5bc   :  { %2695 = vrot.lane.b32.xlu0 %v2199_v53, %s5500_s2  ;;  %3989 = vmatpush1.bf16.msra.mxu1 %v5223_v61  ;;  %5362 = vrcp.f32 %v2515_v15  ;;  %v2639_v12 = vpop.xlane.xlu0 %2638 }
 0x5bd   :  { %3990 = vmatprep.subr.bf16.mxu1 %v5228_v44  ;;  %5364 = vrcp.f32 %v2518_v22 }
 0x5bf   :  { %v2310_v36 = vpop.f32.mrb[32].mxu0  ;;  %v2636_v6 = vpop.xlane.xlu1 %2635 }
 0x5c0   :  { %v6037_v58 = vmul.f32 %v5355_v14, %v2310_v36  ;;  %v4698_v49 = vpop.f32.mrb[33].mxu0  ;;  %3991 = vmatpush1.bf16.msra.mxu1 %v5226_v29  ;;  %5366 = vrcp.f32 %v2636_v6 }
 0x5c1   :  { %v2313_v52 = vpop.f32.mrb[34].mxu0  ;;  %3992 = vmatprep.subr.bf16.mxu1 %v5233_v50  ;;  %5368 = vrcp.f32 %v2639_v12 }
 0x5c2   :  { %v6039_v25 = vmul.f32 %v5357_v47, %v2313_v52  ;;  %v4699_v7 = vpop.f32.mrb[35].mxu0  ;;  %v5359_v56 = vpop.eup %5358 }
 0x5c3   :  { %v5361_v28 = vpop.eup %5360  ;;  %v2783_v49 = vpop.xlane.xlu1 %2782 }
 0x5c4   :  { %v2321_v48 = vpack.c.bf16 %v6039_v25, %v6037_v58  ;;  %3993 = vmatpush1.bf16.msra.mxu1 %v5231_v26  ;;  %v2786_v47 = vpop.xlane.xlu0 %2785  ;;  %5370 = vrcp.f32 %v2783_v49  ;;  %v5276_v58 = vld [vmem:[#allocation7 + $0x1b4] ss:$12 sps:$4 sm:$0xff]   ;;  %v5277_v25 = vld [vmem:[#allocation7 + $0x1b8] ss:$12 sps:$4 sm:$0xff]  }
 0x5c5   :  { %3994 = vmatprep.subr.bf16.mxu1 %v5238_v34  ;;  %5372 = vrcp.f32 %v2786_v47 }
 0x5c6   :  { %v5363_v37 = vpop.eup %5362 }
 0x5c7   :  { %v5365_v14 = vpop.eup %5364 }
 0x5c8   :  { %3995 = vmatpush1.bf16.msra.mxu1 %v5236_v27  ;;  %v2907_v17 = vpop.xlane.xlu0 %2906 }
 0x5c9   :  { %3996 = vmatprep.subr.bf16.mxu1 %v5243_v62  ;;  %5374 = vrcp.f32 %v2907_v17 }
 0x5ca   :  { %v5367_v5 = vpop.eup %5366 }
 0x5cb   :  { %v5369_v29 = vpop.eup %5368 }
 0x5cc   :  { %3997 = vmatpush1.bf16.msra.mxu1 %v5241_v42 }
 0x5cd   :  { %3998 = vmatprep.subr.bf16.mxu1 %v5248_v2 }
 0x5ce   :  { %v5371_v34 = vpop.eup %5370 }
 0x5cf   :  { %v5373_v62 = vpop.eup %5372 }
 0x5d0   :  { %3999 = vmatpush1.bf16.msra.mxu1 %v5246_v4  ;;  %v2904_v4 = vpop.xlane.xlu1 %2903 }
 0x5d1   :  { %4000 = vmatprep.subr.bf16.mxu1 %v5253_v8  ;;  %5376 = vrcp.f32 %v2904_v4  ;;  %v6065_v8 = vld [vmem:[#allocation7 + $0x188] ss:$12 sps:$4 sm:$0xff]  }
 0x5d2   :  { %4808 = vmatprep.subr.bf16.mxu0 %v6065_v8 }
 0x5d4   :  { %4001 = vmatpush1.bf16.msra.mxu1 %v5251_v40  ;;  %v3030_v24 = vpop.xlane.xlu1 %3029 }
 0x5d5   :  { %4002 = vmatprep.subr.bf16.mxu1 %v5258_v43  ;;  %v3033_v40 = vpop.xlane.xlu0 %3032  ;;  %5378 = vrcp.f32 %v3030_v24 }
 0x5d6   :  { %5380 = vrcp.f32 %v3033_v40 }
 0x5d8   :  { %4003 = vmatpush1.bf16.msra.mxu1 %v5256_v21  ;;  %v5375_v21 = vpop.eup %5374 }
 0x5d9   :  { %4004 = vmatprep.subr.bf16.mxu1 %v5263_v54  ;;  %v3151_v10 = vpop.xlane.xlu1 %3150 }
 0x5da   :  { %5382 = vrcp.f32 %v3151_v10 }
 0x5db   :  { %3279 = vadd.xlane.f32.xlu0 %v3278_v32  ;;  %v3275_v32 = vsel %vm2006_vm3, %v6017_v19, 0.0  ;;  %v5377_v31 = vpop.eup %5376 }
 0x5dc   :  { %4005 = vmatpush1.bf16.msra.mxu1 %v5261_v57 }
 0x5dd   :  { %4027 = vmatprep.subr.bf16.mxu1 %v5268_v1 }
 0x5ea   :  { %v2435_v23 = vpop.f32.mrb[36].mxu0 }
 0x5eb   :  { %v4710_v30 = vpop.f32.mrb[37].mxu0  ;;  %v2444_v13 = vmul.f32 %v5361_v28, %v2435_v23  ;;  %v5379_v28 = vpop.eup %5378 }
 0x5ec   :  { %v2438_v45 = vpop.f32.mrb[38].mxu0  ;;  %v5381_v19 = vpop.eup %5380 }
 0x5ed   :  { %v2445_v18 = vmul.f32 %v5359_v56, %v2438_v45  ;;  %v4711_v53 = vpop.f32.mrb[39].mxu0  ;;  %v3154_v56 = vpop.xlane.xlu1 %3153 }
 0x5ee   :  { %5384 = vrcp.f32 %v3154_v56  ;;  %v5293_v56 = vld [vmem:[#allocation7 + $0x218] ss:$12 sps:$4 sm:$0xff]  }
 0x5ef   :  { %v2446_v41 = vpack.c.bf16 %v2445_v18, %v2444_v13 }
 0x5f1   :  { %2698 = vrot.lane.b32.xlu1 %v2446_v41, %s5500_s2 }
 0x5f2   :  { %v2557_v63 = vpop.f32.mrb[40].mxu0 }
 0x5f3   :  { %v6047_v9 = vmul.f32 %v5363_v37, %v2557_v63  ;;  %v4722_v35 = vpop.f32.mrb[41].mxu0  ;;  %v5383_v63 = vpop.eup %5382 }
 0x5f4   :  { %v2560_v36 = vpop.f32.mrb[42].mxu0 }
 0x5f5   :  { %v6049_v61 = vmul.f32 %v5365_v14, %v2560_v36  ;;  %v4723_v0 = vpop.f32.mrb[43].mxu0 }
 0x5f7   :  { %v2568_v52 = vpack.c.bf16 %v6049_v61, %v6047_v9 }
 0x5f8   :  { %v5385_v14 = vpop.eup %5384 }
 0x5fa   :  { %v2682_v44 = vpop.f32.mrb[44].mxu0 }
 0x5fb   :  { %v4734_v7 = vpop.f32.mrb[45].mxu0  ;;  %v6053_v50 = vmul.f32 %v5367_v5, %v2682_v44  ;;  %v3398_v44 = vpop.xlane.xlu1 %3397 }
 0x5fc   :  { %v2685_v16 = vpop.f32.mrb[46].mxu0  ;;  %v3401_v5 = vpop.xlane.xlu0 %3400  ;;  %5386 = vrcp.f32 %v3398_v44 }
 0x5fd   :  { %v6055_v20 = vmul.f32 %v5369_v29, %v2685_v16  ;;  %v4735_v26 = vpop.f32.mrb[47].mxu0  ;;  %5388 = vrcp.f32 %v3401_v5 }
 0x5ff   :  { %v2693_v3 = vpack.c.bf16 %v6055_v20, %v6053_v50  ;;  %v5272_v20 = vld [vmem:[#allocation7 + $0x19c] ss:$12 sps:$4 sm:$0xff]  }
 0x602   :  { %v2825_v59 = vpop.f32.mrb[48].mxu0 }
 0x603   :  { %v6059_v27 = vmul.f32 %v5371_v34, %v2825_v59  ;;  %v4746_v46 = vpop.f32.mrb[49].mxu0 }
 0x604   :  { %v2828_v38 = vpop.f32.mrb[50].mxu0 }
 0x605   :  { %v6061_v42 = vmul.f32 %v5373_v62, %v2828_v38  ;;  %v4747_v39 = vpop.f32.mrb[51].mxu0 }
 0x606   :  { %v5387_v46 = vpop.eup %5386 }
 0x607   :  { %v2836_v2 = vpack.c.bf16 %v6061_v42, %v6059_v27  ;;  %v5389_v38 = vpop.eup %5388 }
 0x614   :  { %v2950_v43 = vpop.f32.mrb[52].mxu0 }
 0x615   :  { %v4758_v54 = vpop.f32.mrb[53].mxu0  ;;  %3276 = vadd.xlane.f32.xlu1 %v3275_v32  ;;  %v2959_v15 = vmul.f32 %v5377_v31, %v2950_v43  ;;  %v5266_v43 = vld [vmem:[#allocation7 + $0x180] ss:$12 sps:$4 sm:$0xff]   ;;  %v5285_v31 = vld [vmem:[#allocation7 + $0x1e8] ss:$12 sps:$4 sm:$0xff]  }
 0x616   :  { %v2953_v57 = vpop.f32.mrb[54].mxu0  ;;  %v5284_v54 = vld [vmem:[#allocation7 + $0x1e4] ss:$12 sps:$4 sm:$0xff]  }
 0x617   :  { %v2960_v22 = vmul.f32 %v5375_v21, %v2953_v57  ;;  %v4759_v23 = vpop.f32.mrb[55].mxu0  ;;  %v5270_v21 = vld [vmem:[#allocation7 + $0x198] ss:$12 sps:$4 sm:$0xff]   ;;  %v5288_v57 = vld [vmem:[#allocation7 + $0x1fc] ss:$12 sps:$4 sm:$0xff]  }
 0x618   :  { %v5292_v23 = vld [vmem:[#allocation7 + $0x214] ss:$12 sps:$4 sm:$0xff]  }
 0x619   :  { %v2961_v30 = vpack.c.bf16 %v2960_v22, %v2959_v15  ;;  %v5289_v15 = vld [vmem:[#allocation7 + $0x200] ss:$12 sps:$4 sm:$0xff]   ;;  %v5286_v22 = vld [vmem:[#allocation7 + $0x1f8] ss:$12 sps:$4 sm:$0xff]  }
 0x61b   :  { %3457 = vrot.lane.b32.xlu0 %v2961_v30, %s5500_s2  ;;  %v5290_v30 = vld [vmem:[#allocation7 + $0x210] ss:$12 sps:$4 sm:$0xff]  }
 0x61c   :  { %v3072_v45 = vpop.f32.mrb[56].mxu0 }
 0x61d   :  { %v6071_v13 = vmul.f32 %v5379_v28, %v3072_v45  ;;  %v4770_v18 = vpop.f32.mrb[57].mxu0  ;;  %v5296_v28 = vld [vmem:[#allocation7 + $0x22c] ss:$12 sps:$4 sm:$0xff]   ;;  %v5297_v45 = vld [vmem:[#allocation7 + $0x230] ss:$12 sps:$4 sm:$0xff]  }
 0x61e   :  { %v3075_v53 = vpop.f32.mrb[58].mxu0  ;;  %v5294_v18 = vld [vmem:[#allocation7 + $0x228] ss:$12 sps:$4 sm:$0xff]  }
 0x61f   :  { %v6073_v6 = vmul.f32 %v5381_v19, %v3075_v53  ;;  %v4771_v12 = vpop.f32.mrb[59].mxu0 }
 0x621   :  { %v3083_v41 = vpack.c.bf16 %v6073_v6, %v6071_v13 }
 0x624   :  { %v3197_v37 = vpop.f32.mrb[60].mxu0 }
 0x625   :  { %v4782_v35 = vpop.f32.mrb[61].mxu0  ;;  %v3206_v49 = vmul.f32 %v5383_v63, %v3197_v37 }
 0x626   :  { %v3200_v36 = vpop.f32.mrb[62].mxu0 }
 0x627   :  { %v3207_v0 = vmul.f32 %v5385_v14, %v3200_v36  ;;  %v4783_v47 = vpop.f32.mrb[63].mxu0 }
 0x629   :  { %v3208_v7 = vpack.c.bf16 %v3207_v0, %v3206_v49 }
 0x62b   :  { %3460 = vrot.lane.b32.xlu1 %v3208_v7, %s5500_s2 }
 0x62c   :  { %v6078_v29 = vpop.f32.mrb[64].mxu0 }
 0x62d   :  { %v4794_v16 = vpop.f32.mrb[65].mxu0 }
 0x62e   :  { %v6080_v26 = vpop.f32.mrb[66].mxu0  ;;  %v2696_v40 = vpop.permute.xlu0 %2695 }
 0x62f   :  { %v4795_v34 = vpop.f32.mrb[67].mxu0  ;;  %2701 = vrot.lane.b32.xlu1 %v2693_v3, %s5500_s2  ;;  %v5273_v3 = vld [vmem:[#allocation7 + $0x1a0] ss:$12 sps:$4 sm:$0xff]   ;;  %v2705_v32 = vsel %vm1956_vm1, %v2074_v55, %v2696_v40  ;;  %v5278_v55 = vld [vmem:[#allocation7 + $0x1c8] ss:$12 sps:$4 sm:$0xff]  }
 0x630   :  { %v3581_v34 = vsub.s32 1, %v5664_v51 }
 0x634   :  { %v3444_v59 = vpop.f32.mrb[68].mxu0 }
 0x635   :  { %v4806_v62 = vpop.f32.mrb[69].mxu0  ;;  %v3453_v17 = vmul.f32 %v5387_v46, %v3444_v59  ;;  %v3585_v59 = vsub.s32 2, %v5664_v51 }
 0x636   :  { %v3447_v39 = vpop.f32.mrb[70].mxu0 }
 0x637   :  { %v3454_v4 = vmul.f32 %v5389_v38, %v3447_v39  ;;  %v4807_v1 = vpop.f32.mrb[71].mxu0 }
 0x639   :  { %v3455_v24 = vpack.c.bf16 %v3454_v4, %v3453_v17 }
 0x63b   :  { %3463 = vrot.lane.b32.xlu1 %v3455_v24, %s5500_s2 }
 0x663   :  { %v2699_v10 = vpop.permute.xlu1 %2698 }
 0x664   :  { %v2709_v50 = vsel %vm1956_vm1, %v2321_v48, %v2699_v10  ;;  %v5274_v48 = vld [vmem:[#allocation7 + $0x1b0] ss:$12 sps:$4 sm:$0xff]  }
 0x665   :  { %4006 = vmatprep.mubr.bf16.mxu1 %v2709_v50  ;;  %4112 = vmatprep.mubr.bf16.mxu0 %v2709_v50 }
 0x666   :  { %4007 = vmatmul.mubr.bf16.vlgmr.msra.gmra.mrb[68].mxu1 %v2705_v32  ;;  %4113 = vmatmul.mubr.bf16.vlgmr.msra.gmra.mrb[72].mxu0 %v2705_v32 }
 0x667   :  { %4028 = vmatpush1.bf16.msra.mxu1 %v5266_v43  ;;  %4809 = vmatpush3.bf16.msra.mxu0 %v6065_v8  ;;  %v5282_v8 = vld [vmem:[#allocation7 + $0x1e0] ss:$12 sps:$4 sm:$0xff]  }
 0x668   :  { %4029 = vmatprep.subr.bf16.mxu1 %v5272_v20  ;;  %4810 = vmatprep.subr.bf16.mxu0 %v5273_v3  ;;  %v3280_v19 = vpop.xlane.xlu0 %3279 }
 0x669   :  { %5390 = vrcp.f32 %v3280_v19 }
 0x66b   :  { %4030 = vmatpush1.bf16.msra.mxu1 %v5270_v21  ;;  %4811 = vmatpush3.bf16.msra.mxu0 %v5273_v3 }
 0x66c   :  { %4031 = vmatprep.subr.bf16.mxu1 %v5276_v58  ;;  %4812 = vmatprep.subr.bf16.mxu0 %v5277_v25 }
 0x66f   :  { %4032 = vmatpush1.bf16.msra.mxu1 %v5274_v48  ;;  %4813 = vmatpush3.bf16.msra.mxu0 %v5277_v25 }
 0x670   :  { %4033 = vmatprep.subr.bf16.mxu1 %v5280_v60  ;;  %4814 = vmatprep.subr.bf16.mxu0 %v5281_v33 }
 0x673   :  { %4034 = vmatpush1.bf16.msra.mxu1 %v5278_v55  ;;  %4815 = vmatpush3.bf16.msra.mxu0 %v5281_v33  ;;  %v5391_v36 = vpop.eup %5390 }
 0x674   :  { %4035 = vmatprep.subr.bf16.mxu1 %v5284_v54  ;;  %4816 = vmatprep.subr.bf16.mxu0 %v5285_v31  ;;  %v3329_v49 = vmul.f32 %v5391_v36, %v6080_v26 }
 0x677   :  { %4036 = vmatpush1.bf16.msra.mxu1 %v5282_v8  ;;  %4817 = vmatpush3.bf16.msra.mxu0 %v5285_v31 }
 0x678   :  { %4037 = vmatprep.subr.bf16.mxu1 %v5288_v57  ;;  %4818 = vmatprep.subr.bf16.mxu0 %v5289_v15 }
 0x67b   :  { %4038 = vmatpush1.bf16.msra.mxu1 %v5286_v22  ;;  %4819 = vmatpush3.bf16.msra.mxu0 %v5289_v15 }
 0x67c   :  { %4039 = vmatprep.subr.bf16.mxu1 %v5292_v23  ;;  %4820 = vmatprep.subr.bf16.mxu0 %v5293_v56 }
 0x67f   :  { %4040 = vmatpush1.bf16.msra.mxu1 %v5290_v30  ;;  %4821 = vmatpush3.bf16.msra.mxu0 %v5293_v56 }
 0x680   :  { %4041 = vmatprep.subr.bf16.mxu1 %v5296_v28  ;;  %4822 = vmatprep.subr.bf16.mxu0 %v5297_v45 }
 0x683   :  { %4042 = vmatpush1.bf16.msra.mxu1 %v5294_v18  ;;  %4823 = vmatpush3.bf16.msra.mxu0 %v5297_v45 }
 0x68d   :  { %v3458_v12 = vpop.permute.xlu0 %3457 }
 0x68e   :  { %v3467_v35 = vsel %vm1956_vm1, %v2836_v2, %v3458_v12 }
 0x6a2   :  { %v3277_v53 = vpop.xlane.xlu1 %3276 }
 0x6a3   :  { %5392 = vrcp.f32 %v3277_v53 }
 0x6a6   :  { %v3461_v37 = vpop.permute.xlu1 %3460 }
 0x6a7   :  { %v3471_v63 = vsel %vm1956_vm1, %v3083_v41, %v3461_v37 }
 0x6a8   :  { %4016 = vmatprep.mubr.bf16.mxu1 %v3471_v63  ;;  %4120 = vmatprep.mubr.bf16.mxu0 %v3471_v63 }
 0x6a9   :  { %4017 = vmatmul.mubr.bf16.gmra.mrb[72].mxu1 %v3467_v35  ;;  %4121 = vmatmul.mubr.bf16.gmra.mrb[76].mxu0 %v3467_v35 }
 0x6aa   :  { %v2702_v14 = vpop.permute.xlu1 %2701  ;;  %4059 = vmatprep.mubr.bf16.mxu1 %v5497_v11 }
 0x6ab   :  { %v2713_v13 = vsel %vm1956_vm1, %v2568_v52, %v2702_v14 }
 0x6ac   :  { %4824 = vmatprep.mubr.bf16.mxu0 %v2713_v13 }
 0x6ad   :  { %v5393_v6 = vpop.eup %5392 }
 0x6ae   :  { %v3328_v41 = vmul.f32 %v5393_v6, %v6078_v29  ;;  %v3464_v42 = vpop.permute.xlu1 %3463  ;;  %v3577_v29 = vsub.s32 0, %v5664_v51 }
 0x6b0   :  { %v3330_v27 = vpack.c.bf16 %v3329_v49, %v3328_v41 }
 0x6b1   :  { %4060 = vmatmul.mubr.bf16.vlgmr.msra.gmra.mrb[68].mxu1 %v2713_v13 }
 0x6b2   :  { %v3475_v2 = vsel %vm1956_vm1, %v3330_v27, %v3464_v42  ;;  %4069 = vmatprep.mubr.bf16.mxu1 %v5497_v11  ;;  %v3573_v11 = vld [vmem:[%s6137_s3] sm:$0x7]  ;;  %s5501_s3 = smov [#allocation8]  }
 0x6b3   :  { %4825 = vmatmul.mubr.bf16.vlgmr.msra.gmra.mrb[80].mxu0 %v3475_v2  ;;  %v3578_v38 = vrot.slane %v3573_v11, %v3577_v29  ;;  %v3582_v39 = vrot.slane %v3573_v11, %v3581_v34  ;;  %v3586_v17 = vrot.slane %v3573_v11, %v3585_v59  ;;  %s4195_s5 = sshll.u32 %s5501_s3, 4  ;;  %s4196_s5 = int_to_ptr.vmem [resolvable:$true] %s4195_s5 }
 0x6b4   :  { %s5460_s6 = scalar_lea.vmem %s4196_s5, 1536  ;;  %p5465_p11 = scmp.lt.s32.totalorder %s4196_s5, %s4196_s5 }
 0x6b5   :  { %p5461_p10 = scmp.ne.s32.totalorder %s4196_s5, %s5460_s6  ;;  %p5466_p12 = scmp.lt.s32.totalorder %s5460_s6, %s5460_s6 }
 0x6b7   :  { %p5467_p13 = por %p5466_p12, %p5465_p11 }
 0x6b9   :  { %4070 = vmatmul.mubr.bf16.gmra.mrb[72].mxu1 %v3475_v2  ;;  %p5468_p0 = pnand %p5467_p13, %p5461_p10 }
 0x739   :  { %v4622_v0 = vpop.f32.mrb[72].mxu0 }
 0x73a   :  { %v4623_v47 = vpop.f32.mrb[73].mxu0 }
 0x73b   :  { %v4624_v9 = vadd.f32 %v4623_v47, %v4622_v0  ;;  %v4625_v61 = vpop.f32.mrb[74].mxu0 }
 0x73c   :  { %v4626_v52 = vpop.f32.mrb[75].mxu0 }
 0x73d   :  { %v4627_v44 = vadd.f32 %v4626_v52, %v4625_v61  ;;  %v4115_v20 = vadd.f32 %v4624_v9, %v3586_v17 }
 0x73f   :  { %v4118_v33 = vadd.f32 %v4627_v44, %v3586_v17 }
 0x77c   :  { %v4628_v5 = vpop.f32.mrb[76].mxu0 }
 0x77d   :  { %v4629_v7 = vpop.f32.mrb[77].mxu0 }
 0x77e   :  { %v4630_v16 = vadd.f32 %v4629_v7, %v4628_v5  ;;  %v4631_v26 = vpop.f32.mrb[78].mxu0 }
 0x77f   :  { %v4632_v46 = vpop.f32.mrb[79].mxu0 }
 0x780   :  { %v4633_v62 = vadd.f32 %v4632_v46, %v4631_v26  ;;  %v4123_v40 = vadd.f32 %v4630_v16, %v3586_v17 }
 0x782   :  { %v4126_v58 = vadd.f32 %v4633_v62, %v3586_v17 }
 0x784   :  { %v4061_v4 = vpop.f32.mrb[68].mxu1 }
 0x785   :  { %v4828_v1 = vadd.f32 %v4061_v4, %v3578_v38  ;;  %v4063_v24 = vpop.f32.mrb[69].mxu1 }
 0x786   :  { %v4829_v10 = vadd.f32 %v4063_v24, %v3582_v39  ;;  %v4065_v43 = vpop.f32.mrb[70].mxu1  ;;  %v4826_v50 = vpop.f32.mrb[80].mxu0 }
 0x787   :  { %4178 = vst [vmem:[#allocation8] sm:$0xff] %v4828_v1  ;;  %v4830_v3 = vadd.f32 %v4065_v43, %v3578_v38  ;;  %v4172_v51 = vadd.f32 %v4826_v50, %v4123_v40  ;;  %v4067_v32 = vpop.f32.mrb[71].mxu1  ;;  %v4163_v21 = vpop.f32.mrb[81].mxu0 }
 0x788   :  { %4179 = vst [vmem:[#allocation8 + $0x8] sm:$0xff] %v4829_v10  ;;  %v4831_v25 = vadd.f32 %v4067_v32, %v3582_v39  ;;  %v4164_v48 = vadd.f32 %v4163_v21, %v4115_v20  ;;  %v4827_v60 = vpop.f32.mrb[82].mxu0 }
 0x789   :  { %4181 = vst [vmem:[#allocation8 + $0x18] sm:$0xff] %v4830_v3  ;;  %4186 = vst [vmem:[#allocation8 + $0x40] sm:$0xff] %v4172_v51  ;;  %v4175_v55 = vadd.f32 %v4827_v60, %v4126_v58  ;;  %v4166_v54 = vpop.f32.mrb[83].mxu0 }
 0x78a   :  { %4182 = vst [vmem:[#allocation8 + $0x20] sm:$0xff] %v4831_v25  ;;  %4180 = vst [vmem:[#allocation8 + $0x10] sm:$0xff] %v4164_v48  ;;  %v4167_v31 = vadd.f32 %v4166_v54, %v4118_v33 }
 0x78b   :  { %4189 = vst [vmem:[#allocation8 + $0x58] sm:$0xff] %v4175_v55 }
 0x78c   :  { %4183 = vst [vmem:[#allocation8 + $0x28] sm:$0xff] %v4167_v31  ;;  %v4071_v8 = vpop.f32.mrb[72].mxu1 }
 0x78d   :  { %v4832_v57 = vadd.f32 %v4071_v8, %v3578_v38  ;;  %v4073_v15 = vpop.f32.mrb[73].mxu1 }
 0x78e   :  { %v4833_v22 = vadd.f32 %v4073_v15, %v3582_v39  ;;  %v4075_v23 = vpop.f32.mrb[74].mxu1 }
 0x78f   :  { %4184 = vst [vmem:[#allocation8 + $0x30] sm:$0xff] %v4832_v57  ;;  %v4834_v56 = vadd.f32 %v4075_v23, %v3578_v38  ;;  %v4077_v30 = vpop.f32.mrb[75].mxu1 }
 0x790   :  { %4185 = vst [vmem:[#allocation8 + $0x38] sm:$0xff] %v4833_v22  ;;  %v4835_v28 = vadd.f32 %v4077_v30, %v3582_v39 }
 0x791   :  { %4187 = vst [vmem:[#allocation8 + $0x48] sm:$0xff] %v4834_v56 }
 0x792   :  { %4188 = vst [vmem:[#allocation8 + $0x50] sm:$0xff] %v4835_v28 }
 0x793   :  { %5471 = shalt.err (!%p5468_p0)
}
 0x794   :  { %s5472_s9 = scalar_lea.hbm %s6138_s4, 1536 }
 0x795   :  { %p5473_p1 = scmp.ne.s32.totalorder %s6138_s4, %s5472_s9  ;;  %p5476_p2 = scmp.lt.u32.totalorder %s5472_s9, %s6138_s4 }
 0x797   :  { %p5478_p3 = pnand %p5476_p2, %p5473_p1 }
 0x799   :  { %5481 = shalt.err (!%p5478_p3)
}
 0x79a   :  { %4201 = dma.vmem_to_hbm [thread:$0]  %s4196_s5, 1536, %s6138_s4, [#allocation4], %s5492_s1, %s5492_s1, %s5493_s13  }
 0x79b   :  { %5486 = dma.done.wait [#allocation4], 1536  }
 0x79c   :  { %5487 = vsyncadd [#allocation4], 4294965760 }
 0x79d   :  { %4205 = vsyncpa [#allocation3], 1 }
 0x79e   :  { %4206 = vsyncpa [#allocation6], 1 }
 0x79f   :  { %4207 = vsyncpa [#allocation4], 1 }

</bundles_post_ra>
